<compile_context>
chip_gen: v6e
topology: v6e:2x2x1
jax: 0.10.0
libtpu: 0.0.40
codegen_flags: <defaults>
</compile_context>

<pallas_src>
import functools

import jax
import jax.numpy as jnp
from jax.experimental import pallas as pl
from jax.experimental.pallas import tpu as pltpu


def _round_up(x, m):
    return ((x + m - 1) // m) * m


def _pick_batch_tile(B, min_steps=4, max_tile=8192):
    """Largest 8-aligned batch tile that keeps >= min_steps grid steps.

    >= 4 steps gives 2 steps per TensorCore on v7x (so prologue DMA /
    epilogue writeback overlap) and >= 2 steps on single-TC v5e/v6e for the
    BlockSpec double-buffer pipeline; tile capped at 8192 rows (per-tile VMEM
    stays tiny at these feature widths).
    """
    tile = -(-B // min_steps)          # ceil(B / min_steps)
    tile = _round_up(max(tile, 8), 8)  # f32 sublane multiple
    return min(tile, max_tile)


def _layer_dims(hidden_sizes, latent_dim, n_obs):
    """(in, out) per linear layer, in kernel consumption order."""
    dims = []
    in_size = 1
    for h in hidden_sizes:                     # encoder
        dims.append((in_size, h))
        in_size = h
    dims.append((in_size, 2 * latent_dim))     # fused [fc_mu | fc_logsigma]
    in_size = latent_dim
    for h in reversed(hidden_sizes):           # decoder hidden
        dims.append((in_size, h))
        in_size = h
    dims.append((in_size, n_obs))              # decoder output
    return tuple(dims)


def _vae_kernel(layer_dims, n_enc, n_dec, latent_dim, n_obs, used, out_width,
                row_block, in_ref, w_ref, b_ref, out_ref):
    """Whole VAE forward for one batch tile, entirely in VMEM.

    in_ref : (tile, latent_dim + 1) fused per-row stream [eps | x]
    w_ref  : packed weight slab; layer L lives at rows
             [L*row_block : L*row_block + in_dim], lanes [0 : out_dim]
    b_ref  : packed f32 bias slab; layer L bias at row L, lanes [0 : out_dim]
    out_ref: (tile, out_width) lane-dense packed [recon | z | mu | sigma | 0pad]
    """
    eps = in_ref[:, 0:latent_dim]                       # f32
    x = in_ref[:, latent_dim:latent_dim + 1]            # f32 (tile, 1)

    def w_of(L, din, dout):
        r0 = L * row_block
        return w_ref[r0:r0 + din, 0:dout]

    def b_of(L, dout):
        return b_ref[L:L + 1, 0:dout]

    def linear(h, L):
        din, dout = layer_dims[L]
        w = w_of(L, din, dout)
        # bf16 MXU operands, f32 accumulate; bias add stays f32.
        return jnp.dot(h.astype(w.dtype), w,
                       preferred_element_type=jnp.float32) + b_of(L, dout)

    # --- encoder layer 0: in_dim = 1 -> pure VPU broadcast, no K=1 matmul ---
    _, d0 = layer_dims[0]
    h = jnp.maximum(x * w_of(0, 1, d0).astype(jnp.float32) + b_of(0, d0), 0.0)

    # --- remaining encoder layers ---
    L = 1
    for _ in range(n_enc - 1):
        h = jnp.maximum(linear(h, L), 0.0)
        L += 1

    # --- fused heads: one matmul for [mu | logsigma] ---
    heads = linear(h, L)
    L += 1
    mu = heads[:, :latent_dim]
    logsigma = heads[:, latent_dim:2 * latent_dim]

    # --- reparameterise: z = mu + exp(logsigma) * eps ---
    sigma = jnp.exp(logsigma)
    z = mu + sigma * eps

    # --- decoder MLP ---
    d = z
    for _ in range(n_dec):
        d = jnp.maximum(linear(d, L), 0.0)
        L += 1
    recon = linear(d, L)                                # (tile, n_obs)

    # --- direct lane-offset sub-stores (no concat, no full-width temp) ---
    out_ref[:, 0:n_obs] = recon
    out_ref[:, n_obs:n_obs + latent_dim] = z
    out_ref[:, n_obs + latent_dim:n_obs + 2 * latent_dim] = mu
    out_ref[:, n_obs + 2 * latent_dim:used] = sigma
    if out_width > used:
        # Zero the pad lanes once per block so the lane-dense writeback never
        # ships uninitialized VMEM back to HBM.
        out_ref[:, used:out_width] = jnp.zeros(
            (out_ref.shape[0], out_width - used), jnp.float32)


def _init_linear(key, in_dim, out_dim):
    """PyTorch nn.Linear default init: U(-1/sqrt(in), 1/sqrt(in))."""
    kw, kb = jax.random.split(key)
    bound = 1.0 / jnp.sqrt(jnp.float32(in_dim))
    # Stored already transposed: (in, out).  Bias kept 2D (1, out).
    w_t = jax.random.uniform(kw, (in_dim, out_dim), jnp.float32, -bound, bound)
    b = jax.random.uniform(kb, (1, out_dim), jnp.float32, -bound, bound)
    return w_t, b


def make_vae_params(key, hidden_sizes, latent_dim, n_obs,
                    param_dtype=jnp.bfloat16):
    """Pack all layer weights/biases into two slabs.

    Weight slab: (n_layers * row_block, col_width) in `param_dtype`; layer L's
    pre-transposed (in, out) weight occupies rows [L*row_block : +in], lanes
    [0 : out].  Bias slab: (rows padded to 8, col_width) f32; layer L's bias
    at row L.  fc_mu / fc_logsigma are initialized independently
    (PyTorch-equivalent) and concatenated into one fused head.  The unused
    latent_out head is omitted (DiscreteVAE.forward discards it).
    """
    dims = _layer_dims(hidden_sizes, latent_dim, n_obs)
    n_layers = len(dims)
    max_in = max(d for d, _ in dims)
    max_out = max(o for _, o in dims)
    row_block = _round_up(max_in, 16)              # bf16 sublane-pack aligned
    col_width = _round_up(max(max_out, 128), 128)  # lane-dense slab

    w_slab = jnp.zeros((n_layers * row_block, col_width), param_dtype)
    b_slab = jnp.zeros((_round_up(n_layers, 8), col_width), jnp.float32)

    keys = iter(jax.random.split(key, 2 * n_layers + 2))
    head_idx = len(hidden_sizes)
    for L, (din, dout) in enumerate(dims):
        if L == head_idx:
            w_mu, b_mu = _init_linear(next(keys), din, latent_dim)
            w_ls, b_ls = _init_linear(next(keys), din, latent_dim)
            w = jnp.concatenate([w_mu, w_ls], axis=1)
            b = jnp.concatenate([b_mu, b_ls], axis=1)
        else:
            w, b = _init_linear(next(keys), din, dout)
        w_slab = w_slab.at[L * row_block:L * row_block + din, :dout].set(
            w.astype(param_dtype))
        b_slab = b_slab.at[L:L + 1, :dout].set(b)
    return w_slab, b_slab, dims, row_block


def discrete_vae_forward(x, eps, w_slab, b_slab, layer_dims, hidden_sizes,
                         latent_dim, n_obs, row_block, batch_tile=None,
                         lane_dense_output=True):
    """x: (B, 1) float32 obs column, eps: (B, latent_dim) standard normals.

    Returns (recon, z, mu, sigma); mu/sigma are the Normal(dist) parameters.
    `lane_dense_output=False` writes exactly `used` lanes (masked stores but
    no HBM write amplification) — worth benchmarking on v5e.
    """
    B = x.shape[0]
    n_enc = len(hidden_sizes)
    n_dec = len(hidden_sizes)
    used = n_obs + 3 * latent_dim
    out_width = _round_up(used, 128) if lane_dense_output else used

    if batch_tile is None:
        batch_tile = _pick_batch_tile(B)
    batch_tile = max(8, (batch_tile // 8) * 8)
    B_pad = _round_up(B, batch_tile)

    # Single fused per-row input stream: [eps | x]; ragged batch zero-padded.
    inp = jnp.concatenate(
        [eps.astype(jnp.float32), x.astype(jnp.float32)], axis=1)
    if B_pad != B:
        inp = jnp.pad(inp, ((0, B_pad - B), (0, 0)))

    kernel = functools.partial(_vae_kernel, layer_dims, n_enc, n_dec,
                               latent_dim, n_obs, used, out_width, row_block)

    in_specs = [
        pl.BlockSpec((batch_tile, latent_dim + 1), lambda i: (i, 0)),
        # Grid-invariant param slabs -> one DMA each for the whole grid.
        pl.BlockSpec(w_slab.shape, lambda i: (0, 0)),
        pl.BlockSpec(b_slab.shape, lambda i: (0, 0)),
    ]
    out_specs = pl.BlockSpec((batch_tile, out_width), lambda i: (i, 0))

    packed = pl.pallas_call(
        kernel,
        out_shape=jax.ShapeDtypeStruct((B_pad, out_width), jnp.float32),
        grid_spec=pltpu.PrefetchScalarGridSpec(
            num_scalar_prefetch=0,
            grid=(B_pad // batch_tile,),
            in_specs=in_specs,
            out_specs=out_specs,
        ),
        # Batch axis is embarrassingly parallel (megacore-shardable on v7x).
        compiler_params=pltpu.CompilerParams(
            dimension_semantics=("parallel",)),
    )(inp, w_slab, b_slab)

    # Slice the coalesced block apart in the wrapper (pure layout plumbing).
    recon = packed[:B, :n_obs]
    z = packed[:B, n_obs:n_obs + latent_dim]
    mu = packed[:B, n_obs + latent_dim:n_obs + 2 * latent_dim]
    sigma = packed[:B, n_obs + 2 * latent_dim:used]
    return recon, z, mu, sigma


def _reference_forward(x, eps, w_slab, b_slab, layer_dims, hidden_sizes,
                       latent_dim, row_block):
    """Pure-JAX reference mirroring the kernel math on the packed slabs."""
    n_enc = len(hidden_sizes)
    n_dec = len(hidden_sizes)

    def w_of(L):
        din, dout = layer_dims[L]
        return w_slab[L * row_block:L * row_block + din, :dout]

    def b_of(L):
        _, dout = layer_dims[L]
        return b_slab[L:L + 1, :dout]

    def linear(h, L):
        w = w_of(L)
        return jnp.dot(h.astype(w.dtype), w,
                       preferred_element_type=jnp.float32) + b_of(L)

    h = jnp.maximum(x * w_of(0).astype(jnp.float32) + b_of(0), 0.0)
    L = 1
    for _ in range(n_enc - 1):
        h = jnp.maximum(linear(h, L), 0.0)
        L += 1
    heads = linear(h, L)
    L += 1
    mu = heads[:, :latent_dim]
    logsigma = heads[:, latent_dim:2 * latent_dim]
    sigma = jnp.exp(logsigma)
    z = mu + sigma * eps
    d = z
    for _ in range(n_dec):
        d = jnp.maximum(linear(d, L), 0.0)
        L += 1
    recon = linear(d, L)
    return recon, z, mu, sigma


if __name__ == "__main__":
    # Config consistent with the module: Discrete observation space with n=16
    # values, hidden_sizes=[32, 32], latent_dim=8.  Batch 2048 -> auto tile of
    # 512 rows and grid=(4,): 2 steps per TensorCore on v7x with DMA/compute
    # overlap, and >= 2 pipelined steps on single-TC v5e/v6e.
    hidden_sizes = [32, 32]
    latent_dim = 8
    n_obs = 16
    batch = 2048

    key = jax.random.PRNGKey(0)
    k_obs, k_eps, k_params = jax.random.split(key, 3)

    # inputs['obs'] for a Discrete space is an integer; the encoder casts to
    # float and views it as a (-1, 1) column.
    obs_int = jax.random.randint(k_obs, (batch,), 0, n_obs)
    x = obs_int.astype(jnp.float32).reshape(-1, 1)              # (B, 1)
    eps = jax.random.normal(k_eps, (batch, latent_dim), jnp.float32)

    w_slab, b_slab, layer_dims, row_block = make_vae_params(
        k_params, hidden_sizes, latent_dim, n_obs, param_dtype=jnp.bfloat16)

    outs = discrete_vae_forward(x, eps, w_slab, b_slab, layer_dims,
                                hidden_sizes, latent_dim, n_obs, row_block)
    outs = jax.block_until_ready(outs)
    recon, z, mu, sigma = outs

    # Sanity check against pure-JAX reference (same bf16 weight operands).
    ref = _reference_forward(x, eps, w_slab, b_slab, layer_dims, hidden_sizes,
                             latent_dim, row_block)
    for got, want in zip(outs, ref):
        assert got.shape == want.shape
        assert jnp.allclose(got, want, atol=1e-2, rtol=1e-2), \
            "mismatch vs reference"

    print("KERNEL_OK")
</pallas_src>

<mosaic_0001>
module attributes {stable_mosaic.version = 11 : i64} {
  func.func @_vae_kernel(%arg0: i32, %arg1: memref<512x9xf32, #tpu.memory_space<vmem>>, %arg2: memref<192x128xbf16, #tpu.memory_space<vmem>>, %arg3: memref<8x128xf32, #tpu.memory_space<vmem>>, %arg4: memref<512x128xf32, #tpu.memory_space<vmem>>) attributes {dimension_semantics = [#tpu.dimension_semantics<parallel>], iteration_bounds = array<i64: 4>, scalar_prefetch = 0 : i64, scratch_operands = 0 : i64, tpu.core_type = #tpu.core_type<tc>, window_params = [{transform_indices = @transform_0, window_bounds = array<i64: 512, 9>}, {pipeline_mode = #tpu.pipeline_mode<synchronous>, transform_indices = @transform_1, window_bounds = array<i64: 192, 128>}, {pipeline_mode = #tpu.pipeline_mode<synchronous>, transform_indices = @transform_2, window_bounds = array<i64: 8, 128>}, {transform_indices = @transform_3, window_bounds = array<i64: 512, 128>}]} {
    %c0 = arith.constant 0 : index
    %c0_0 = arith.constant 0 : index
    %0 = vector.load %arg1[%c0, %c0_0] : memref<512x9xf32, #tpu.memory_space<vmem>>, vector<512x8xf32>
    %c0_1 = arith.constant 0 : index
    %c8 = arith.constant 8 : index
    %1 = vector.load %arg1[%c0_1, %c8] : memref<512x9xf32, #tpu.memory_space<vmem>>, vector<512x1xf32>
    %c0_2 = arith.constant 0 : index
    %c0_3 = arith.constant 0 : index
    %2 = vector.load %arg2[%c0_2, %c0_3] : memref<192x128xbf16, #tpu.memory_space<vmem>>, vector<1x32xbf16>
    %3 = arith.extf %2 : vector<1x32xbf16> to vector<1x32xf32>
    %4 = vector.broadcast %1 : vector<512x1xf32> to vector<512x32xf32>
    %5 = vector.broadcast %3 : vector<1x32xf32> to vector<512x32xf32>
    %6 = arith.mulf %4, %5 : vector<512x32xf32>
    %c0_4 = arith.constant 0 : index
    %c0_5 = arith.constant 0 : index
    %7 = vector.load %arg3[%c0_4, %c0_5] : memref<8x128xf32, #tpu.memory_space<vmem>>, vector<1x32xf32>
    %8 = vector.broadcast %7 : vector<1x32xf32> to vector<512x32xf32>
    %9 = arith.addf %6, %8 : vector<512x32xf32>
    %cst = arith.constant 0.000000e+00 : f32
    %10 = vector.broadcast %cst : f32 to vector<512x32xf32>
    %11 = arith.maximumf %9, %10 : vector<512x32xf32>
    %c32 = arith.constant 32 : index
    %c0_6 = arith.constant 0 : index
    %12 = vector.load %arg2[%c32, %c0_6] : memref<192x128xbf16, #tpu.memory_space<vmem>>, vector<32x32xbf16>
    %13 = arith.truncf %11 : vector<512x32xf32> to vector<512x32xbf16>
    %cst_7 = arith.constant dense<0.000000e+00> : vector<512x32xf32>
    %14 = tpu.matmul %13, %12, %cst_7 {dimension_numbers = #tpu.dot_dimension_numbers<[1], [0], [0], [1], [0, 0, 1, 1], [], []>} : vector<512x32xbf16>, vector<32x32xbf16>, vector<512x32xf32> -> vector<512x32xf32>
    %c1 = arith.constant 1 : index
    %c0_8 = arith.constant 0 : index
    %15 = vector.load %arg3[%c1, %c0_8] : memref<8x128xf32, #tpu.memory_space<vmem>>, vector<1x32xf32>
    %16 = vector.broadcast %15 : vector<1x32xf32> to vector<512x32xf32>
    %17 = arith.addf %14, %16 : vector<512x32xf32>
    %cst_9 = arith.constant 0.000000e+00 : f32
    %18 = vector.broadcast %cst_9 : f32 to vector<512x32xf32>
    %19 = arith.maximumf %17, %18 : vector<512x32xf32>
    %c64 = arith.constant 64 : index
    %c0_10 = arith.constant 0 : index
    %20 = vector.load %arg2[%c64, %c0_10] : memref<192x128xbf16, #tpu.memory_space<vmem>>, vector<32x16xbf16>
    %21 = arith.truncf %19 : vector<512x32xf32> to vector<512x32xbf16>
    %cst_11 = arith.constant dense<0.000000e+00> : vector<512x16xf32>
    %22 = tpu.matmul %21, %20, %cst_11 {dimension_numbers = #tpu.dot_dimension_numbers<[1], [0], [0], [1], [0, 0, 1, 1], [], []>} : vector<512x32xbf16>, vector<32x16xbf16>, vector<512x16xf32> -> vector<512x16xf32>
    %c2 = arith.constant 2 : index
    %c0_12 = arith.constant 0 : index
    %23 = vector.load %arg3[%c2, %c0_12] : memref<8x128xf32, #tpu.memory_space<vmem>>, vector<1x16xf32>
    %24 = vector.broadcast %23 : vector<1x16xf32> to vector<512x16xf32>
    %25 = arith.addf %22, %24 : vector<512x16xf32>
    %26 = vector.extract_strided_slice %25 {offsets = [0, 0], sizes = [512, 8], strides = [1, 1]} : vector<512x16xf32> to vector<512x8xf32>
    %27 = vector.extract_strided_slice %25 {offsets = [0, 8], sizes = [512, 8], strides = [1, 1]} : vector<512x16xf32> to vector<512x8xf32>
    %28 = math.exp %27 : vector<512x8xf32>
    %29 = arith.mulf %28, %0 : vector<512x8xf32>
    %30 = arith.addf %26, %29 : vector<512x8xf32>
    %c96 = arith.constant 96 : index
    %c0_13 = arith.constant 0 : index
    %31 = vector.load %arg2[%c96, %c0_13] : memref<192x128xbf16, #tpu.memory_space<vmem>>, vector<8x32xbf16>
    %32 = arith.truncf %30 : vector<512x8xf32> to vector<512x8xbf16>
    %cst_14 = arith.constant dense<0.000000e+00> : vector<512x32xf32>
    %33 = tpu.matmul %32, %31, %cst_14 {dimension_numbers = #tpu.dot_dimension_numbers<[1], [0], [0], [1], [0, 0, 1, 1], [], []>} : vector<512x8xbf16>, vector<8x32xbf16>, vector<512x32xf32> -> vector<512x32xf32>
    %c3 = arith.constant 3 : index
    %c0_15 = arith.constant 0 : index
    %34 = vector.load %arg3[%c3, %c0_15] : memref<8x128xf32, #tpu.memory_space<vmem>>, vector<1x32xf32>
    %35 = vector.broadcast %34 : vector<1x32xf32> to vector<512x32xf32>
    %36 = arith.addf %33, %35 : vector<512x32xf32>
    %cst_16 = arith.constant 0.000000e+00 : f32
    %37 = vector.broadcast %cst_16 : f32 to vector<512x32xf32>
    %38 = arith.maximumf %36, %37 : vector<512x32xf32>
    %c128 = arith.constant 128 : index
    %c0_17 = arith.constant 0 : index
    %39 = vector.load %arg2[%c128, %c0_17] : memref<192x128xbf16, #tpu.memory_space<vmem>>, vector<32x32xbf16>
    %40 = arith.truncf %38 : vector<512x32xf32> to vector<512x32xbf16>
    %cst_18 = arith.constant dense<0.000000e+00> : vector<512x32xf32>
    %41 = tpu.matmul %40, %39, %cst_18 {dimension_numbers = #tpu.dot_dimension_numbers<[1], [0], [0], [1], [0, 0, 1, 1], [], []>} : vector<512x32xbf16>, vector<32x32xbf16>, vector<512x32xf32> -> vector<512x32xf32>
    %c4 = arith.constant 4 : index
    %c0_19 = arith.constant 0 : index
    %42 = vector.load %arg3[%c4, %c0_19] : memref<8x128xf32, #tpu.memory_space<vmem>>, vector<1x32xf32>
    %43 = vector.broadcast %42 : vector<1x32xf32> to vector<512x32xf32>
    %44 = arith.addf %41, %43 : vector<512x32xf32>
    %cst_20 = arith.constant 0.000000e+00 : f32
    %45 = vector.broadcast %cst_20 : f32 to vector<512x32xf32>
    %46 = arith.maximumf %44, %45 : vector<512x32xf32>
    %c160 = arith.constant 160 : index
    %c0_21 = arith.constant 0 : index
    %47 = vector.load %arg2[%c160, %c0_21] : memref<192x128xbf16, #tpu.memory_space<vmem>>, vector<32x16xbf16>
    %48 = arith.truncf %46 : vector<512x32xf32> to vector<512x32xbf16>
    %cst_22 = arith.constant dense<0.000000e+00> : vector<512x16xf32>
    %49 = tpu.matmul %48, %47, %cst_22 {dimension_numbers = #tpu.dot_dimension_numbers<[1], [0], [0], [1], [0, 0, 1, 1], [], []>} : vector<512x32xbf16>, vector<32x16xbf16>, vector<512x16xf32> -> vector<512x16xf32>
    %c5 = arith.constant 5 : index
    %c0_23 = arith.constant 0 : index
    %50 = vector.load %arg3[%c5, %c0_23] : memref<8x128xf32, #tpu.memory_space<vmem>>, vector<1x16xf32>
    %51 = vector.broadcast %50 : vector<1x16xf32> to vector<512x16xf32>
    %52 = arith.addf %49, %51 : vector<512x16xf32>
    %c0_24 = arith.constant 0 : index
    %c0_25 = arith.constant 0 : index
    %53 = vector.load %arg4[%c0_24, %c0_25] : memref<512x128xf32, #tpu.memory_space<vmem>>, vector<512x16xf32>
    tpu.vector_store %arg4[%c0_24, %c0_25], %52 {strides = array<i32>} : memref<512x128xf32, #tpu.memory_space<vmem>>, vector<512x16xf32>,
    %c0_26 = arith.constant 0 : index
    %c16 = arith.constant 16 : index
    %54 = vector.load %arg4[%c0_26, %c16] : memref<512x128xf32, #tpu.memory_space<vmem>>, vector<512x8xf32>
    tpu.vector_store %arg4[%c0_26, %c16], %30 {strides = array<i32>} : memref<512x128xf32, #tpu.memory_space<vmem>>, vector<512x8xf32>,
    %c0_27 = arith.constant 0 : index
    %c24 = arith.constant 24 : index
    %55 = vector.load %arg4[%c0_27, %c24] : memref<512x128xf32, #tpu.memory_space<vmem>>, vector<512x8xf32>
    tpu.vector_store %arg4[%c0_27, %c24], %26 {strides = array<i32>} : memref<512x128xf32, #tpu.memory_space<vmem>>, vector<512x8xf32>,
    %c0_28 = arith.constant 0 : index
    %c32_29 = arith.constant 32 : index
    %56 = vector.load %arg4[%c0_28, %c32_29] : memref<512x128xf32, #tpu.memory_space<vmem>>, vector<512x8xf32>
    tpu.vector_store %arg4[%c0_28, %c32_29], %28 {strides = array<i32>} : memref<512x128xf32, #tpu.memory_space<vmem>>, vector<512x8xf32>,
    %cst_30 = arith.constant 0.000000e+00 : f32
    %57 = vector.broadcast %cst_30 : f32 to vector<512x88xf32>
    %c0_31 = arith.constant 0 : index
    %c40 = arith.constant 40 : index
    %58 = vector.load %arg4[%c0_31, %c40] : memref<512x128xf32, #tpu.memory_space<vmem>>, vector<512x88xf32>
    tpu.vector_store %arg4[%c0_31, %c40], %57 {strides = array<i32>} : memref<512x128xf32, #tpu.memory_space<vmem>>, vector<512x88xf32>,
    return
  }
  func.func @transform_0(%arg0: i32) -> (i32, i32) {
    %c0_i32 = arith.constant 0 : i32
    %c0_i32_0 = arith.constant 0 : i32
    return %arg0, %c0_i32 : i32, i32
  }
  func.func @transform_1(%arg0: i32) -> (i32, i32) {
    %c0_i32 = arith.constant 0 : i32
    %c0_i32_0 = arith.constant 0 : i32
    %c0_i32_1 = arith.constant 0 : i32
    return %c0_i32, %c0_i32_0 : i32, i32
  }
  func.func @transform_2(%arg0: i32) -> (i32, i32) {
    %c0_i32 = arith.constant 0 : i32
    %c0_i32_0 = arith.constant 0 : i32
    %c0_i32_1 = arith.constant 0 : i32
    return %c0_i32, %c0_i32_0 : i32, i32
  }
  func.func @transform_3(%arg0: i32) -> (i32, i32) {
    %c0_i32 = arith.constant 0 : i32
    %c0_i32_0 = arith.constant 0 : i32
    return %arg0, %c0_i32 : i32, i32
  }
}

</mosaic_0001>

<bundles_post_ra>
// kernel: tpu_custom_call.1
= control target key start
LH: loop header
LB: loop body
LE: loop exit
PB: predicated region body
PF: predicated region fallthrough
CT: control target
= control target key end

     0   :  { %8 = vsyncpa [#allocation3], 0  ;;  %s9573_s0 = inlined_call_operand.vmem [shape: f32[2048,9], index: 0, kind: input, shape index: {}]   ;;  %s9574_s1 = inlined_call_operand.vmem [shape: bf16[192,128], index: 1, kind: input, shape index: {}]   ;;  %s9575_s2 = inlined_call_operand.vmem [shape: f32[8,128], index: 2, kind: input, shape index: {}]   ;;  %s9576_s3 = inlined_call_operand.hbm [shape: f32[2048,128], index: 3, kind: output, shape index: {}]  }
   0x1   :  { %10 = vsyncpa [#allocation3 + $0x1], 0  ;;  %s6008_s12 = smov 0   ;;  %s6010_s13 = smov 0  }
   0x2   :  { %s6012_s14 = smov 0   ;;  %s6014_s15 = smov 0  }
   0x3 LB: > { %s6029_s16 = sadd.s32 4294967295, %s5978_s15   ;;  %s5006_s17 = sadd.s32 4294967294, %s5978_s15   ;;  %s5978_s15 = sphi %s6014_s15, %s10156_s15   ;;  %s5974_s14 = sphi %s6012_s14, %s10155_s14   ;;  %s5970_s13 = sphi %s6010_s13, %s10154_s13   ;;  %s5966_s12 = sphi %s6008_s12, %s10153_s12  }
   0x4   : > { %s6033_s18 = sadd.s32 1, %s5978_s15   ;;  %s91_s19 = sadd.s32 1, %s5974_s14 }
   0x5   : > { %s88_s20 = ssub.s32 %s5978_s15, %s6033_s18  ;;  %p101_p0 = scmp.ne.s32.totalorder %s5974_s14, %s5970_s13 }
   0x6   : > { %p89_p1 = scmp.eq.s32.totalorder %s88_s20, 0  ;;  %p102_p2 = scmp.eq.s32.totalorder %s6029_s16, 3 }
   0x7   : > { %p107_p3 = scmp.ne.s32.totalorder %s5970_s13, %s5966_s12  ;;  %p108_p4 = scmp.eq.s32.totalorder %s5006_s17, 3 }
   0x8   : > { %s6044_s21 = scalar_select %p89_p1, %s5974_s14, %s91_s19  }
   0x9   : > { %p6046_p5 = por %p102_p2, %p101_p0  ;;  %p6050_p6 = por %p108_p4, %p107_p3 }
   0xa   : > { %p5009_p7 = scmp.ge.s32.totalorder %s5978_s15, 1  ;;  %p141_p8 = scmp.lt.s32.totalorder %s5978_s15, 5 }
   0xc   : > { %p142_p9 = pnand %p5009_p7, %p141_p8 }
   0xe   : > { %145 = sbr.rel (%p142_p9) target bundleno = 1521 (0x5f1), region = 32 }
  0x13   : > { %s5011_s24 = sshll.u32 %s6029_s16, 6  ;;  %v5980_v0 = vmov 8   ;;  %v5753_v15 = vld [vmem:[%s9574_s1 + $0x18] sm:$0xff]   ;;  %v5754_v16 = vld [vmem:[%s9574_s1 + $0x10] sm:$0xff]   ;;  %v559_v59 = vlaneseq  ;;  %vm813_vm0 = vcmask 261120   ;;  %s5981_s20 = smov 8  }
  0x14   : > { %5752 = vset.pattern.permute.xlu1 %v5980_v0  ;;  %5751 = vset.pattern.permute.xlu0 %v5980_v0  ;;  %p166_p10 = scmp.lt.s32.totalorder %s5011_s24, 255  ;;  %vm2540_vm1 = vcmask 1043456   ;;  %s5982_s4 = smov 120   ;;  %vm2443_vm2 = vcmask 64512   ;;  %vm3837_vm3 = vcmask 130048   ;;  %vm4158_vm4 = vcmask 195712  }
  0x15   : > { %5362 = vmatprep.subr.bf16.mxu0 %v5753_v15  ;;  %5700 = vmatprep.subr.bf16.mxu1 %v5753_v15  ;;  %v560_v62 = vshrl.u32 %v559_v59, 7  ;;  %s5983_s8 = smov 16   ;;  %s5984_s9 = smov 24   ;;  %vm4479_vm5 = vcmask 261312   ;;  %vm4800_vm6 = vcmask 326912   ;;  %vm4865_vm7 = vcmask 1047872  }
  0x16   : > { %s10158_s24 = smov (!%p166_p10, %s5011_s24), 255  ;;  %5363 = vmatpush3.bf16.msra.mxu0 %v5753_v15  ;;  %5702 = vmatpush3.bf16.msra.mxu1 %v5753_v15  ;;  %v237_v15 = vld [vmem:[%s9574_s1] sm:$0x1] }
  0x17   : > { %s5012_s25 = sshll.u32 %s10158_s24, 3  ;;  %5364 = vmatprep.subr.bf16.mxu0 %v5754_v16  ;;  %5701 = vmatprep.subr.bf16.mxu1 %v5754_v16  ;;  %s5986_s24 = smov [#allocation2]  }
  0x18   : > { %s6060_s28 = scalar_lea.vmem %s9573_s0, %s5012_s25  ;;  %s5922_s25 = sshll.u32 %s5986_s24, 4  ;;  %s5923_s25 = int_to_ptr.vmem [resolvable:$false] %s5922_s25 }
  0x19   : > { %v6063_v1 = vld [vmem:[%s6060_s28 + $0x10] sm:$0xff]  ;;  %v6066_v2 = vld [vmem:[%s6060_s28] sm:$0xff]  ;;  %v6071_v3 = vld [vmem:[%s6060_s28 + $0x18] sm:$0xff]  ;;  %s5924_s26 = scalar_lea.vmem %s5923_s25, 16384 }
  0x1a   : > { %251 = vperm.xlu1 %5752, %v6063_v1   ;;  %241 = vperm.xlu0 %5751, %v6066_v2   ;;  %v6074_v4 = vld [vmem:[%s6060_s28 + $0x8] sm:$0xff]  ;;  %v6082_v6 = vld [vmem:[%s6060_s28 + $0x20] sm:$0xff]  ;;  %v6087_v7 = vld [vmem:[%s6060_s28 + $0x38] sm:$0xff] }
  0x1b   : > { %v6079_v5 = vld [vmem:[%s6060_s28 + $0x28] sm:$0xff]  ;;  %v6090_v8 = vld [vmem:[%s6060_s28 + $0x30] sm:$0xff]  ;;  %v6098_v10 = vld [vmem:[%s6060_s28 + $0x40] sm:$0xff]  ;;  %5365 = vmatpush3.bf16.msra.mxu0 %v5754_v16  ;;  %5703 = vmatpush3.bf16.msra.mxu1 %v5754_v16  ;;  %v238_v16 = vunpack.c.l.bf16 %v237_v15 }
  0x1c   : > { %v6095_v9 = vld [vmem:[%s6060_s28 + $0x48] sm:$0xff]  ;;  %v6103_v11 = vld [vmem:[%s6060_s28 + $0x58] sm:$0xff]  ;;  %v6106_v12 = vld [vmem:[%s6060_s28 + $0x50] sm:$0xff] }
  0x1d   : > { %v6109_v13 = vld [vmem:[%s6060_s28 + $0x68] sm:$0xff]  ;;  %v6114_v14 = vld [vmem:[%s6060_s28 + $0x60] sm:$0xff]  ;;  %v6125_v17 = vld [vmem:[%s6060_s28 + $0x78] sm:$0xff] }
  0x1e   : > { %256 = vperm.xlu1 %5752, %v6071_v3   ;;  %246 = vperm.xlu0 %5751, %v6074_v4   ;;  %v6128_v18 = vld [vmem:[%s6060_s28 + $0x70] sm:$0xff]  ;;  %v6133_v19 = vld [vmem:[%s6060_s28 + $0x88] sm:$0xff]  ;;  %v6136_v20 = vld [vmem:[%s6060_s28 + $0x80] sm:$0xff] }
  0x1f   : > { %v6141_v21 = vld [vmem:[%s6060_s28 + $0x98] sm:$0xff]  ;;  %v6144_v22 = vld [vmem:[%s6060_s28 + $0x90] sm:$0xff]  ;;  %v6149_v23 = vld [vmem:[%s6060_s28 + $0xa8] sm:$0xff] }
  0x20   : > { %v6152_v24 = vld [vmem:[%s6060_s28 + $0xa0] sm:$0xff]  ;;  %v6157_v25 = vld [vmem:[%s6060_s28 + $0xb8] sm:$0xff]  ;;  %v6160_v26 = vld [vmem:[%s6060_s28 + $0xb0] sm:$0xff] }
  0x21   : > { %v6165_v27 = vld [vmem:[%s6060_s28 + $0xc8] sm:$0xff]  ;;  %v6168_v28 = vld [vmem:[%s6060_s28 + $0xc0] sm:$0xff]  ;;  %v6173_v29 = vld [vmem:[%s6060_s28 + $0xd8] sm:$0xff] }
  0x22   : > { %266 = vperm.xlu1 %5752, %v6079_v5   ;;  %261 = vperm.xlu0 %5751, %v6082_v6   ;;  %v6176_v30 = vld [vmem:[%s6060_s28 + $0xd0] sm:$0xff]  ;;  %v6181_v31 = vld [vmem:[%s6060_s28 + $0xe8] sm:$0xff]  ;;  %v6184_v32 = vld [vmem:[%s6060_s28 + $0xe0] sm:$0xff] }
  0x23   : > { %v6189_v33 = vld [vmem:[%s6060_s28 + $0xf8] sm:$0xff]  ;;  %v6192_v34 = vld [vmem:[%s6060_s28 + $0xf0] sm:$0xff]  ;;  %v6197_v35 = vld [vmem:[%s6060_s28 + $0x108] sm:$0xff] }
  0x24   : > { %v6200_v36 = vld [vmem:[%s6060_s28 + $0x100] sm:$0xff]  ;;  %v6205_v37 = vld [vmem:[%s6060_s28 + $0x118] sm:$0xff]  ;;  %v6208_v38 = vld [vmem:[%s6060_s28 + $0x110] sm:$0xff] }
  0x25   : > { %v210_v39 = vld [vmem:[%s6060_s28 + $0x128] sm:$0xff]  ;;  %v209_v40 = vld [vmem:[%s6060_s28 + $0x120] sm:$0xff]  ;;  %v212_v41 = vld [vmem:[%s6060_s28 + $0x138] sm:$0xff] }
  0x26   : > { %276 = vperm.xlu1 %5752, %v6087_v7   ;;  %271 = vperm.xlu0 %5751, %v6090_v8   ;;  %v211_v42 = vld [vmem:[%s6060_s28 + $0x130] sm:$0xff]  ;;  %v214_v43 = vld [vmem:[%s6060_s28 + $0x148] sm:$0xff]  ;;  %v213_v44 = vld [vmem:[%s6060_s28 + $0x140] sm:$0xff] }
  0x27   : > { %v216_v45 = vld [vmem:[%s6060_s28 + $0x158] sm:$0xff]  ;;  %v215_v46 = vld [vmem:[%s6060_s28 + $0x150] sm:$0xff]  ;;  %v218_v47 = vld [vmem:[%s6060_s28 + $0x168] sm:$0xff] }
  0x28   : > { %v217_v48 = vld [vmem:[%s6060_s28 + $0x160] sm:$0xff]  ;;  %v220_v49 = vld [vmem:[%s6060_s28 + $0x178] sm:$0xff]  ;;  %v219_v50 = vld [vmem:[%s6060_s28 + $0x170] sm:$0xff] }
  0x29   : > { %v222_v51 = vld [vmem:[%s6060_s28 + $0x188] sm:$0xff]  ;;  %v221_v52 = vld [vmem:[%s6060_s28 + $0x180] sm:$0xff]  ;;  %v224_v53 = vld [vmem:[%s6060_s28 + $0x198] sm:$0xff] }
  0x2a   : > { %286 = vperm.xlu1 %5752, %v6095_v9   ;;  %281 = vperm.xlu0 %5751, %v6098_v10   ;;  %v223_v54 = vld [vmem:[%s6060_s28 + $0x190] sm:$0xff]  ;;  %v226_v55 = vld [vmem:[%s6060_s28 + $0x1a8] sm:$0xff]  ;;  %v225_v56 = vld [vmem:[%s6060_s28 + $0x1a0] sm:$0xff] }
  0x2b   : > { %v228_v57 = vld [vmem:[%s6060_s28 + $0x1b8] sm:$0xff]  ;;  %v227_v58 = vld [vmem:[%s6060_s28 + $0x1b0] sm:$0xff]  ;;  %v230_v60 = vld [vmem:[%s6060_s28 + $0x1c8] sm:$0xff] }
  0x2c   : > { %v229_v61 = vld [vmem:[%s6060_s28 + $0x1c0] sm:$0xff]  ;;  %v232_v63 = vld [vmem:[%s6060_s28 + $0x1d8] sm:$0xff]  ;;  %v231_v0 = vld [vmem:[%s6060_s28 + $0x1d0] sm:$0xff] }
  0x2e   : > { %296 = vperm.xlu1 %5752, %v6103_v11   ;;  %291 = vperm.xlu0 %5751, %v6106_v12  }
  0x32   : > { %306 = vperm.xlu1 %5752, %v6109_v13   ;;  %301 = vperm.xlu0 %5751, %v6114_v14  }
  0x36   : > { %316 = vperm.xlu1 %5752, %v6125_v17   ;;  %311 = vperm.xlu0 %5751, %v6128_v18  }
  0x3a   : > { %326 = vperm.xlu1 %5752, %v6133_v19   ;;  %321 = vperm.xlu0 %5751, %v6136_v20  }
  0x3e   : > { %336 = vperm.xlu1 %5752, %v6141_v21   ;;  %331 = vperm.xlu0 %5751, %v6144_v22  }
  0x42   : > { %346 = vperm.xlu1 %5752, %v6149_v23   ;;  %341 = vperm.xlu0 %5751, %v6152_v24  }
  0x46   : > { %356 = vperm.xlu1 %5752, %v6157_v25   ;;  %351 = vperm.xlu0 %5751, %v6160_v26  }
  0x4a   : > { %366 = vperm.xlu1 %5752, %v6165_v27   ;;  %361 = vperm.xlu0 %5751, %v6168_v28  }
  0x4e   : > { %376 = vperm.xlu1 %5752, %v6173_v29   ;;  %371 = vperm.xlu0 %5751, %v6176_v30  }
  0x52   : > { %386 = vperm.xlu1 %5752, %v6181_v31   ;;  %381 = vperm.xlu0 %5751, %v6184_v32  }
  0x56   : > { %396 = vperm.xlu1 %5752, %v6189_v33   ;;  %391 = vperm.xlu0 %5751, %v6192_v34  }
  0x5a   : > { %406 = vperm.xlu1 %5752, %v6197_v35   ;;  %401 = vperm.xlu0 %5751, %v6200_v36  }
  0x5e   : > { %416 = vperm.xlu1 %5752, %v6205_v37   ;;  %411 = vperm.xlu0 %5751, %v6208_v38  }
  0x62   : > { %426 = vperm.xlu1 %5752, %v210_v39   ;;  %421 = vperm.xlu0 %5751, %v209_v40   ;;  %v561_v39 = vsub.s32 0, %v560_v62  ;;  %v234_v40 = vld [vmem:[%s6060_s28 + $0x1e8] sm:$0xff] }
  0x66   : > { %436 = vperm.xlu1 %5752, %v212_v41   ;;  %431 = vperm.xlu0 %5751, %v211_v42   ;;  %v233_v41 = vld [vmem:[%s6060_s28 + $0x1e0] sm:$0xff]  ;;  %v6241_v42 = vrot.slane %v238_v16, %v561_v39 }
  0x6a   : > { %446 = vperm.xlu1 %5752, %v214_v43   ;;  %441 = vperm.xlu0 %5751, %v213_v44   ;;  %v236_v43 = vld [vmem:[%s6060_s28 + $0x1f8] sm:$0xff]  ;;  %v235_v44 = vld [vmem:[%s6060_s28 + $0x1f0] sm:$0xff] }
  0x6e   : > { %456 = vperm.xlu1 %5752, %v216_v45   ;;  %451 = vperm.xlu0 %5751, %v215_v46  }
  0x72   : > { %466 = vperm.xlu1 %5752, %v218_v47   ;;  %461 = vperm.xlu0 %5751, %v217_v48   ;;  %v6248_v47 = vld [vmem:[%s9575_s2] ss:$0 sm:$0xff] }
  0x76   : > { %476 = vperm.xlu1 %5752, %v220_v49   ;;  %471 = vperm.xlu0 %5751, %v219_v50  }
  0x7a   : > { %486 = vperm.xlu1 %5752, %v222_v51   ;;  %481 = vperm.xlu0 %5751, %v221_v52  }
  0x7e   : > { %496 = vperm.xlu1 %5752, %v224_v53   ;;  %491 = vperm.xlu0 %5751, %v223_v54  }
  0x82   : > { %506 = vperm.xlu1 %5752, %v226_v55   ;;  %501 = vperm.xlu0 %5751, %v225_v56   ;;  %v6259_v56 = vld [vmem:[%s9574_s1 + $0x28] sm:$0xff]  }
  0x83   : > { %5430 = vmatprep.subr.bf16.mxu1 %v6259_v56 }
  0x86   : > { %516 = vperm.xlu1 %5752, %v228_v57   ;;  %511 = vperm.xlu0 %5751, %v227_v58  }
  0x8a   : > { %526 = vperm.xlu1 %5752, %v230_v60   ;;  %521 = vperm.xlu0 %5751, %v229_v61  }
  0x8e   : > { %536 = vperm.xlu1 %5752, %v232_v63   ;;  %531 = vperm.xlu0 %5751, %v231_v0  }
  0x92   : > { %546 = vperm.xlu1 %5752, %v234_v40   ;;  %541 = vperm.xlu0 %5751, %v233_v41  }
  0x95   : > { %v252_v45 = vpop.permute.xlu1 %251  ;;  %v242_v46 = vpop.permute.xlu0 %241 }
  0x96   : > { %v565_v48 = vmul.f32 %v6241_v42, %v252_v45  ;;  %v563_v49 = vmul.f32 %v6241_v42, %v242_v46  ;;  %556 = vperm.xlu1 %5752, %v236_v43   ;;  %551 = vperm.xlu0 %5751, %v235_v44  }
  0x98   : > { %v634_v50 = vadd.f32 %v6248_v47, %v565_v48  ;;  %v632_v51 = vadd.f32 %v6248_v47, %v563_v49 }
  0x99   : > { %v257_v52 = vpop.permute.xlu1 %256  ;;  %v247_v53 = vpop.permute.xlu0 %246 }
  0x9a   : > { %v566_v54 = vmul.f32 %v6241_v42, %v257_v52  ;;  %v564_v55 = vmul.f32 %v6241_v42, %v247_v53  ;;  %v698_v59 = vmax.f32 %v634_v50, 0.0  ;;  %v696_v62 = vmax.f32 %v632_v51, 0.0  ;;  %1829 = vrot.lane.b32.xlu0 %v6066_v2, %s5981_s20  ;;  %1831 = vrot.lane.b32.xlu1 %v6074_v4, %s5981_s20 }
  0x9c   : > { %v635_v57 = vadd.f32 %v6248_v47, %v566_v54  ;;  %v633_v58 = vadd.f32 %v6248_v47, %v564_v55 }
  0x9d   : > { %v267_v60 = vpop.permute.xlu1 %266  ;;  %v262_v61 = vpop.permute.xlu0 %261 }
  0x9e   : > { %v699_v63 = vmax.f32 %v635_v57, 0.0  ;;  %v568_v0 = vmul.f32 %v6241_v42, %v267_v60  ;;  %v567_v15 = vmul.f32 %v6241_v42, %v262_v61  ;;  %v697_v16 = vmax.f32 %v633_v58, 0.0  ;;  %1833 = vrot.lane.b32.xlu0 %v6063_v1, %s5981_s20  ;;  %1835 = vrot.lane.b32.xlu1 %v6071_v3, %s5981_s20  ;;  %v6451_v3 = vld [vmem:[%s9575_s2 + $0x1] ss:$0 sm:$0xff] }
  0xa0   : > { %v765_v39 = vpack.c.bf16 %v699_v63, %v698_v59  ;;  %v637_v40 = vadd.f32 %v6248_v47, %v568_v0  ;;  %v636_v41 = vadd.f32 %v6248_v47, %v567_v15  ;;  %v764_v43 = vpack.c.bf16 %v697_v16, %v696_v62 }
  0xa1   : > { %v277_v44 = vpop.permute.xlu1 %276  ;;  %v272_v45 = vpop.permute.xlu0 %271 }
  0xa2   : > { %v701_v46 = vmax.f32 %v637_v40, 0.0  ;;  %v700_v48 = vmax.f32 %v636_v41, 0.0  ;;  %v570_v49 = vmul.f32 %v6241_v42, %v277_v44  ;;  %v569_v50 = vmul.f32 %v6241_v42, %v272_v45  ;;  %5366 = vmatprep.mubr.msk.bf16.mxu0 %vm813_vm0, %v764_v43  ;;  %1837 = vrot.lane.b32.xlu0 %v6082_v6, %s5981_s20 }
  0xa3   : > { %5367 = vmatmul.mubr.msk.bf16.vlgmr.msra.gmra.mxu0 %vm813_vm0, %v765_v39  ;;  %1839 = vrot.lane.b32.xlu1 %v6079_v5, %s5981_s20 }
  0xa4   : > { %v766_v51 = vpack.c.bf16 %v701_v46, %v700_v48  ;;  %v639_v52 = vadd.f32 %v6248_v47, %v570_v49  ;;  %v638_v53 = vadd.f32 %v6248_v47, %v569_v50 }
  0xa5   : > { %v287_v54 = vpop.permute.xlu1 %286  ;;  %v282_v55 = vpop.permute.xlu0 %281 }
  0xa6   : > { %v703_v57 = vmax.f32 %v639_v52, 0.0  ;;  %v702_v58 = vmax.f32 %v638_v53, 0.0  ;;  %v572_v59 = vmul.f32 %v6241_v42, %v287_v54  ;;  %v571_v60 = vmul.f32 %v6241_v42, %v282_v55  ;;  %5370 = vmatprep.mubr.msk.bf16.mxu0 %vm813_vm0, %v766_v51  ;;  %1841 = vrot.lane.b32.xlu0 %v6090_v8, %s5981_s20 }
  0xa7   : > { %1843 = vrot.lane.b32.xlu1 %v6087_v7, %s5981_s20 }
  0xa8   : > { %v767_v61 = vpack.c.bf16 %v703_v57, %v702_v58  ;;  %v641_v62 = vadd.f32 %v6248_v47, %v572_v59  ;;  %v640_v63 = vadd.f32 %v6248_v47, %v571_v60 }
  0xa9   : > { %v297_v0 = vpop.permute.xlu1 %296  ;;  %v292_v15 = vpop.permute.xlu0 %291 }
  0xaa   : > { %v705_v16 = vmax.f32 %v641_v62, 0.0  ;;  %v704_v39 = vmax.f32 %v640_v63, 0.0  ;;  %v574_v40 = vmul.f32 %v6241_v42, %v297_v0  ;;  %v573_v41 = vmul.f32 %v6241_v42, %v292_v15  ;;  %1845 = vrot.lane.b32.xlu0 %v6098_v10, %s5981_s20 }
  0xab   : > { %5371 = vmatmul.mubr.msk.bf16.gmra.mxu0 %vm813_vm0, %v767_v61  ;;  %1847 = vrot.lane.b32.xlu1 %v6095_v9, %s5981_s20 }
  0xac   : > { %v768_v43 = vpack.c.bf16 %v705_v16, %v704_v39  ;;  %v643_v44 = vadd.f32 %v6248_v47, %v574_v40  ;;  %v642_v45 = vadd.f32 %v6248_v47, %v573_v41 }
  0xad   : > { %v307_v46 = vpop.permute.xlu1 %306  ;;  %v302_v48 = vpop.permute.xlu0 %301 }
  0xae   : > { %v707_v49 = vmax.f32 %v643_v44, 0.0  ;;  %v706_v50 = vmax.f32 %v642_v45, 0.0  ;;  %v576_v51 = vmul.f32 %v6241_v42, %v307_v46  ;;  %v575_v52 = vmul.f32 %v6241_v42, %v302_v48  ;;  %5374 = vmatprep.mubr.msk.bf16.mxu0 %vm813_vm0, %v768_v43  ;;  %1849 = vrot.lane.b32.xlu0 %v6106_v12, %s5981_s20 }
  0xaf   : > { %1851 = vrot.lane.b32.xlu1 %v6103_v11, %s5981_s20 }
  0xb0   : > { %v769_v53 = vpack.c.bf16 %v707_v49, %v706_v50  ;;  %v645_v54 = vadd.f32 %v6248_v47, %v576_v51  ;;  %v644_v55 = vadd.f32 %v6248_v47, %v575_v52 }
  0xb1   : > { %v317_v57 = vpop.permute.xlu1 %316  ;;  %v312_v58 = vpop.permute.xlu0 %311 }
  0xb2   : > { %v709_v59 = vmax.f32 %v645_v54, 0.0  ;;  %v708_v60 = vmax.f32 %v644_v55, 0.0  ;;  %v578_v61 = vmul.f32 %v6241_v42, %v317_v57  ;;  %v577_v62 = vmul.f32 %v6241_v42, %v312_v58  ;;  %1853 = vrot.lane.b32.xlu0 %v6114_v14, %s5981_s20 }
  0xb3   : > { %5375 = vmatmul.mubr.msk.bf16.gmra.mxu0 %vm813_vm0, %v769_v53  ;;  %1855 = vrot.lane.b32.xlu1 %v6109_v13, %s5981_s20 }
  0xb4   : > { %v770_v63 = vpack.c.bf16 %v709_v59, %v708_v60  ;;  %v647_v0 = vadd.f32 %v6248_v47, %v578_v61  ;;  %v646_v15 = vadd.f32 %v6248_v47, %v577_v62 }
  0xb5   : > { %v327_v16 = vpop.permute.xlu1 %326  ;;  %v322_v39 = vpop.permute.xlu0 %321 }
  0xb6   : > { %v711_v40 = vmax.f32 %v647_v0, 0.0  ;;  %v710_v41 = vmax.f32 %v646_v15, 0.0  ;;  %v580_v43 = vmul.f32 %v6241_v42, %v327_v16  ;;  %v579_v44 = vmul.f32 %v6241_v42, %v322_v39  ;;  %5378 = vmatprep.mubr.msk.bf16.mxu0 %vm813_vm0, %v770_v63  ;;  %1857 = vrot.lane.b32.xlu0 %v6128_v18, %s5981_s20 }
  0xb7   : > { %1859 = vrot.lane.b32.xlu1 %v6125_v17, %s5981_s20 }
  0xb8   : > { %v771_v45 = vpack.c.bf16 %v711_v40, %v710_v41  ;;  %v649_v46 = vadd.f32 %v6248_v47, %v580_v43  ;;  %v648_v48 = vadd.f32 %v6248_v47, %v579_v44 }
  0xb9   : > { %v337_v49 = vpop.permute.xlu1 %336  ;;  %v332_v50 = vpop.permute.xlu0 %331 }
  0xba   : > { %v713_v51 = vmax.f32 %v649_v46, 0.0  ;;  %v712_v52 = vmax.f32 %v648_v48, 0.0  ;;  %v582_v53 = vmul.f32 %v6241_v42, %v337_v49  ;;  %v581_v54 = vmul.f32 %v6241_v42, %v332_v50  ;;  %1861 = vrot.lane.b32.xlu0 %v6136_v20, %s5981_s20 }
  0xbb   : > { %5379 = vmatmul.mubr.msk.bf16.gmra.mxu0 %vm813_vm0, %v771_v45  ;;  %1863 = vrot.lane.b32.xlu1 %v6133_v19, %s5981_s20 }
  0xbc   : > { %v772_v55 = vpack.c.bf16 %v713_v51, %v712_v52  ;;  %v651_v57 = vadd.f32 %v6248_v47, %v582_v53  ;;  %v650_v58 = vadd.f32 %v6248_v47, %v581_v54 }
  0xbd   : > { %v347_v59 = vpop.permute.xlu1 %346  ;;  %v342_v60 = vpop.permute.xlu0 %341 }
  0xbe   : > { %v715_v61 = vmax.f32 %v651_v57, 0.0  ;;  %v714_v62 = vmax.f32 %v650_v58, 0.0  ;;  %v584_v63 = vmul.f32 %v6241_v42, %v347_v59  ;;  %v583_v0 = vmul.f32 %v6241_v42, %v342_v60  ;;  %5382 = vmatprep.mubr.msk.bf16.mxu0 %vm813_vm0, %v772_v55  ;;  %1865 = vrot.lane.b32.xlu0 %v6144_v22, %s5981_s20 }
  0xbf   : > { %1867 = vrot.lane.b32.xlu1 %v6141_v21, %s5981_s20 }
  0xc0   : > { %v773_v15 = vpack.c.bf16 %v715_v61, %v714_v62  ;;  %v653_v16 = vadd.f32 %v6248_v47, %v584_v63  ;;  %v652_v39 = vadd.f32 %v6248_v47, %v583_v0 }
  0xc1   : > { %v357_v40 = vpop.permute.xlu1 %356  ;;  %v352_v41 = vpop.permute.xlu0 %351 }
  0xc2   : > { %v717_v43 = vmax.f32 %v653_v16, 0.0  ;;  %v716_v44 = vmax.f32 %v652_v39, 0.0  ;;  %v586_v45 = vmul.f32 %v6241_v42, %v357_v40  ;;  %v585_v46 = vmul.f32 %v6241_v42, %v352_v41  ;;  %1869 = vrot.lane.b32.xlu0 %v6152_v24, %s5981_s20 }
  0xc3   : > { %5383 = vmatmul.mubr.msk.bf16.gmra.mxu0 %vm813_vm0, %v773_v15  ;;  %1871 = vrot.lane.b32.xlu1 %v6149_v23, %s5981_s20 }
  0xc4   : > { %v774_v48 = vpack.c.bf16 %v717_v43, %v716_v44  ;;  %v655_v49 = vadd.f32 %v6248_v47, %v586_v45  ;;  %v654_v50 = vadd.f32 %v6248_v47, %v585_v46 }
  0xc5   : > { %v367_v51 = vpop.permute.xlu1 %366  ;;  %v362_v52 = vpop.permute.xlu0 %361 }
  0xc6   : > { %v719_v53 = vmax.f32 %v655_v49, 0.0  ;;  %v718_v54 = vmax.f32 %v654_v50, 0.0  ;;  %v588_v55 = vmul.f32 %v6241_v42, %v367_v51  ;;  %v587_v57 = vmul.f32 %v6241_v42, %v362_v52  ;;  %5386 = vmatprep.mubr.msk.bf16.mxu0 %vm813_vm0, %v774_v48  ;;  %1873 = vrot.lane.b32.xlu0 %v6160_v26, %s5981_s20 }
  0xc7   : > { %1875 = vrot.lane.b32.xlu1 %v6157_v25, %s5981_s20 }
  0xc8   : > { %v775_v58 = vpack.c.bf16 %v719_v53, %v718_v54  ;;  %v657_v59 = vadd.f32 %v6248_v47, %v588_v55  ;;  %v656_v60 = vadd.f32 %v6248_v47, %v587_v57 }
  0xc9   : > { %v377_v61 = vpop.permute.xlu1 %376  ;;  %v372_v62 = vpop.permute.xlu0 %371 }
  0xca   : > { %v721_v63 = vmax.f32 %v657_v59, 0.0  ;;  %v720_v0 = vmax.f32 %v656_v60, 0.0  ;;  %v590_v15 = vmul.f32 %v6241_v42, %v377_v61  ;;  %v589_v16 = vmul.f32 %v6241_v42, %v372_v62  ;;  %1877 = vrot.lane.b32.xlu0 %v6168_v28, %s5981_s20 }
  0xcb   : > { %5387 = vmatmul.mubr.msk.bf16.gmra.mxu0 %vm813_vm0, %v775_v58  ;;  %1879 = vrot.lane.b32.xlu1 %v6165_v27, %s5981_s20 }
  0xcc   : > { %v776_v39 = vpack.c.bf16 %v721_v63, %v720_v0  ;;  %v659_v40 = vadd.f32 %v6248_v47, %v590_v15  ;;  %v658_v41 = vadd.f32 %v6248_v47, %v589_v16 }
  0xcd   : > { %v387_v43 = vpop.permute.xlu1 %386  ;;  %v382_v44 = vpop.permute.xlu0 %381 }
  0xce   : > { %v723_v45 = vmax.f32 %v659_v40, 0.0  ;;  %v722_v46 = vmax.f32 %v658_v41, 0.0  ;;  %v592_v48 = vmul.f32 %v6241_v42, %v387_v43  ;;  %v591_v49 = vmul.f32 %v6241_v42, %v382_v44  ;;  %5390 = vmatprep.mubr.msk.bf16.mxu0 %vm813_vm0, %v776_v39  ;;  %1881 = vrot.lane.b32.xlu0 %v6176_v30, %s5981_s20 }
  0xcf   : > { %1883 = vrot.lane.b32.xlu1 %v6173_v29, %s5981_s20 }
  0xd0   : > { %v777_v50 = vpack.c.bf16 %v723_v45, %v722_v46  ;;  %v661_v51 = vadd.f32 %v6248_v47, %v592_v48  ;;  %v660_v52 = vadd.f32 %v6248_v47, %v591_v49 }
  0xd1   : > { %v397_v53 = vpop.permute.xlu1 %396  ;;  %v392_v54 = vpop.permute.xlu0 %391 }
  0xd2   : > { %v725_v55 = vmax.f32 %v661_v51, 0.0  ;;  %v724_v57 = vmax.f32 %v660_v52, 0.0  ;;  %v594_v58 = vmul.f32 %v6241_v42, %v397_v53  ;;  %v593_v59 = vmul.f32 %v6241_v42, %v392_v54  ;;  %1885 = vrot.lane.b32.xlu0 %v6184_v32, %s5981_s20 }
  0xd3   : > { %5391 = vmatmul.mubr.msk.bf16.gmra.mxu0 %vm813_vm0, %v777_v50  ;;  %1887 = vrot.lane.b32.xlu1 %v6181_v31, %s5981_s20 }
  0xd4   : > { %v778_v60 = vpack.c.bf16 %v725_v55, %v724_v57  ;;  %v663_v61 = vadd.f32 %v6248_v47, %v594_v58  ;;  %v662_v62 = vadd.f32 %v6248_v47, %v593_v59 }
  0xd5   : > { %v407_v63 = vpop.permute.xlu1 %406  ;;  %v402_v0 = vpop.permute.xlu0 %401 }
  0xd6   : > { %v727_v15 = vmax.f32 %v663_v61, 0.0  ;;  %v726_v16 = vmax.f32 %v662_v62, 0.0  ;;  %v596_v39 = vmul.f32 %v6241_v42, %v407_v63  ;;  %v595_v40 = vmul.f32 %v6241_v42, %v402_v0  ;;  %5394 = vmatprep.mubr.msk.bf16.mxu0 %vm813_vm0, %v778_v60  ;;  %1889 = vrot.lane.b32.xlu0 %v6192_v34, %s5981_s20 }
  0xd7   : > { %1891 = vrot.lane.b32.xlu1 %v6189_v33, %s5981_s20 }
  0xd8   : > { %v779_v41 = vpack.c.bf16 %v727_v15, %v726_v16  ;;  %v665_v43 = vadd.f32 %v6248_v47, %v596_v39  ;;  %v664_v44 = vadd.f32 %v6248_v47, %v595_v40  ;;  %v5756_v15 = vld [vmem:[%s9574_s1 + $0x20] sm:$0xff]  }
  0xd9   : > { %v417_v45 = vpop.permute.xlu1 %416  ;;  %v412_v46 = vpop.permute.xlu0 %411 }
  0xda   : > { %v598_v48 = vmul.f32 %v6241_v42, %v417_v45  ;;  %v597_v49 = vmul.f32 %v6241_v42, %v412_v46  ;;  %v728_v50 = vmax.f32 %v664_v44, 0.0  ;;  %v729_v51 = vmax.f32 %v665_v43, 0.0  ;;  %1893 = vrot.lane.b32.xlu0 %v6200_v36, %s5981_s20 }
  0xdb   : > { %5395 = vmatmul.mubr.msk.bf16.gmra.mxu0 %vm813_vm0, %v779_v41  ;;  %1895 = vrot.lane.b32.xlu1 %v6197_v35, %s5981_s20 }
  0xdc   : > { %v667_v52 = vadd.f32 %v6248_v47, %v598_v48  ;;  %v666_v53 = vadd.f32 %v6248_v47, %v597_v49  ;;  %v780_v54 = vpack.c.bf16 %v729_v51, %v728_v50 }
  0xdd   : > { %v427_v55 = vpop.permute.xlu1 %426  ;;  %v422_v57 = vpop.permute.xlu0 %421 }
  0xde   : > { %v731_v58 = vmax.f32 %v667_v52, 0.0  ;;  %v730_v59 = vmax.f32 %v666_v53, 0.0  ;;  %v600_v60 = vmul.f32 %v6241_v42, %v427_v55  ;;  %v599_v61 = vmul.f32 %v6241_v42, %v422_v57  ;;  %5398 = vmatprep.mubr.msk.bf16.mxu1 %vm813_vm0, %v780_v54  ;;  %1897 = vrot.lane.b32.xlu0 %v6208_v38, %s5981_s20 }
  0xdf   : > { %1899 = vrot.lane.b32.xlu1 %v6205_v37, %s5981_s20  ;;  %v5890_v37 = vld [vmem:[%s6060_s28 + $0x128] sm:$0xff] }
  0xe0   : > { %v781_v62 = vpack.c.bf16 %v731_v58, %v730_v59  ;;  %v669_v63 = vadd.f32 %v6248_v47, %v600_v60  ;;  %v668_v0 = vadd.f32 %v6248_v47, %v599_v61 }
  0xe1   : > { %v437_v16 = vpop.permute.xlu1 %436  ;;  %v432_v39 = vpop.permute.xlu0 %431 }
  0xe2   : > { %v733_v40 = vmax.f32 %v669_v63, 0.0  ;;  %v732_v41 = vmax.f32 %v668_v0, 0.0  ;;  %v602_v43 = vmul.f32 %v6241_v42, %v437_v16  ;;  %v601_v44 = vmul.f32 %v6241_v42, %v432_v39  ;;  %5399 = vmatmul.mubr.msk.bf16.vlgmr.msra.gmra.mxu1 %vm813_vm0, %v781_v62 }
  0xe3   : > { %5431 = vmatpush3.bf16.msra.mxu1 %v6259_v56  ;;  %1903 = vrot.lane.b32.xlu1 %v5890_v37, %s5981_s20  ;;  %v5903_v37 = vld [vmem:[%s6060_s28 + $0x190] sm:$0xff] }
  0xe4   : > { %v782_v45 = vpack.c.bf16 %v733_v40, %v732_v41  ;;  %v671_v46 = vadd.f32 %v6248_v47, %v602_v43  ;;  %v670_v48 = vadd.f32 %v6248_v47, %v601_v44  ;;  %5432 = vmatprep.subr.bf16.mxu1 %v5756_v15 }
  0xe5   : > { %v447_v49 = vpop.permute.xlu1 %446  ;;  %v442_v50 = vpop.permute.xlu0 %441 }
  0xe6   : > { %v735_v51 = vmax.f32 %v671_v46, 0.0  ;;  %v734_v52 = vmax.f32 %v670_v48, 0.0  ;;  %v604_v53 = vmul.f32 %v6241_v42, %v447_v49  ;;  %v603_v54 = vmul.f32 %v6241_v42, %v442_v50  ;;  %5402 = vmatprep.mubr.msk.bf16.mxu1 %vm813_vm0, %v782_v45 }
  0xe7   : > { %5433 = vmatpush3.bf16.msra.mxu1 %v5756_v15 }
  0xe8   : > { %v783_v55 = vpack.c.bf16 %v735_v51, %v734_v52  ;;  %v673_v56 = vadd.f32 %v6248_v47, %v604_v53  ;;  %v672_v57 = vadd.f32 %v6248_v47, %v603_v54 }
  0xe9   : > { %v457_v58 = vpop.permute.xlu1 %456  ;;  %v452_v59 = vpop.permute.xlu0 %451 }
  0xea   : > { %v737_v60 = vmax.f32 %v673_v56, 0.0  ;;  %v736_v61 = vmax.f32 %v672_v57, 0.0  ;;  %v606_v62 = vmul.f32 %v6241_v42, %v457_v58  ;;  %v605_v63 = vmul.f32 %v6241_v42, %v452_v59  ;;  %5403 = vmatmul.mubr.msk.bf16.gmra.mxu1 %vm813_vm0, %v783_v55 }
  0xec   : > { %v784_v0 = vpack.c.bf16 %v737_v60, %v736_v61  ;;  %v675_v16 = vadd.f32 %v6248_v47, %v606_v62  ;;  %v674_v15 = vadd.f32 %v6248_v47, %v605_v63 }
  0xed   : > { %v467_v39 = vpop.permute.xlu1 %466  ;;  %v462_v40 = vpop.permute.xlu0 %461 }
  0xee   : > { %v739_v41 = vmax.f32 %v675_v16, 0.0  ;;  %v738_v43 = vmax.f32 %v674_v15, 0.0  ;;  %v608_v44 = vmul.f32 %v6241_v42, %v467_v39  ;;  %v607_v45 = vmul.f32 %v6241_v42, %v462_v40  ;;  %5406 = vmatprep.mubr.msk.bf16.mxu1 %vm813_vm0, %v784_v0 }
  0xf0   : > { %v785_v46 = vpack.c.bf16 %v739_v41, %v738_v43  ;;  %v677_v48 = vadd.f32 %v6248_v47, %v608_v44  ;;  %v676_v49 = vadd.f32 %v6248_v47, %v607_v45 }
  0xf1   : > { %v477_v50 = vpop.permute.xlu1 %476  ;;  %v472_v51 = vpop.permute.xlu0 %471 }
  0xf2   : > { %v741_v52 = vmax.f32 %v677_v48, 0.0  ;;  %v740_v53 = vmax.f32 %v676_v49, 0.0  ;;  %v610_v54 = vmul.f32 %v6241_v42, %v477_v50  ;;  %v609_v55 = vmul.f32 %v6241_v42, %v472_v51  ;;  %5407 = vmatmul.mubr.msk.bf16.gmra.mxu1 %vm813_vm0, %v785_v46 }
  0xf4   : > { %v786_v56 = vpack.c.bf16 %v741_v52, %v740_v53  ;;  %v679_v57 = vadd.f32 %v6248_v47, %v610_v54  ;;  %v678_v58 = vadd.f32 %v6248_v47, %v609_v55 }
  0xf5   : > { %v487_v59 = vpop.permute.xlu1 %486  ;;  %v482_v60 = vpop.permute.xlu0 %481 }
  0xf6   : > { %v743_v61 = vmax.f32 %v679_v57, 0.0  ;;  %v742_v62 = vmax.f32 %v678_v58, 0.0  ;;  %v612_v63 = vmul.f32 %v6241_v42, %v487_v59  ;;  %v611_v0 = vmul.f32 %v6241_v42, %v482_v60  ;;  %5410 = vmatprep.mubr.msk.bf16.mxu1 %vm813_vm0, %v786_v56 }
  0xf8   : > { %v787_v16 = vpack.c.bf16 %v743_v61, %v742_v62  ;;  %v681_v15 = vadd.f32 %v6248_v47, %v612_v63  ;;  %v680_v39 = vadd.f32 %v6248_v47, %v611_v0 }
  0xf9   : > { %v497_v40 = vpop.permute.xlu1 %496  ;;  %v492_v41 = vpop.permute.xlu0 %491 }
  0xfa   : > { %v745_v43 = vmax.f32 %v681_v15, 0.0  ;;  %v744_v44 = vmax.f32 %v680_v39, 0.0  ;;  %v614_v45 = vmul.f32 %v6241_v42, %v497_v40  ;;  %v613_v46 = vmul.f32 %v6241_v42, %v492_v41  ;;  %5411 = vmatmul.mubr.msk.bf16.gmra.mxu1 %vm813_vm0, %v787_v16 }
  0xfc   : > { %v788_v48 = vpack.c.bf16 %v745_v43, %v744_v44  ;;  %v683_v49 = vadd.f32 %v6248_v47, %v614_v45  ;;  %v682_v50 = vadd.f32 %v6248_v47, %v613_v46 }
  0xfd   : > { %v507_v51 = vpop.permute.xlu1 %506  ;;  %v502_v52 = vpop.permute.xlu0 %501 }
  0xfe   : > { %v747_v53 = vmax.f32 %v683_v49, 0.0  ;;  %v746_v54 = vmax.f32 %v682_v50, 0.0  ;;  %v616_v55 = vmul.f32 %v6241_v42, %v507_v51  ;;  %v615_v56 = vmul.f32 %v6241_v42, %v502_v52  ;;  %5414 = vmatprep.mubr.msk.bf16.mxu1 %vm813_vm0, %v788_v48 }
 0x100   : > { %v789_v57 = vpack.c.bf16 %v747_v53, %v746_v54  ;;  %v685_v58 = vadd.f32 %v6248_v47, %v616_v55  ;;  %v684_v59 = vadd.f32 %v6248_v47, %v615_v56 }
 0x101   : > { %v517_v60 = vpop.permute.xlu1 %516  ;;  %v512_v61 = vpop.permute.xlu0 %511 }
 0x102   : > { %v749_v62 = vmax.f32 %v685_v58, 0.0  ;;  %v748_v63 = vmax.f32 %v684_v59, 0.0  ;;  %v618_v0 = vmul.f32 %v6241_v42, %v517_v60  ;;  %v617_v16 = vmul.f32 %v6241_v42, %v512_v61  ;;  %5415 = vmatmul.mubr.msk.bf16.gmra.mxu1 %vm813_vm0, %v789_v57 }
 0x104   : > { %v790_v15 = vpack.c.bf16 %v749_v62, %v748_v63  ;;  %v687_v39 = vadd.f32 %v6248_v47, %v618_v0  ;;  %v686_v40 = vadd.f32 %v6248_v47, %v617_v16 }
 0x105   : > { %v527_v41 = vpop.permute.xlu1 %526  ;;  %v522_v43 = vpop.permute.xlu0 %521 }
 0x106   : > { %v751_v44 = vmax.f32 %v687_v39, 0.0  ;;  %v750_v45 = vmax.f32 %v686_v40, 0.0  ;;  %v620_v46 = vmul.f32 %v6241_v42, %v527_v41  ;;  %v619_v48 = vmul.f32 %v6241_v42, %v522_v43  ;;  %5418 = vmatprep.mubr.msk.bf16.mxu1 %vm813_vm0, %v790_v15 }
 0x108   : > { %v791_v49 = vpack.c.bf16 %v751_v44, %v750_v45  ;;  %v689_v50 = vadd.f32 %v6248_v47, %v620_v46  ;;  %v688_v51 = vadd.f32 %v6248_v47, %v619_v48 }
 0x109   : > { %v537_v52 = vpop.permute.xlu1 %536  ;;  %v532_v53 = vpop.permute.xlu0 %531 }
 0x10a   : > { %v753_v54 = vmax.f32 %v689_v50, 0.0  ;;  %v752_v55 = vmax.f32 %v688_v51, 0.0  ;;  %v622_v56 = vmul.f32 %v6241_v42, %v537_v52  ;;  %v621_v57 = vmul.f32 %v6241_v42, %v532_v53  ;;  %5419 = vmatmul.mubr.msk.bf16.gmra.mxu1 %vm813_vm0, %v791_v49 }
 0x10c   : > { %v792_v58 = vpack.c.bf16 %v753_v54, %v752_v55  ;;  %v691_v59 = vadd.f32 %v6248_v47, %v622_v56  ;;  %v690_v60 = vadd.f32 %v6248_v47, %v621_v57 }
 0x10d   : > { %v547_v61 = vpop.permute.xlu1 %546  ;;  %v542_v62 = vpop.permute.xlu0 %541 }
 0x10e   : > { %v755_v63 = vmax.f32 %v691_v59, 0.0  ;;  %v754_v0 = vmax.f32 %v690_v60, 0.0  ;;  %v624_v16 = vmul.f32 %v6241_v42, %v547_v61  ;;  %v623_v15 = vmul.f32 %v6241_v42, %v542_v62  ;;  %5422 = vmatprep.mubr.msk.bf16.mxu1 %vm813_vm0, %v792_v58 }
 0x110   : > { %v793_v39 = vpack.c.bf16 %v755_v63, %v754_v0  ;;  %v693_v40 = vadd.f32 %v6248_v47, %v624_v16  ;;  %v692_v41 = vadd.f32 %v6248_v47, %v623_v15 }
 0x111   : > { %v557_v43 = vpop.permute.xlu1 %556  ;;  %v552_v44 = vpop.permute.xlu0 %551 }
 0x112   : > { %v757_v45 = vmax.f32 %v693_v40, 0.0  ;;  %v756_v46 = vmax.f32 %v692_v41, 0.0  ;;  %v626_v48 = vmul.f32 %v6241_v42, %v557_v43  ;;  %v625_v49 = vmul.f32 %v6241_v42, %v552_v44  ;;  %5423 = vmatmul.mubr.msk.bf16.gmra.mxu1 %vm813_vm0, %v793_v39 }
 0x114   : > { %v794_v50 = vpack.c.bf16 %v757_v45, %v756_v46  ;;  %v695_v51 = vadd.f32 %v6248_v47, %v626_v48  ;;  %v694_v52 = vadd.f32 %v6248_v47, %v625_v49 }
 0x116   : > { %v759_v53 = vmax.f32 %v695_v51, 0.0  ;;  %v758_v54 = vmax.f32 %v694_v52, 0.0  ;;  %5426 = vmatprep.mubr.msk.bf16.mxu1 %vm813_vm0, %v794_v50 }
 0x118   : > { %v795_v55 = vpack.c.bf16 %v759_v53, %v758_v54 }
 0x11a   : > { %5427 = vmatmul.mubr.msk.bf16.gmra.mxu1 %vm813_vm0, %v795_v55 }
 0x163   : > { %v5368_v1 = vpop.f32.mrf.mxu0 }
 0x164   : > { %v953_v7 = vadd.f32 %v5368_v1, %v6451_v3 }
 0x165   : > { %v944_v2 = vpop.f32.mrf.mxu0 }
 0x166   : > { %v945_v5 = vadd.f32 %v6451_v3, %v944_v2  ;;  %v1201_v14 = vmax.f32 %v953_v7, 0.0 }
 0x167   : > { %v5369_v4 = vpop.f32.mrf.mxu0 }
 0x168   : > { %v956_v6 = vadd.f32 %v5369_v4, %v6451_v3  ;;  %v1199_v12 = vmax.f32 %v945_v5, 0.0 }
 0x169   : > { %v947_v8 = vpop.f32.mrf.mxu0 }
 0x16a   : > { %v948_v9 = vadd.f32 %v6451_v3, %v947_v8  ;;  %v1202_v10 = vmax.f32 %v956_v6, 0.0 }
 0x16b   : > { %v5372_v11 = vpop.f32.mrf.mxu0 }
 0x16c   : > { %v1200_v13 = vmax.f32 %v948_v9, 0.0  ;;  %v1268_v42 = vpack.c.bf16 %v1202_v10, %v1201_v14  ;;  %v969_v19 = vadd.f32 %v5372_v11, %v6451_v3 }
 0x16d   : > { %v960_v17 = vpop.f32.mrf.mxu0 }
 0x16e   : > { %v1267_v18 = vpack.c.bf16 %v1200_v13, %v1199_v12  ;;  %v961_v20 = vadd.f32 %v6451_v3, %v960_v17  ;;  %v1205_v61 = vmax.f32 %v969_v19, 0.0 }
 0x16f   : > { %v5373_v47 = vpop.f32.mrf.mxu0 }
 0x170   : > { %v972_v56 = vadd.f32 %v5373_v47, %v6451_v3  ;;  %5434 = vmatprep.mubr.msk.bf16.mxu1 %vm813_vm0, %v1267_v18  ;;  %v1203_v59 = vmax.f32 %v961_v20, 0.0  ;;  %v5889_v47 = vld [vmem:[%s6060_s28 + $0x120] sm:$0xff] }
 0x171   : > { %v963_v57 = vpop.f32.mrf.mxu0  ;;  %5435 = vmatmul.mubr.msk.bf16.vlgmr.msra.gmra.mxu1 %vm813_vm0, %v1268_v42  ;;  %1901 = vrot.lane.b32.xlu0 %v5889_v47, %s5981_s20 }
 0x172   : > { %v964_v58 = vadd.f32 %v6451_v3, %v963_v57  ;;  %v1206_v21 = vmax.f32 %v972_v56, 0.0 }
 0x173   : > { %v5376_v22 = vpop.f32.mrf.mxu0 }
 0x174   : > { %v1204_v60 = vmax.f32 %v964_v58, 0.0  ;;  %v1270_v0 = vpack.c.bf16 %v1206_v21, %v1205_v61  ;;  %v985_v23 = vadd.f32 %v5376_v22, %v6451_v3 }
 0x175   : > { %v976_v62 = vpop.f32.mrf.mxu0 }
 0x176   : > { %v1269_v63 = vpack.c.bf16 %v1204_v60, %v1203_v59  ;;  %v977_v24 = vadd.f32 %v6451_v3, %v976_v62  ;;  %v1209_v44 = vmax.f32 %v985_v23, 0.0  ;;  %v5891_v59 = vld [vmem:[%s6060_s28 + $0x130] sm:$0xff]  ;;  %v5892_v60 = vld [vmem:[%s6060_s28 + $0x138] sm:$0xff]  ;;  %v5893_v23 = vld [vmem:[%s6060_s28 + $0x140] sm:$0xff] }
 0x177   : > { %v5377_v16 = vpop.f32.mrf.mxu0  ;;  %1905 = vrot.lane.b32.xlu0 %v5891_v59, %s5981_s20  ;;  %1907 = vrot.lane.b32.xlu1 %v5892_v60, %s5981_s20  ;;  %v5905_v60 = vld [vmem:[%s6060_s28 + $0x1a0] sm:$0xff] }
 0x178   : > { %v988_v15 = vadd.f32 %v5377_v16, %v6451_v3  ;;  %5438 = vmatprep.mubr.msk.bf16.mxu1 %vm813_vm0, %v1269_v63  ;;  %v1207_v41 = vmax.f32 %v977_v24, 0.0 }
 0x179   : > { %v979_v39 = vpop.f32.mrf.mxu0  ;;  %5439 = vmatmul.mubr.msk.bf16.gmra.mxu1 %vm813_vm0, %v1270_v0 }
 0x17a   : > { %v980_v40 = vadd.f32 %v6451_v3, %v979_v39  ;;  %v1210_v25 = vmax.f32 %v988_v15, 0.0  ;;  %v5894_v39 = vld [vmem:[%s6060_s28 + $0x148] sm:$0xff] }
 0x17b   : > { %v5380_v26 = vpop.f32.mrf.mxu0  ;;  %1909 = vrot.lane.b32.xlu0 %v5893_v23, %s5981_s20  ;;  %1911 = vrot.lane.b32.xlu1 %v5894_v39, %s5981_s20  ;;  %v5907_v39 = vld [vmem:[%s6060_s28 + $0x1b0] sm:$0xff] }
 0x17c   : > { %v1208_v43 = vmax.f32 %v980_v40, 0.0  ;;  %v1272_v48 = vpack.c.bf16 %v1210_v25, %v1209_v44  ;;  %v1001_v27 = vadd.f32 %v5380_v26, %v6451_v3 }
 0x17d   : > { %v992_v45 = vpop.f32.mrf.mxu0 }
 0x17e   : > { %v1271_v46 = vpack.c.bf16 %v1208_v43, %v1207_v41  ;;  %v993_v28 = vadd.f32 %v6451_v3, %v992_v45  ;;  %v1213_v55 = vmax.f32 %v1001_v27, 0.0 }
 0x17f   : > { %v5381_v49 = vpop.f32.mrf.mxu0 }
 0x180   : > { %v1004_v50 = vadd.f32 %v5381_v49, %v6451_v3  ;;  %5442 = vmatprep.mubr.msk.bf16.mxu1 %vm813_vm0, %v1271_v46  ;;  %v1211_v53 = vmax.f32 %v993_v28, 0.0  ;;  %v5895_v46 = vld [vmem:[%s6060_s28 + $0x150] sm:$0xff] }
 0x181   : > { %v995_v51 = vpop.f32.mrf.mxu0  ;;  %5443 = vmatmul.mubr.msk.bf16.gmra.mxu1 %vm813_vm0, %v1272_v48  ;;  %1913 = vrot.lane.b32.xlu0 %v5895_v46, %s5981_s20  ;;  %v5896_v48 = vld [vmem:[%s6060_s28 + $0x158] sm:$0xff] }
 0x182   : > { %v996_v52 = vadd.f32 %v6451_v3, %v995_v51  ;;  %v1214_v29 = vmax.f32 %v1004_v50, 0.0  ;;  %1915 = vrot.lane.b32.xlu1 %v5896_v48, %s5981_s20  ;;  %v5909_v48 = vld [vmem:[%s6060_s28 + $0x1c0] sm:$0xff] }
 0x183   : > { %v5384_v30 = vpop.f32.mrf.mxu0 }
 0x184   : > { %v1212_v54 = vmax.f32 %v996_v52, 0.0  ;;  %v1274_v4 = vpack.c.bf16 %v1214_v29, %v1213_v55  ;;  %v1017_v31 = vadd.f32 %v5384_v30, %v6451_v3 }
 0x185   : > { %v1008_v1 = vpop.f32.mrf.mxu0 }
 0x186   : > { %v1273_v2 = vpack.c.bf16 %v1212_v54, %v1211_v53  ;;  %v1009_v32 = vadd.f32 %v6451_v3, %v1008_v1  ;;  %v1217_v11 = vmax.f32 %v1017_v31, 0.0  ;;  %v5897_v53 = vld [vmem:[%s6060_s28 + $0x160] sm:$0xff]  ;;  %v5898_v54 = vld [vmem:[%s6060_s28 + $0x168] sm:$0xff]  ;;  %v5899_v31 = vld [vmem:[%s6060_s28 + $0x170] sm:$0xff] }
 0x187   : > { %v5385_v5 = vpop.f32.mrf.mxu0  ;;  %1917 = vrot.lane.b32.xlu0 %v5897_v53, %s5981_s20  ;;  %1919 = vrot.lane.b32.xlu1 %v5898_v54, %s5981_s20  ;;  %v5911_v53 = vld [vmem:[%s6060_s28 + $0x1d0] sm:$0xff]  ;;  %v5912_v54 = vld [vmem:[%s6060_s28 + $0x1d8] sm:$0xff] }
 0x188   : > { %v1020_v6 = vadd.f32 %v5385_v5, %v6451_v3  ;;  %5446 = vmatprep.mubr.msk.bf16.mxu1 %vm813_vm0, %v1273_v2  ;;  %v1215_v9 = vmax.f32 %v1009_v32, 0.0 }
 0x189   : > { %v1011_v7 = vpop.f32.mrf.mxu0  ;;  %5447 = vmatmul.mubr.msk.bf16.gmra.mxu1 %vm813_vm0, %v1274_v4 }
 0x18a   : > { %v1012_v8 = vadd.f32 %v6451_v3, %v1011_v7  ;;  %v1218_v33 = vmax.f32 %v1020_v6, 0.0  ;;  %v5900_v7 = vld [vmem:[%s6060_s28 + $0x178] sm:$0xff] }
 0x18b   : > { %v5388_v34 = vpop.f32.mrf.mxu0  ;;  %1921 = vrot.lane.b32.xlu0 %v5899_v31, %s5981_s20  ;;  %1923 = vrot.lane.b32.xlu1 %v5900_v7, %s5981_s20  ;;  %v5913_v31 = vld [vmem:[%s6060_s28 + $0x1e0] sm:$0xff]  ;;  %v5914_v7 = vld [vmem:[%s6060_s28 + $0x1e8] sm:$0xff] }
 0x18c   : > { %v1216_v10 = vmax.f32 %v1012_v8, 0.0  ;;  %v1276_v14 = vpack.c.bf16 %v1218_v33, %v1217_v11  ;;  %v1033_v18 = vadd.f32 %v5388_v34, %v6451_v3 }
 0x18d   : > { %v1024_v12 = vpop.f32.mrf.mxu0 }
 0x18e   : > { %v1275_v13 = vpack.c.bf16 %v1216_v10, %v1215_v9  ;;  %v1025_v17 = vadd.f32 %v6451_v3, %v1024_v12  ;;  %v1221_v58 = vmax.f32 %v1033_v18, 0.0 }
 0x18f   : > { %v5389_v36 = vpop.f32.mrf.mxu0 }
 0x190   : > { %v1036_v35 = vadd.f32 %v5389_v36, %v6451_v3  ;;  %5450 = vmatprep.mubr.msk.bf16.mxu1 %vm813_vm0, %v1275_v13  ;;  %v1219_v19 = vmax.f32 %v1025_v17, 0.0  ;;  %v5901_v13 = vld [vmem:[%s6060_s28 + $0x180] sm:$0xff] }
 0x191   : > { %v1027_v42 = vpop.f32.mrf.mxu0  ;;  %5451 = vmatmul.mubr.msk.bf16.gmra.mxu1 %vm813_vm0, %v1276_v14  ;;  %1925 = vrot.lane.b32.xlu0 %v5901_v13, %s5981_s20  ;;  %v5902_v14 = vld [vmem:[%s6060_s28 + $0x188] sm:$0xff] }
 0x192   : > { %v1028_v38 = vadd.f32 %v6451_v3, %v1027_v42  ;;  %v1222_v20 = vmax.f32 %v1036_v35, 0.0  ;;  %1927 = vrot.lane.b32.xlu1 %v5902_v14, %s5981_s20 }
 0x193   : > { %v5392_v56 = vpop.f32.mrf.mxu0 }
 0x194   : > { %v1220_v57 = vmax.f32 %v1028_v38, 0.0  ;;  %v1278_v61 = vpack.c.bf16 %v1222_v20, %v1221_v58  ;;  %v1049_v16 = vadd.f32 %v5392_v56, %v6451_v3  ;;  %v5904_v20 = vld [vmem:[%s6060_s28 + $0x198] sm:$0xff] }
 0x195   : > { %v1040_v21 = vpop.f32.mrf.mxu0  ;;  %1929 = vrot.lane.b32.xlu0 %v5903_v37, %s5981_s20 }
 0x196   : > { %v1277_v22 = vpack.c.bf16 %v1220_v57, %v1219_v19  ;;  %v1041_v63 = vadd.f32 %v6451_v3, %v1040_v21  ;;  %v1225_v43 = vmax.f32 %v1049_v16, 0.0  ;;  %1931 = vrot.lane.b32.xlu1 %v5904_v20, %s5981_s20 }
 0x197   : > { %v5393_v62 = vpop.f32.mrf.mxu0 }
 0x198   : > { %v1052_v0 = vadd.f32 %v5393_v62, %v6451_v3  ;;  %5454 = vmatprep.mubr.msk.bf16.mxu1 %vm813_vm0, %v1277_v22  ;;  %v1223_v26 = vmax.f32 %v1041_v63, 0.0 }
 0x199   : > { %v1043_v24 = vpop.f32.mrf.mxu0  ;;  %5455 = vmatmul.mubr.msk.bf16.gmra.mxu1 %vm813_vm0, %v1278_v61  ;;  %1933 = vrot.lane.b32.xlu0 %v5905_v60, %s5981_s20  ;;  %v5906_v61 = vld [vmem:[%s6060_s28 + $0x1a8] sm:$0xff] }
 0x19a   : > { %v1044_v15 = vadd.f32 %v6451_v3, %v1043_v24  ;;  %v1226_v40 = vmax.f32 %v1052_v0, 0.0  ;;  %1935 = vrot.lane.b32.xlu1 %v5906_v61, %s5981_s20 }
 0x19b   : > { %v5396_v25 = vpop.f32.mrf.mxu0 }
 0x19c   : > { %v1224_v41 = vmax.f32 %v1044_v15, 0.0  ;;  %v1280_v49 = vpack.c.bf16 %v1226_v40, %v1225_v43  ;;  %v1065_v51 = vadd.f32 %v5396_v25, %v6451_v3  ;;  %v5908_v40 = vld [vmem:[%s6060_s28 + $0x1b8] sm:$0xff] }
 0x19d   : > { %v1056_v44 = vpop.f32.mrf.mxu0  ;;  %1937 = vrot.lane.b32.xlu0 %v5907_v39, %s5981_s20 }
 0x19e   : > { %v1279_v45 = vpack.c.bf16 %v1224_v41, %v1223_v26  ;;  %v1057_v50 = vadd.f32 %v6451_v3, %v1056_v44  ;;  %v1229_v5 = vmax.f32 %v1065_v51, 0.0  ;;  %1939 = vrot.lane.b32.xlu1 %v5908_v40, %s5981_s20 }
 0x19f   : > { %v5397_v28 = vpop.f32.mrf.mxu0 }
 0x1a0   : > { %v1068_v27 = vadd.f32 %v5397_v28, %v6451_v3  ;;  %5458 = vmatprep.mubr.msk.bf16.mxu1 %vm813_vm0, %v1279_v45  ;;  %v1227_v1 = vmax.f32 %v1057_v50, 0.0 }
 0x1a1   : > { %v1059_v52 = vpop.f32.mrf.mxu0  ;;  %5459 = vmatmul.mubr.msk.bf16.gmra.mxu1 %vm813_vm0, %v1280_v49  ;;  %1941 = vrot.lane.b32.xlu0 %v5909_v48, %s5981_s20  ;;  %v5910_v49 = vld [vmem:[%s6060_s28 + $0x1c8] sm:$0xff] }
 0x1a2   : > { %v1060_v29 = vadd.f32 %v6451_v3, %v1059_v52  ;;  %v5400_v30 = vpop.f32.mrf.mxu1  ;;  %v1230_v55 = vmax.f32 %v1068_v27, 0.0  ;;  %1943 = vrot.lane.b32.xlu1 %v5910_v49, %s5981_s20 }
 0x1a3   : > { %v1081_v10 = vadd.f32 %v5400_v30, %v6451_v3 }
 0x1a4   : > { %v1228_v2 = vmax.f32 %v1060_v29, 0.0  ;;  %v1072_v4 = vpop.f32.mrf.mxu1  ;;  %v1282_v8 = vpack.c.bf16 %v1230_v55, %v1229_v5 }
 0x1a5   : > { %v1073_v33 = vadd.f32 %v6451_v3, %v1072_v4  ;;  %v1233_v42 = vmax.f32 %v1081_v10, 0.0  ;;  %1945 = vrot.lane.b32.xlu0 %v5911_v53, %s5981_s20 }
 0x1a6   : > { %v1281_v32 = vpack.c.bf16 %v1228_v2, %v1227_v1  ;;  %v5401_v6 = vpop.f32.mrf.mxu1  ;;  %1947 = vrot.lane.b32.xlu1 %v5912_v54, %s5981_s20 }
 0x1a7   : > { %v1084_v34 = vadd.f32 %v5401_v6, %v6451_v3  ;;  %v1231_v36 = vmax.f32 %v1073_v33, 0.0 }
 0x1a8   : > { %v1075_v9 = vpop.f32.mrf.mxu1  ;;  %5462 = vmatprep.mubr.msk.bf16.mxu1 %vm813_vm0, %v1281_v32 }
 0x1a9   : > { %v1076_v11 = vadd.f32 %v6451_v3, %v1075_v9  ;;  %5463 = vmatmul.mubr.msk.bf16.gmra.mxu1 %vm813_vm0, %v1282_v8  ;;  %v1234_v17 = vmax.f32 %v1084_v34, 0.0  ;;  %1949 = vrot.lane.b32.xlu0 %v5913_v31, %s5981_s20  ;;  %v6645_v31 = vpop.permute.xlu0 %1829 }
 0x1aa   : > { %v5404_v12 = vpop.f32.mrf.mxu1  ;;  %1951 = vrot.lane.b32.xlu1 %v5914_v7, %s5981_s20  ;;  %v6647_v7 = vpop.permute.xlu1 %1831 }
 0x1ab   : > { %v1232_v35 = vmax.f32 %v1076_v11, 0.0  ;;  %v1284_v56 = vpack.c.bf16 %v1234_v17, %v1233_v42  ;;  %v1097_v21 = vadd.f32 %v5404_v12, %v6451_v3 }
 0x1ac   : > { %v1088_v18 = vpop.f32.mrf.mxu1 }
 0x1ad   : > { %v1283_v38 = vpack.c.bf16 %v1232_v35, %v1231_v36  ;;  %v1089_v19 = vadd.f32 %v6451_v3, %v1088_v18  ;;  %v1237_v24 = vmax.f32 %v1097_v21, 0.0 }
 0x1ae   : > { %v5405_v47 = vpop.f32.mrf.mxu1 }
 0x1af   : > { %v1100_v57 = vadd.f32 %v5405_v47, %v6451_v3  ;;  %5466 = vmatprep.mubr.msk.bf16.mxu1 %vm813_vm0, %v1283_v38  ;;  %v1235_v62 = vmax.f32 %v1089_v19, 0.0 }
 0x1b0   : > { %v1091_v58 = vpop.f32.mrf.mxu1 }
 0x1b1   : > { %v1092_v22 = vadd.f32 %v6451_v3, %v1091_v58  ;;  %5467 = vmatmul.mubr.msk.bf16.gmra.mxu1 %vm813_vm0, %v1284_v56  ;;  %v1238_v63 = vmax.f32 %v1100_v57, 0.0 }
 0x1b2   : > { %v5408_v59 = vpop.f32.mrf.mxu1 }
 0x1b3   : > { %v1236_v0 = vmax.f32 %v1092_v22, 0.0  ;;  %v1286_v25 = vpack.c.bf16 %v1238_v63, %v1237_v24  ;;  %v1113_v44 = vadd.f32 %v5408_v59, %v6451_v3 }
 0x1b4   : > { %v1104_v16 = vpop.f32.mrf.mxu1 }
 0x1b5   : > { %v1285_v15 = vpack.c.bf16 %v1236_v0, %v1235_v62  ;;  %v1105_v26 = vadd.f32 %v6451_v3, %v1104_v16  ;;  %v1241_v52 = vmax.f32 %v1113_v44, 0.0 }
 0x1b6   : > { %v5409_v23 = vpop.f32.mrf.mxu1 }
 0x1b7   : > { %v1116_v41 = vadd.f32 %v5409_v23, %v6451_v3  ;;  %5470 = vmatprep.mubr.msk.bf16.mxu1 %vm813_vm0, %v1285_v15  ;;  %v1239_v28 = vmax.f32 %v1105_v26, 0.0 }
 0x1b8   : > { %v1107_v43 = vpop.f32.mrf.mxu1 }
 0x1b9   : > { %v1108_v45 = vadd.f32 %v6451_v3, %v1107_v43  ;;  %5471 = vmatmul.mubr.msk.bf16.gmra.mxu1 %vm813_vm0, %v1286_v25  ;;  %v1242_v50 = vmax.f32 %v1116_v41, 0.0 }
 0x1ba   : > { %v5412_v46 = vpop.f32.mrf.mxu1 }
 0x1bb   : > { %v1240_v27 = vmax.f32 %v1108_v45, 0.0  ;;  %v1288_v55 = vpack.c.bf16 %v1242_v50, %v1241_v52  ;;  %v1129_v5 = vadd.f32 %v5412_v46, %v6451_v3 }
 0x1bc   : > { %v1120_v51 = vpop.f32.mrf.mxu1 }
 0x1bd   : > { %v1287_v29 = vpack.c.bf16 %v1240_v27, %v1239_v28  ;;  %v1121_v1 = vadd.f32 %v6451_v3, %v1120_v51  ;;  %v1245_v10 = vmax.f32 %v1129_v5, 0.0 }
 0x1be   : > { %v5413_v30 = vpop.f32.mrf.mxu1 }
 0x1bf   : > { %v1132_v2 = vadd.f32 %v5413_v30, %v6451_v3  ;;  %5474 = vmatprep.mubr.msk.bf16.mxu1 %vm813_vm0, %v1287_v29  ;;  %v1243_v8 = vmax.f32 %v1121_v1, 0.0 }
 0x1c0   : > { %v1123_v4 = vpop.f32.mrf.mxu1 }
 0x1c1   : > { %v1124_v32 = vadd.f32 %v6451_v3, %v1123_v4  ;;  %5475 = vmatmul.mubr.msk.bf16.gmra.mxu1 %vm813_vm0, %v1288_v55  ;;  %v1246_v33 = vmax.f32 %v1132_v2, 0.0 }
 0x1c2   : > { %v5416_v6 = vpop.f32.mrf.mxu1 }
 0x1c3   : > { %v1244_v34 = vmax.f32 %v1124_v32, 0.0  ;;  %v1290_v13 = vpack.c.bf16 %v1246_v33, %v1245_v10  ;;  %v1145_v35 = vadd.f32 %v5416_v6, %v6451_v3  ;;  %v6651_v33 = vpop.permute.xlu1 %1835 }
 0x1c4   : > { %v1136_v9 = vpop.f32.mrf.mxu1 }
 0x1c5   : > { %v1289_v11 = vpack.c.bf16 %v1244_v34, %v1243_v8  ;;  %v1137_v14 = vadd.f32 %v6451_v3, %v1136_v9  ;;  %v1249_v56 = vmax.f32 %v1145_v35, 0.0  ;;  %v6649_v8 = vpop.permute.xlu0 %1833 }
 0x1c6   : > { %v5417_v12 = vpop.f32.mrf.mxu1 }
 0x1c7   : > { %v1148_v36 = vadd.f32 %v5417_v12, %v6451_v3  ;;  %5478 = vmatprep.mubr.msk.bf16.mxu1 %vm813_vm0, %v1289_v11  ;;  %v1247_v38 = vmax.f32 %v1137_v14, 0.0  ;;  %v6655_v34 = vpop.permute.xlu1 %1839 }
 0x1c8   : > { %v1139_v17 = vpop.f32.mrf.mxu1 }
 0x1c9   : > { %v1140_v18 = vadd.f32 %v6451_v3, %v1139_v17  ;;  %5479 = vmatmul.mubr.msk.bf16.gmra.mxu1 %vm813_vm0, %v1290_v13  ;;  %v1250_v47 = vmax.f32 %v1148_v36, 0.0 }
 0x1ca   : > { %v5420_v42 = vpop.f32.mrf.mxu1 }
 0x1cb   : > { %v1248_v37 = vmax.f32 %v1140_v18, 0.0  ;;  %v1292_v58 = vpack.c.bf16 %v1250_v47, %v1249_v56  ;;  %v1161_v60 = vadd.f32 %v5420_v42, %v6451_v3  ;;  %v6659_v10 = vpop.permute.xlu1 %1843 }
 0x1cc   : > { %v1152_v20 = vpop.f32.mrf.mxu1 }
 0x1cd   : > { %v1291_v19 = vpack.c.bf16 %v1248_v37, %v1247_v38  ;;  %v1153_v21 = vadd.f32 %v6451_v3, %v1152_v20  ;;  %v1253_v15 = vmax.f32 %v1161_v60, 0.0  ;;  %v6682_v38 = vld [vmem:[%s9575_s2 + $0x2] ss:$0 sm:$0xff] }
 0x1ce   : > { %v5421_v57 = vpop.f32.mrf.mxu1 }
 0x1cf   : > { %v1164_v22 = vadd.f32 %v5421_v57, %v6451_v3  ;;  %5482 = vmatprep.mubr.msk.bf16.mxu1 %vm813_vm0, %v1291_v19  ;;  %v1251_v63 = vmax.f32 %v1153_v21, 0.0  ;;  %v6663_v12 = vpop.permute.xlu1 %1847 }
 0x1d0   : > { %v1155_v59 = vpop.f32.mrf.mxu1 }
 0x1d1   : > { %v1156_v61 = vadd.f32 %v6451_v3, %v1155_v59  ;;  %5483 = vmatmul.mubr.msk.bf16.gmra.mxu1 %vm813_vm0, %v1292_v58  ;;  %v1254_v0 = vmax.f32 %v1164_v22, 0.0 }
 0x1d2   : > { %v5424_v62 = vpop.f32.mrf.mxu1 }
 0x1d3   : > { %v1252_v16 = vmax.f32 %v1156_v61, 0.0  ;;  %v1294_v40 = vpack.c.bf16 %v1254_v0, %v1253_v15  ;;  %v1177_v43 = vadd.f32 %v5424_v62, %v6451_v3  ;;  %v6667_v14 = vpop.permute.xlu1 %1851 }
 0x1d4   : > { %v1168_v24 = vpop.f32.mrf.mxu1 }
 0x1d5   : > { %v1293_v23 = vpack.c.bf16 %v1252_v16, %v1251_v63  ;;  %v1169_v25 = vadd.f32 %v6451_v3, %v1168_v24  ;;  %v1257_v50 = vmax.f32 %v1177_v43, 0.0 }
 0x1d6   : > { %v5425_v39 = vpop.f32.mrf.mxu1 }
 0x1d7   : > { %v1180_v26 = vadd.f32 %v5425_v39, %v6451_v3  ;;  %5486 = vmatprep.mubr.msk.bf16.mxu1 %vm813_vm0, %v1293_v23  ;;  %v1255_v46 = vmax.f32 %v1169_v25, 0.0  ;;  %v6671_v17 = vpop.permute.xlu1 %1855 }
 0x1d8   : > { %v1171_v41 = vpop.f32.mrf.mxu1 }
 0x1d9   : > { %v1172_v44 = vadd.f32 %v6451_v3, %v1171_v41  ;;  %5487 = vmatmul.mubr.msk.bf16.gmra.mxu1 %vm813_vm0, %v1294_v40  ;;  %v1258_v48 = vmax.f32 %v1180_v26, 0.0 }
 0x1da   : > { %v5428_v45 = vpop.f32.mrf.mxu1 }
 0x1db   : > { %v1256_v49 = vmax.f32 %v1172_v44, 0.0  ;;  %v1296_v52 = vpack.c.bf16 %v1258_v48, %v1257_v50  ;;  %v1193_v54 = vadd.f32 %v5428_v45, %v6451_v3  ;;  %v6675_v18 = vpop.permute.xlu1 %1859 }
 0x1dc   : > { %v1184_v28 = vpop.f32.mrf.mxu1 }
 0x1dd   : > { %v1295_v27 = vpack.c.bf16 %v1256_v49, %v1255_v46  ;;  %v1185_v29 = vadd.f32 %v6451_v3, %v1184_v28  ;;  %v1261_v5 = vmax.f32 %v1193_v54, 0.0  ;;  %v2405_v28 = vld [vmem:[%s9574_s1 + $0x30] sm:$0xf] }
 0x1de   : > { %v5429_v51 = vpop.f32.mrf.mxu1  ;;  %5704 = vmatprep.subr.msk.bf16.mxu0 %vm2540_vm1, %v2405_v28 }
 0x1df   : > { %v1196_v30 = vadd.f32 %v5429_v51, %v6451_v3  ;;  %5490 = vmatprep.mubr.msk.bf16.mxu1 %vm813_vm0, %v1295_v27  ;;  %v1259_v1 = vmax.f32 %v1185_v29, 0.0  ;;  %v6687_v20 = vpop.permute.xlu1 %1863  ;;  %v2542_v51 = vsel %vm2540_vm1, %v2405_v28, 0 }
 0x1e0   : > { %v1187_v53 = vpop.f32.mrf.mxu1  ;;  %5499 = vmatpush3.bf16.msra.mxu0 %v2542_v51 }
 0x1e1   : > { %v1188_v55 = vadd.f32 %v6451_v3, %v1187_v53  ;;  %5491 = vmatmul.mubr.msk.bf16.gmra.mxu1 %vm813_vm0, %v1296_v52  ;;  %v1262_v2 = vmax.f32 %v1196_v30, 0.0  ;;  %v6653_v3 = vpop.permute.xlu0 %1837 }
 0x1e3   : > { %v1260_v4 = vmax.f32 %v1188_v55, 0.0  ;;  %v1298_v6 = vpack.c.bf16 %v1262_v2, %v1261_v5  ;;  %v6703_v63 = vpop.permute.xlu1 %1867 }
 0x1e5   : > { %v1297_v32 = vpack.c.bf16 %v1260_v4, %v1259_v1  ;;  %v6657_v9 = vpop.permute.xlu0 %1841 }
 0x1e7   : > { %5494 = vmatprep.mubr.msk.bf16.mxu1 %vm813_vm0, %v1297_v32  ;;  %v6719_v43 = vpop.permute.xlu1 %1871 }
 0x1e9   : > { %5495 = vmatmul.mubr.msk.bf16.gmra.mxu1 %vm813_vm0, %v1298_v6  ;;  %v6661_v11 = vpop.permute.xlu0 %1845 }
 0x1eb   : > { %v6742_v55 = vpop.permute.xlu1 %1875 }
 0x1ed   : > { %v6665_v13 = vpop.permute.xlu0 %1849 }
 0x1f1   : > { %v6669_v36 = vpop.permute.xlu0 %1853 }
 0x1f5   : > { %v6673_v35 = vpop.permute.xlu0 %1857 }
 0x1f9   : > { %v6677_v42 = vpop.permute.xlu0 %1861 }
 0x1fd   : > { %v6693_v58 = vpop.permute.xlu0 %1865 }
 0x201   : > { %v6709_v15 = vpop.permute.xlu0 %1869 }
 0x205   : > { %v6725_v48 = vpop.permute.xlu0 %1873 }
 0x209   : > { %v6751_v32 = vpop.permute.xlu0 %1877 }
 0x231   : > { %v5436_v47 = vpop.f32.mrf.mxu1 }
 0x232   : > { %v6685_v37 = vadd.f32 %v5436_v47, %v6682_v38 }
 0x233   : > { %v1446_v56 = vpop.f32.mrf.mxu1 }
 0x234   : > { %v1705_v19 = vmul.f32 1.442695, %v6685_v37  ;;  %v6691_v57 = vadd.f32 %v6682_v38, %v1446_v56 }
 0x235   : > { %v5437_v21 = vpop.f32.mrf.mxu1 }
 0x236   : > { %5761 = vpow2.f32 %v1705_v19  ;;  %v1701_v22 = vmul.f32 1.442695, %v6691_v57  ;;  %v6697_v59 = vadd.f32 %v5437_v21, %v6682_v38 }
 0x237   : > { %v1449_v60 = vpop.f32.mrf.mxu1 }
 0x238   : > { %5763 = vpow2.f32 %v1701_v22  ;;  %v1707_v61 = vmul.f32 1.442695, %v6697_v59  ;;  %v6701_v62 = vadd.f32 %v6682_v38, %v1449_v60 }
 0x239   : > { %v5440_v0 = vpop.f32.mrf.mxu1 }
 0x23a   : > { %5765 = vpow2.f32 %v1707_v61  ;;  %v1703_v16 = vmul.f32 1.442695, %v6701_v62  ;;  %v6707_v24 = vadd.f32 %v5440_v0, %v6682_v38 }
 0x23b   : > { %v1462_v23 = vpop.f32.mrf.mxu1 }
 0x23c   : > { %5767 = vpow2.f32 %v1703_v16  ;;  %v1713_v39 = vmul.f32 1.442695, %v6707_v24  ;;  %v6713_v40 = vadd.f32 %v6682_v38, %v1462_v23 }
 0x23d   : > { %v5441_v25 = vpop.f32.mrf.mxu1 }
 0x23e   : > { %5769 = vpow2.f32 %v1713_v39  ;;  %v1709_v26 = vmul.f32 1.442695, %v6713_v40  ;;  %v6717_v41 = vadd.f32 %v5441_v25, %v6682_v38 }
 0x23f   : > { %v1465_v44 = vpop.f32.mrf.mxu1 }
 0x240   : > { %5771 = vpow2.f32 %v1709_v26  ;;  %v1715_v45 = vmul.f32 1.442695, %v6717_v41  ;;  %v6723_v46 = vadd.f32 %v6682_v38, %v1465_v44  ;;  %v6783_v44 = vpop.permute.xlu0 %1881 }
 0x241   : > { %v5444_v49 = vpop.f32.mrf.mxu1 }
 0x242   : > { %5773 = vpow2.f32 %v1715_v45  ;;  %v1711_v50 = vmul.f32 1.442695, %v6723_v46  ;;  %v6732_v27 = vadd.f32 %v5444_v49, %v6682_v38 }
 0x243   : > { %v6734_v52 = vpop.eup %5761  ;;  %v1478_v29 = vpop.f32.mrf.mxu1 }
 0x244   : > { %9725 = vst [vmem:[#allocation5_spill] sm:$0xff] %v6734_v52  ;;  %5775 = vpow2.f32 %v1711_v50  ;;  %v2023_v30 = vmul.f32 %v6734_v52, %v6649_v8  ;;  %v1721_v53 = vmul.f32 1.442695, %v6732_v27  ;;  %v6740_v54 = vadd.f32 %v6682_v38, %v1478_v29 }
 0x245   : > { %v6744_v1 = vpop.eup %5763  ;;  %v5445_v2 = vpop.f32.mrf.mxu1 }
 0x246   : > { %9726 = vst [vmem:[#allocation6_spill] sm:$0xff] %v6744_v1  ;;  %5777 = vpow2.f32 %v1721_v53  ;;  %v1717_v4 = vmul.f32 1.442695, %v6740_v54  ;;  %v6748_v5 = vadd.f32 %v5445_v2, %v6682_v38  ;;  %2153 = vrot.lane.b32.xlu0 %v2023_v30, %s5982_s4  ;;  %v2021_v8 = vmul.f32 %v6744_v1, %v6645_v31  ;;  %v6771_v31 = vpop.permute.xlu1 %1879 }
 0x247   : > { %v6753_v6 = vpop.eup %5765  ;;  %v1481_v47 = vpop.f32.mrf.mxu1 }
 0x248   : > { %9727 = vst [vmem:[#allocation7_spill] sm:$0xff] %v6753_v6  ;;  %5779 = vpow2.f32 %v1717_v4  ;;  %v2024_v56 = vmul.f32 %v6753_v6, %v6651_v33  ;;  %v1723_v19 = vmul.f32 1.442695, %v6748_v5  ;;  %v6761_v21 = vadd.f32 %v6682_v38, %v1481_v47 }
 0x249   : > { %v6763_v22 = vpop.eup %5767  ;;  %v5448_v60 = vpop.f32.mrf.mxu1 }
 0x24a   : > { %9728 = vst [vmem:[#allocation8_spill] sm:$0xff] %v6763_v22  ;;  %5781 = vpow2.f32 %v1723_v19  ;;  %v1719_v61 = vmul.f32 1.442695, %v6761_v21  ;;  %v6767_v0 = vadd.f32 %v5448_v60, %v6682_v38  ;;  %2155 = vrot.lane.b32.xlu1 %v2024_v56, %s5982_s4  ;;  %2149 = vrot.lane.b32.xlu0 %v2021_v8, %s5982_s4  ;;  %v2022_v16 = vmul.f32 %v6763_v22, %v6647_v7  ;;  %v6803_v2 = vpop.permute.xlu1 %1883 }
 0x24b   : > { %v6773_v33 = vpop.eup %5769  ;;  %v1494_v23 = vpop.f32.mrf.mxu1 }
 0x24c   : > { %9729 = vst [vmem:[#allocation9_spill] sm:$0xff] %v6773_v33  ;;  %5783 = vpow2.f32 %v1719_v61  ;;  %v2027_v39 = vmul.f32 %v6773_v33, %v6657_v9  ;;  %v1729_v25 = vmul.f32 1.442695, %v6767_v0  ;;  %v6781_v26 = vadd.f32 %v6682_v38, %v1494_v23 }
 0x24d   : > { %v6785_v45 = vpop.eup %5771  ;;  %v5449_v49 = vpop.f32.mrf.mxu1 }
 0x24e   : > { %9730 = vst [vmem:[#allocation10_spill] sm:$0xff] %v6785_v45  ;;  %5785 = vpow2.f32 %v1729_v25  ;;  %v1725_v28 = vmul.f32 1.442695, %v6781_v26  ;;  %v6789_v7 = vadd.f32 %v5449_v49, %v6682_v38  ;;  %2151 = vrot.lane.b32.xlu1 %v2022_v16, %s5982_s4  ;;  %2161 = vrot.lane.b32.xlu0 %v2027_v39, %s5982_s4  ;;  %v2025_v50 = vmul.f32 %v6785_v45, %v6653_v3 }
 0x24f   : > { %v6793_v9 = vpop.eup %5773  ;;  %v1497_v51 = vpop.f32.mrf.mxu1 }
 0x250   : > { %9731 = vst [vmem:[#allocation11_spill] sm:$0xff] %v6793_v9  ;;  %5787 = vpow2.f32 %v1725_v28  ;;  %v2028_v29 = vmul.f32 %v6793_v9, %v6659_v10  ;;  %v1731_v30 = vmul.f32 1.442695, %v6789_v7  ;;  %v6801_v53 = vadd.f32 %v6682_v38, %v1497_v51  ;;  %v6813_v10 = vpop.permute.xlu0 %1885 }
 0x251   : > { %v6805_v4 = vpop.eup %5775  ;;  %v5452_v8 = vpop.f32.mrf.mxu1 }
 0x252   : > { %9732 = vst [vmem:[#allocation12_spill] sm:$0xff] %v6805_v4  ;;  %5789 = vpow2.f32 %v1731_v30  ;;  %v1727_v47 = vmul.f32 1.442695, %v6801_v53  ;;  %v6809_v3 = vadd.f32 %v5452_v8, %v6682_v38  ;;  %2163 = vrot.lane.b32.xlu1 %v2028_v29, %s5982_s4  ;;  %2157 = vrot.lane.b32.xlu0 %v2025_v50, %s5982_s4  ;;  %v2026_v19 = vmul.f32 %v6805_v4, %v6655_v34  ;;  %v6833_v34 = vpop.permute.xlu1 %1887 }
 0x253   : > { %v6815_v56 = vpop.eup %5777  ;;  %v1510_v60 = vpop.f32.mrf.mxu1 }
 0x254   : > { %9733 = vst [vmem:[#allocation13_spill] sm:$0xff] %v6815_v56  ;;  %5791 = vpow2.f32 %v1727_v47  ;;  %v2031_v61 = vmul.f32 %v6815_v56, %v6665_v13  ;;  %v1737_v16 = vmul.f32 1.442695, %v6809_v3  ;;  %v6823_v23 = vadd.f32 %v6682_v38, %v1510_v60  ;;  %v6845_v47 = vpop.permute.xlu0 %1889 }
 0x255   : > { %v6825_v39 = vpop.eup %5779  ;;  %v5453_v25 = vpop.f32.mrf.mxu1 }
 0x256   : > { %9734 = vst [vmem:[#allocation14_spill] sm:$0xff] %v6825_v39  ;;  %5793 = vpow2.f32 %v1737_v16  ;;  %v1733_v49 = vmul.f32 1.442695, %v6823_v23  ;;  %v6829_v28 = vadd.f32 %v5453_v25, %v6682_v38  ;;  %2159 = vrot.lane.b32.xlu1 %v2026_v19, %s5982_s4  ;;  %2169 = vrot.lane.b32.xlu0 %v2031_v61, %s5982_s4  ;;  %v2029_v50 = vmul.f32 %v6825_v39, %v6661_v11 }
 0x257   : > { %v6835_v13 = vpop.eup %5781  ;;  %v1513_v51 = vpop.f32.mrf.mxu1 }
 0x258   : > { %9735 = vst [vmem:[#allocation15_spill] sm:$0xff] %v6835_v13  ;;  %5795 = vpow2.f32 %v1733_v49  ;;  %v2032_v29 = vmul.f32 %v6835_v13, %v6667_v14  ;;  %v1739_v30 = vmul.f32 1.442695, %v6829_v28  ;;  %v6843_v8 = vadd.f32 %v6682_v38, %v1513_v51 }
 0x259   : > { %v6847_v19 = vpop.eup %5783  ;;  %v5456_v60 = vpop.f32.mrf.mxu1 }
 0x25a   : > { %9736 = vst [vmem:[#allocation16_spill] sm:$0xff] %v6847_v19  ;;  %5797 = vpow2.f32 %v1739_v30  ;;  %v1735_v61 = vmul.f32 1.442695, %v6843_v8  ;;  %v6851_v11 = vadd.f32 %v5456_v60, %v6682_v38  ;;  %2171 = vrot.lane.b32.xlu1 %v2032_v29, %s5982_s4  ;;  %2165 = vrot.lane.b32.xlu0 %v2029_v50, %s5982_s4  ;;  %v2030_v16 = vmul.f32 %v6847_v19, %v6663_v12  ;;  %v6865_v60 = vpop.permute.xlu1 %1891 }
 0x25b   : > { %v6855_v14 = vpop.eup %5785  ;;  %v1526_v25 = vpop.f32.mrf.mxu1 }
 0x25c   : > { %9737 = vst [vmem:[#allocation17_spill] sm:$0xff] %v6855_v14  ;;  %5799 = vpow2.f32 %v1735_v61  ;;  %v2035_v49 = vmul.f32 %v6855_v14, %v6673_v35  ;;  %v1745_v51 = vmul.f32 1.442695, %v6851_v11  ;;  %v6863_v30 = vadd.f32 %v6682_v38, %v1526_v25  ;;  %v6875_v35 = vpop.permute.xlu0 %1893 }
 0x25d   : > { %v6867_v29 = vpop.eup %5787  ;;  %v5457_v50 = vpop.f32.mrf.mxu1 }
 0x25e   : > { %9738 = vst [vmem:[#allocation18_spill] sm:$0xff] %v6867_v29  ;;  %5801 = vpow2.f32 %v1745_v51  ;;  %v1741_v56 = vmul.f32 1.442695, %v6863_v30  ;;  %v6871_v12 = vadd.f32 %v5457_v50, %v6682_v38  ;;  %2167 = vrot.lane.b32.xlu1 %v2030_v16, %s5982_s4  ;;  %2177 = vrot.lane.b32.xlu0 %v2035_v49, %s5982_s4  ;;  %v2033_v25 = vmul.f32 %v6867_v29, %v6669_v36  ;;  %v6895_v36 = vpop.permute.xlu1 %1895 }
 0x25f   : > { %v6877_v61 = vpop.eup %5789  ;;  %v1529_v14 = vpop.f32.mrf.mxu1 }
 0x260   : > { %9739 = vst [vmem:[#allocation19_spill] sm:$0xff] %v6877_v61  ;;  %5803 = vpow2.f32 %v1741_v56  ;;  %v2036_v51 = vmul.f32 %v6877_v61, %v6675_v18  ;;  %v1747_v13 = vmul.f32 1.442695, %v6871_v12  ;;  %v6885_v50 = vadd.f32 %v6682_v38, %v1529_v14 }
 0x261   : > { %v6887_v16 = vpop.eup %5791  ;;  %v5460_v49 = vpop.f32.mrf.mxu1 }
 0x262   : > { %9740 = vst [vmem:[#allocation20_spill] sm:$0xff] %v6887_v16  ;;  %5805 = vpow2.f32 %v1747_v13  ;;  %v1743_v39 = vmul.f32 1.442695, %v6885_v50  ;;  %v6891_v19 = vadd.f32 %v5460_v49, %v6682_v38  ;;  %2179 = vrot.lane.b32.xlu1 %v2036_v51, %s5982_s4  ;;  %2173 = vrot.lane.b32.xlu0 %v2033_v25, %s5982_s4  ;;  %v2034_v56 = vmul.f32 %v6887_v16, %v6671_v17  ;;  %v6907_v51 = vpop.permute.xlu0 %1897 }
 0x263   : > { %v6897_v18 = vpop.eup %5793  ;;  %v1542_v14 = vpop.f32.mrf.mxu1 }
 0x264   : > { %9741 = vst [vmem:[#allocation21_spill] sm:$0xff] %v6897_v18  ;;  %5807 = vpow2.f32 %v1743_v39  ;;  %v2039_v13 = vmul.f32 %v6897_v18, %v6693_v58  ;;  %v1753_v61 = vmul.f32 1.442695, %v6891_v19  ;;  %v6905_v49 = vadd.f32 %v6682_v38, %v1542_v14 }
 0x265   : > { %v6909_v25 = vpop.eup %5795  ;;  %v5461_v29 = vpop.f32.mrf.mxu1 }
 0x266   : > { %9742 = vst [vmem:[#allocation22_spill] sm:$0xff] %v6909_v25  ;;  %5809 = vpow2.f32 %v1753_v61  ;;  %v1749_v33 = vmul.f32 1.442695, %v6905_v49  ;;  %v6913_v17 = vadd.f32 %v5461_v29, %v6682_v38  ;;  %2175 = vrot.lane.b32.xlu1 %v2034_v56, %s5982_s4  ;;  %2185 = vrot.lane.b32.xlu0 %v2039_v13, %s5982_s4  ;;  %v2037_v39 = vmul.f32 %v6909_v25, %v6677_v42  ;;  %v6927_v29 = vpop.permute.xlu1 %1899 }
 0x267   : > { %v6917_v58 = vpop.eup %5797  ;;  %v1545_v14 = vpop.f32.mrf.mxu1 }
 0x268   : > { %9743 = vst [vmem:[#allocation23_spill] sm:$0xff] %v6917_v58  ;;  %5811 = vpow2.f32 %v1749_v33  ;;  %v2040_v18 = vmul.f32 %v6917_v58, %v6703_v63  ;;  %v1755_v61 = vmul.f32 1.442695, %v6913_v17  ;;  %v6925_v16 = vadd.f32 %v6682_v38, %v1545_v14  ;;  %v6937_v63 = vpop.permute.xlu0 %1901 }
 0x269   : > { %v6929_v56 = vpop.eup %5799  ;;  %v5464_v13 = vpop.f32.mrf.mxu1 }
 0x26a   : > { %9744 = vst [vmem:[#allocation24_spill] sm:$0xff] %v6929_v56  ;;  %5813 = vpow2.f32 %v1755_v61  ;;  %v1751_v9 = vmul.f32 1.442695, %v6925_v16  ;;  %v6933_v42 = vadd.f32 %v5464_v13, %v6682_v38  ;;  %2187 = vrot.lane.b32.xlu1 %v2040_v18, %s5982_s4  ;;  %2181 = vrot.lane.b32.xlu0 %v2037_v39, %s5982_s4  ;;  %v2038_v14 = vmul.f32 %v6929_v56, %v6687_v20  ;;  %v6957_v20 = vpop.permute.xlu1 %1903 }
 0x26b   : > { %v6939_v33 = vpop.eup %5801  ;;  %v1558_v58 = vpop.f32.mrf.mxu1 }
 0x26c   : > { %9745 = vst [vmem:[#allocation25_spill] sm:$0xff] %v6939_v33  ;;  %5815 = vpow2.f32 %v1751_v9  ;;  %v2043_v61 = vmul.f32 %v6939_v33, %v6725_v48  ;;  %v1761_v25 = vmul.f32 1.442695, %v6933_v42  ;;  %v6947_v13 = vadd.f32 %v6682_v38, %v1558_v58 }
 0x26d   : > { %v6949_v18 = vpop.eup %5803  ;;  %v5465_v39 = vpop.f32.mrf.mxu1 }
 0x26e   : > { %9746 = vst [vmem:[#allocation26_spill] sm:$0xff] %v6949_v18  ;;  %5817 = vpow2.f32 %v1761_v25  ;;  %v1757_v45 = vmul.f32 1.442695, %v6947_v13  ;;  %v6953_v4 = vadd.f32 %v5465_v39, %v6682_v38  ;;  %2183 = vrot.lane.b32.xlu1 %v2038_v14, %s5982_s4  ;;  %2193 = vrot.lane.b32.xlu0 %v2043_v61, %s5982_s4  ;;  %v2041_v9 = vmul.f32 %v6949_v18, %v6709_v15  ;;  %v6969_v14 = vpop.permute.xlu0 %1905  ;;  %v6988_v18 = vpop.permute.xlu1 %1907 }
 0x26f   : > { %v6959_v48 = vpop.eup %5805  ;;  %v1561_v58 = vpop.f32.mrf.mxu1 }
 0x270   : > { %9747 = vst [vmem:[#allocation27_spill] sm:$0xff] %v6959_v48  ;;  %5819 = vpow2.f32 %v1757_v45  ;;  %v2044_v25 = vmul.f32 %v6959_v48, %v6742_v55  ;;  %v1763_v33 = vmul.f32 1.442695, %v6953_v4  ;;  %v6967_v39 = vadd.f32 %v6682_v38, %v1561_v58 }
 0x271   : > { %v6971_v61 = vpop.eup %5807  ;;  %v5468_v56 = vpop.f32.mrf.mxu1 }
 0x272   : > { %9748 = vst [vmem:[#allocation28_spill] sm:$0xff] %v6971_v61  ;;  %5821 = vpow2.f32 %v1763_v33  ;;  %v1759_v52 = vmul.f32 1.442695, %v6967_v39  ;;  %2195 = vrot.lane.b32.xlu1 %v2044_v25, %s5982_s4  ;;  %2189 = vrot.lane.b32.xlu0 %v2041_v9, %s5982_s4  ;;  %v6979_v55 = vadd.f32 %v5468_v56, %v6682_v38  ;;  %v2042_v58 = vmul.f32 %v6971_v61, %v6719_v43  ;;  %v6995_v56 = vpop.permute.xlu0 %1909 }
 0x273   : > { %v6976_v15 = vpop.eup %5809  ;;  %v1574_v45 = vpop.f32.mrf.mxu1 }
 0x274   : > { %9749 = vst [vmem:[#allocation29_spill] sm:$0xff] %v6976_v15  ;;  %9750 = vst [vmem:[#allocation30_spill] sm:$0xff] %v6979_v55  ;;  %5823 = vpow2.f32 %v1759_v52  ;;  %v2047_v48 = vmul.f32 %v6976_v15, %v6783_v44  ;;  %v6986_v33 = vadd.f32 %v6682_v38, %v1574_v45  ;;  %v1769_v52 = vmul.f32 1.442695, %v6979_v55 }
 0x275   : > { %v6990_v25 = vpop.eup %5811  ;;  %v5469_v9 = vpop.f32.mrf.mxu1 }
 0x276   : > { %9751 = vst [vmem:[#allocation31_spill] sm:$0xff] %v6990_v25  ;;  %v1765_v6 = vmul.f32 1.442695, %v6986_v33  ;;  %2191 = vrot.lane.b32.xlu1 %v2042_v58, %s5982_s4  ;;  %2201 = vrot.lane.b32.xlu0 %v2047_v48, %s5982_s4  ;;  %v7001_v44 = vadd.f32 %v5469_v9, %v6682_v38  ;;  %v2045_v15 = vmul.f32 %v6990_v25, %v6751_v32  ;;  %v7015_v9 = vpop.permute.xlu1 %1911 }
 0x277   : > { %v6997_v43 = vpop.eup %5813  ;;  %v1577_v45 = vpop.f32.mrf.mxu1 }
 0x278   : > { %9752 = vst [vmem:[#allocation32_spill] sm:$0xff] %v6997_v43  ;;  %9753 = vst [vmem:[#allocation33_spill] sm:$0xff] %v7001_v44  ;;  %5825 = vpow2.f32 %v1765_v6  ;;  %v2048_v61 = vmul.f32 %v6997_v43, %v6803_v2  ;;  %v7008_v58 = vadd.f32 %v6682_v38, %v1577_v45  ;;  %v1771_v32 = vmul.f32 1.442695, %v7001_v44  ;;  %v7030_v43 = vpop.permute.xlu0 %1913 }
 0x279   : > { %v7010_v48 = vpop.eup %5815  ;;  %v5472_v1 = vpop.f32.mrf.mxu1  ;;  %5827 = vpow2.f32 %v1769_v52 }
 0x27a   : > { %9754 = vst [vmem:[#allocation34_spill] sm:$0xff] %v7010_v48  ;;  %v1767_v22 = vmul.f32 1.442695, %v7008_v58  ;;  %2203 = vrot.lane.b32.xlu1 %v2048_v61, %s5982_s4  ;;  %2197 = vrot.lane.b32.xlu0 %v2045_v15, %s5982_s4  ;;  %v7021_v6 = vadd.f32 %v5472_v1, %v6682_v38  ;;  %v2046_v45 = vmul.f32 %v7010_v48, %v6771_v31 }
 0x27b   : > { %v7017_v55 = vpop.eup %5817  ;;  %v1590_v2 = vpop.f32.mrf.mxu1 }
 0x27c   : > { %9755 = vst [vmem:[#allocation35_spill] sm:$0xff] %v7017_v55  ;;  %9756 = vst [vmem:[#allocation36_spill] sm:$0xff] %v7021_v6  ;;  %5829 = vpow2.f32 %v1767_v22  ;;  %v2051_v61 = vmul.f32 %v7017_v55, %v6845_v47  ;;  %v7028_v15 = vadd.f32 %v6682_v38, %v1590_v2  ;;  %v1777_v22 = vmul.f32 1.442695, %v7021_v6 }
 0x27d   : > { %v7032_v25 = vpop.eup %5819  ;;  %v5473_v52 = vpop.f32.mrf.mxu1  ;;  %5831 = vpow2.f32 %v1771_v32 }
 0x27e   : > { %9757 = vst [vmem:[#allocation37_spill] sm:$0xff] %v7028_v15  ;;  %9758 = vst [vmem:[#allocation38_spill] sm:$0xff] %v7032_v25  ;;  %v1773_v44 = vmul.f32 1.442695, %v7028_v15  ;;  %2199 = vrot.lane.b32.xlu1 %v2046_v45, %s5982_s4  ;;  %2209 = vrot.lane.b32.xlu0 %v2051_v61, %s5982_s4  ;;  %v7041_v31 = vadd.f32 %v5473_v52, %v6682_v38  ;;  %v2049_v2 = vmul.f32 %v7032_v25, %v6813_v10  ;;  %v7050_v61 = vpop.permute.xlu1 %1915  ;;  %v7057_v10 = vpop.permute.xlu0 %1917 }
 0x27f   : > { %v7037_v1 = vpop.eup %5821  ;;  %v1593_v47 = vpop.f32.mrf.mxu1 }
 0x280   : > { %9759 = vst [vmem:[#allocation39_spill] sm:$0xff] %v7037_v1  ;;  %9760 = vst [vmem:[#allocation40_spill] sm:$0xff] %v7041_v31  ;;  %5833 = vpow2.f32 %v1773_v44  ;;  %v2052_v55 = vmul.f32 %v7037_v1, %v6865_v60  ;;  %v7048_v45 = vadd.f32 %v6682_v38, %v1593_v47  ;;  %v1779_v60 = vmul.f32 1.442695, %v7041_v31 }
 0x281   : > { %v7052_v48 = vpop.eup %5823  ;;  %v5476_v32 = vpop.f32.mrf.mxu1  ;;  %5835 = vpow2.f32 %v1777_v22  ;;  %v5915_v22 = vld [vmem:[%s6060_s28 + $0x1f0] sm:$0xff] }
 0x282   : > { %9761 = vst [vmem:[#allocation41_spill] sm:$0xff] %v7048_v45  ;;  %9762 = vst [vmem:[#allocation42_spill] sm:$0xff] %v7052_v48  ;;  %v1775_v52 = vmul.f32 1.442695, %v7048_v45  ;;  %2211 = vrot.lane.b32.xlu1 %v2052_v55, %s5982_s4  ;;  %2205 = vrot.lane.b32.xlu0 %v2049_v2, %s5982_s4  ;;  %v7061_v44 = vadd.f32 %v5476_v32, %v6682_v38  ;;  %v2050_v1 = vmul.f32 %v7052_v48, %v6833_v34  ;;  %v7074_v32 = vpop.permute.xlu1 %1919  ;;  %v7087_v31 = vpop.permute.xlu0 %1921  ;;  %v5916_v45 = vld [vmem:[%s6060_s28 + $0x1f8] sm:$0xff] }
 0x283   : > { %v1606_v47 = vpop.f32.mrf.mxu1 }
 0x284   : > { %9763 = vst [vmem:[#allocation43_spill] sm:$0xff] %v7061_v44  ;;  %5837 = vpow2.f32 %v1775_v52  ;;  %v7066_v25 = vadd.f32 %v6682_v38, %v1606_v47  ;;  %v1785_v34 = vmul.f32 1.442695, %v7061_v44 }
 0x285   : > { %v7068_v6 = vpop.eup %5825  ;;  %v5477_v55 = vpop.f32.mrf.mxu1  ;;  %5839 = vpow2.f32 %v1779_v60 }
 0x286   : > { %9764 = vst [vmem:[#allocation44_spill] sm:$0xff] %v7066_v25  ;;  %9765 = vst [vmem:[#allocation45_spill] sm:$0xff] %v7068_v6  ;;  %v1781_v2 = vmul.f32 1.442695, %v7066_v25  ;;  %2207 = vrot.lane.b32.xlu1 %v2050_v1, %s5982_s4  ;;  %1953 = vrot.lane.b32.xlu0 %v5915_v22, %s5981_s20  ;;  %v7078_v52 = vadd.f32 %v5477_v55, %v6682_v38  ;;  %v7080_v48 = vpop.eup %5827  ;;  %v2053_v25 = vmul.f32 %v7068_v6, %v6875_v35  ;;  %v7115_v15 = vpop.permute.xlu0 %1925 }
 0x287   : > { %v1609_v47 = vpop.f32.mrf.mxu1  ;;  %9767 = vst [vmem:[#allocation47_spill] sm:$0xff] %v7080_v48 }
 0x288   : > { %9766 = vst [vmem:[#allocation46_spill] sm:$0xff] %v7078_v52  ;;  %5841 = vpow2.f32 %v1781_v2  ;;  %v7085_v1 = vadd.f32 %v6682_v38, %v1609_v47  ;;  %v1787_v55 = vmul.f32 1.442695, %v7078_v52 }
 0x289   : > { %v7089_v22 = vpop.eup %5829  ;;  %v5480_v60 = vpop.f32.mrf.mxu1  ;;  %5843 = vpow2.f32 %v1785_v34 }
 0x28a   : > { %9768 = vst [vmem:[#allocation48_spill] sm:$0xff] %v7085_v1  ;;  %9769 = vst [vmem:[#allocation49_spill] sm:$0xff] %v7089_v22  ;;  %v1783_v44 = vmul.f32 1.442695, %v7085_v1  ;;  %1955 = vrot.lane.b32.xlu1 %v5916_v45, %s5981_s20  ;;  %2213 = vrot.lane.b32.xlu0 %v2053_v25, %s5982_s4  ;;  %v7097_v35 = vadd.f32 %v5480_v60, %v6682_v38  ;;  %v7099_v47 = vpop.eup %5831  ;;  %v2054_v6 = vmul.f32 %v7089_v22, %v6895_v36  ;;  %v7108_v25 = vpop.permute.xlu1 %1923 }
 0x28b   : > { %v1622_v2 = vpop.f32.mrf.mxu1  ;;  %9771 = vst [vmem:[#allocation51_spill] sm:$0xff] %v7099_v47  ;;  %v2055_v1 = vmul.f32 %v7080_v48, %v6907_v51  ;;  %v2056_v48 = vmul.f32 %v7099_v47, %v6927_v29 }
 0x28c   : > { %9770 = vst [vmem:[#allocation50_spill] sm:$0xff] %v7097_v35  ;;  %5845 = vpow2.f32 %v1783_v44  ;;  %v7106_v45 = vadd.f32 %v6682_v38, %v1622_v2  ;;  %v1793_v36 = vmul.f32 1.442695, %v7097_v35 }
 0x28d   : > { %v7110_v34 = vpop.eup %5833  ;;  %v5481_v52 = vpop.f32.mrf.mxu1  ;;  %5847 = vpow2.f32 %v1787_v55 }
 0x28e   : > { %9772 = vst [vmem:[#allocation52_spill] sm:$0xff] %v7110_v34  ;;  %v1789_v60 = vmul.f32 1.442695, %v7106_v45  ;;  %2215 = vrot.lane.b32.xlu1 %v2054_v6, %s5982_s4  ;;  %2217 = vrot.lane.b32.xlu0 %v2055_v1, %s5982_s4  ;;  %v7119_v51 = vadd.f32 %v5481_v52, %v6682_v38  ;;  %v7121_v2 = vpop.eup %5835  ;;  %v2057_v22 = vmul.f32 %v7110_v34, %v6937_v63  ;;  %v7135_v52 = vpop.permute.xlu1 %1927 }
 0x28f   : > { %v1625_v44 = vpop.f32.mrf.mxu1  ;;  %9774 = vst [vmem:[#allocation54_spill] sm:$0xff] %v7121_v2  ;;  %v2059_v47 = vmul.f32 %v7121_v2, %v6969_v14 }
 0x290   : > { %9773 = vst [vmem:[#allocation53_spill] sm:$0xff] %v7119_v51  ;;  %5849 = vpow2.f32 %v1789_v60  ;;  %v7128_v6 = vadd.f32 %v6682_v38, %v1625_v44  ;;  %v1795_v29 = vmul.f32 1.442695, %v7119_v51 }
 0x291   : > { %v7130_v1 = vpop.eup %5837  ;;  %v5484_v55 = vpop.f32.mrf.mxu1  ;;  %5851 = vpow2.f32 %v1793_v36 }
 0x292   : > { %9775 = vst [vmem:[#allocation55_spill] sm:$0xff] %v7130_v1  ;;  %v1791_v35 = vmul.f32 1.442695, %v7128_v6  ;;  %2219 = vrot.lane.b32.xlu1 %v2056_v48, %s5982_s4  ;;  %2221 = vrot.lane.b32.xlu0 %v2057_v22, %s5982_s4  ;;  %v7139_v63 = vadd.f32 %v5484_v55, %v6682_v38  ;;  %v7141_v44 = vpop.eup %5839  ;;  %v2058_v34 = vmul.f32 %v7130_v1, %v6957_v20  ;;  %v7150_v22 = vpop.permute.xlu0 %1929 }
 0x293   : > { %v1638_v60 = vpop.f32.mrf.mxu1  ;;  %9777 = vst [vmem:[#allocation57_spill] sm:$0xff] %v7141_v44  ;;  %v2060_v2 = vmul.f32 %v7141_v44, %v6988_v18 }
 0x294   : > { %9776 = vst [vmem:[#allocation56_spill] sm:$0xff] %v7139_v63  ;;  %5853 = vpow2.f32 %v1791_v35  ;;  %v7148_v48 = vadd.f32 %v6682_v38, %v1638_v60  ;;  %v1801_v20 = vmul.f32 1.442695, %v7139_v63 }
 0x295   : > { %v7152_v36 = vpop.eup %5841  ;;  %v5485_v51 = vpop.f32.mrf.mxu1  ;;  %5855 = vpow2.f32 %v1795_v29 }
 0x296   : > { %9778 = vst [vmem:[#allocation58_spill] sm:$0xff] %v7148_v48  ;;  %9779 = vst [vmem:[#allocation59_spill] sm:$0xff] %v7152_v36  ;;  %v1797_v55 = vmul.f32 1.442695, %v7148_v48  ;;  %2223 = vrot.lane.b32.xlu1 %v2058_v34, %s5982_s4  ;;  %2225 = vrot.lane.b32.xlu0 %v2059_v47, %s5982_s4  ;;  %v7159_v14 = vadd.f32 %v5485_v51, %v6682_v38  ;;  %v7161_v60 = vpop.eup %5843  ;;  %v2061_v1 = vmul.f32 %v7152_v36, %v6995_v56  ;;  %v7170_v47 = vpop.permute.xlu1 %1931 }
 0x297   : > { %v1641_v35 = vpop.f32.mrf.mxu1  ;;  %9781 = vst [vmem:[#allocation61_spill] sm:$0xff] %v7161_v60  ;;  %v7177_v48 = vpop.permute.xlu0 %1933  ;;  %v2063_v44 = vmul.f32 %v7161_v60, %v7030_v43 }
 0x298   : > { %9780 = vst [vmem:[#allocation60_spill] sm:$0xff] %v7159_v14  ;;  %5857 = vpow2.f32 %v1797_v55  ;;  %v7168_v34 = vadd.f32 %v6682_v38, %v1641_v35  ;;  %v1803_v18 = vmul.f32 1.442695, %v7159_v14 }
 0x299   : > { %v7172_v29 = vpop.eup %5845  ;;  %v5488_v63 = vpop.f32.mrf.mxu1  ;;  %5859 = vpow2.f32 %v1801_v20 }
 0x29a   : > { %9782 = vst [vmem:[#allocation62_spill] sm:$0xff] %v7172_v29  ;;  %v1799_v51 = vmul.f32 1.442695, %v7168_v34  ;;  %2227 = vrot.lane.b32.xlu1 %v2060_v2, %s5982_s4  ;;  %2229 = vrot.lane.b32.xlu0 %v2061_v1, %s5982_s4  ;;  %v7181_v56 = vadd.f32 %v5488_v63, %v6682_v38  ;;  %v7183_v35 = vpop.eup %5847  ;;  %v2062_v36 = vmul.f32 %v7172_v29, %v7015_v9  ;;  %v7197_v63 = vpop.permute.xlu1 %1935 }
 0x29b   : > { %v1654_v55 = vpop.f32.mrf.mxu1  ;;  %9784 = vst [vmem:[#allocation64_spill] sm:$0xff] %v7183_v35  ;;  %v2064_v60 = vmul.f32 %v7183_v35, %v7050_v61 }
 0x29c   : > { %9783 = vst [vmem:[#allocation63_spill] sm:$0xff] %v7181_v56  ;;  %5861 = vpow2.f32 %v1799_v51  ;;  %v7190_v2 = vadd.f32 %v6682_v38, %v1654_v55  ;;  %v1809_v9 = vmul.f32 1.442695, %v7181_v56 }
 0x29d   : > { %v7192_v1 = vpop.eup %5849  ;;  %v5489_v20 = vpop.f32.mrf.mxu1  ;;  %5863 = vpow2.f32 %v1803_v18 }
 0x29e   : > { %9785 = vst [vmem:[#allocation65_spill] sm:$0xff] %v7192_v1  ;;  %v1805_v14 = vmul.f32 1.442695, %v7190_v2  ;;  %2231 = vrot.lane.b32.xlu1 %v2062_v36, %s5982_s4  ;;  %2233 = vrot.lane.b32.xlu0 %v2063_v44, %s5982_s4  ;;  %v7201_v43 = vadd.f32 %v5489_v20, %v6682_v38  ;;  %v7203_v55 = vpop.eup %5851  ;;  %v2065_v29 = vmul.f32 %v7192_v1, %v7057_v10  ;;  %v7212_v36 = vpop.permute.xlu0 %1937 }
 0x29f   : > { %v1657_v51 = vpop.f32.mrf.mxu1  ;;  %9787 = vst [vmem:[#allocation67_spill] sm:$0xff] %v7203_v55  ;;  %v2067_v35 = vmul.f32 %v7203_v55, %v7087_v31 }
 0x2a0   : > { %9786 = vst [vmem:[#allocation66_spill] sm:$0xff] %v7201_v43  ;;  %5865 = vpow2.f32 %v1805_v14  ;;  %v7210_v44 = vadd.f32 %v6682_v38, %v1657_v51  ;;  %v1811_v61 = vmul.f32 1.442695, %v7201_v43 }
 0x2a1   : > { %v7214_v18 = vpop.eup %5853  ;;  %v5492_v56 = vpop.f32.mrf.mxu1  ;;  %5867 = vpow2.f32 %v1809_v9 }
 0x2a2   : > { %9788 = vst [vmem:[#allocation68_spill] sm:$0xff] %v7210_v44  ;;  %9789 = vst [vmem:[#allocation69_spill] sm:$0xff] %v7214_v18  ;;  %v1807_v20 = vmul.f32 1.442695, %v7210_v44  ;;  %2235 = vrot.lane.b32.xlu1 %v2064_v60, %s5982_s4  ;;  %2237 = vrot.lane.b32.xlu0 %v2065_v29, %s5982_s4  ;;  %v7221_v10 = vadd.f32 %v5492_v56, %v6682_v38  ;;  %v7223_v51 = vpop.eup %5855  ;;  %v2066_v1 = vmul.f32 %v7214_v18, %v7074_v32  ;;  %v1940_v29 = vpop.permute.xlu1 %1939 }
 0x2a3   : > { %v1670_v14 = vpop.f32.mrf.mxu1  ;;  %9791 = vst [vmem:[#allocation71_spill] sm:$0xff] %v7223_v51  ;;  %v1942_v44 = vpop.permute.xlu0 %1941  ;;  %v2068_v55 = vmul.f32 %v7223_v51, %v7108_v25 }
 0x2a4   : > { %9790 = vst [vmem:[#allocation70_spill] sm:$0xff] %v7221_v10  ;;  %5869 = vpow2.f32 %v1807_v20  ;;  %v7230_v60 = vadd.f32 %v6682_v38, %v1670_v14  ;;  %v1817_v32 = vmul.f32 1.442695, %v7221_v10 }
 0x2a5   : > { %v7232_v9 = vpop.eup %5857  ;;  %v5493_v43 = vpop.f32.mrf.mxu1  ;;  %5871 = vpow2.f32 %v1811_v61 }
 0x2a6   : > { %9792 = vst [vmem:[#allocation72_spill] sm:$0xff] %v7232_v9  ;;  %v1813_v56 = vmul.f32 1.442695, %v7230_v60  ;;  %2239 = vrot.lane.b32.xlu1 %v2066_v1, %s5982_s4  ;;  %2241 = vrot.lane.b32.xlu0 %v2067_v35, %s5982_s4  ;;  %v7239_v31 = vadd.f32 %v5493_v43, %v6682_v38  ;;  %v7241_v14 = vpop.eup %5859  ;;  %v2069_v18 = vmul.f32 %v7232_v9, %v7115_v15  ;;  %v1944_v10 = vpop.permute.xlu1 %1943 }
 0x2a7   : > { %v1673_v20 = vpop.f32.mrf.mxu1  ;;  %9793 = vst [vmem:[#allocation73_spill] sm:$0xff] %v7241_v14 }
 0x2a8   : > { %5873 = vpow2.f32 %v1813_v56  ;;  %v7248_v1 = vadd.f32 %v6682_v38, %v1673_v20  ;;  %v1819_v25 = vmul.f32 1.442695, %v7239_v31  ;;  %v2071_v20 = vmul.f32 %v7241_v14, %v7150_v22 }
 0x2a9   : > { %v7250_v35 = vpop.eup %5861  ;;  %v7252_v61 = vpop.f32.mrf.mxu1  ;;  %5875 = vpow2.f32 %v1817_v32 }
 0x2aa   : > { %9794 = vst [vmem:[#allocation74_spill] sm:$0xff] %v7248_v1  ;;  %9795 = vst [vmem:[#allocation75_spill] sm:$0xff] %v7250_v35  ;;  %v1815_v43 = vmul.f32 1.442695, %v7248_v1  ;;  %2243 = vrot.lane.b32.xlu1 %v2068_v55, %s5982_s4  ;;  %2245 = vrot.lane.b32.xlu0 %v2069_v18, %s5982_s4  ;;  %v7258_v15 = vpop.eup %5863  ;;  %v2070_v56 = vmul.f32 %v7250_v35, %v7135_v52  ;;  %v1946_v55 = vpop.permute.xlu0 %1945 }
 0x2ab   : > { %v1686_v51 = vpop.f32.mrf.mxu1  ;;  %9796 = vst [vmem:[#allocation76_spill] sm:$0xff] %v7258_v15  ;;  %v2072_v22 = vmul.f32 %v7258_v15, %v7170_v47  ;;  %v1948_v14 = vpop.permute.xlu1 %1947 }
 0x2ac   : > { %5877 = vpow2.f32 %v1815_v43  ;;  %v7265_v9 = vadd.f32 %v6682_v38, %v1686_v51 }
 0x2ad   : > { %v7267_v1 = vpop.eup %5865  ;;  %v7269_v18 = vpop.f32.mrf.mxu1  ;;  %5879 = vpow2.f32 %v1819_v25 }
 0x2ae   : > { %9797 = vst [vmem:[#allocation77_spill] sm:$0xff] %v7265_v9  ;;  %9798 = vst [vmem:[#allocation78_spill] sm:$0xff] %v7267_v1  ;;  %v1821_v32 = vmul.f32 1.442695, %v7265_v9  ;;  %2247 = vrot.lane.b32.xlu1 %v2070_v56, %s5982_s4  ;;  %2249 = vrot.lane.b32.xlu0 %v2071_v20, %s5982_s4  ;;  %v7274_v35 = vpop.eup %5867  ;;  %v2073_v51 = vmul.f32 %v7267_v1, %v7177_v48  ;;  %v1950_v25 = vpop.permute.xlu0 %1949 }
 0x2af   : > { %v1689_v52 = vpop.f32.mrf.mxu1  ;;  %9799 = vst [vmem:[#allocation79_spill] sm:$0xff] %v7274_v35  ;;  %v2075_v48 = vmul.f32 %v7274_v35, %v7212_v36 }
 0x2b0   : > { %5881 = vpow2.f32 %v1821_v32  ;;  %v7281_v43 = vadd.f32 %v6682_v38, %v1689_v52  ;;  %v1952_v32 = vpop.permute.xlu1 %1951 }
 0x2b1   : > { %v7283_v9 = vpop.eup %5869 }
 0x2b2   : > { %v1823_v56 = vmul.f32 1.442695, %v7281_v43  ;;  %2251 = vrot.lane.b32.xlu1 %v2072_v22, %s5982_s4  ;;  %2253 = vrot.lane.b32.xlu0 %v2073_v51, %s5982_s4  ;;  %v7288_v20 = vpop.eup %5871  ;;  %v2074_v47 = vmul.f32 %v7283_v9, %v7197_v63 }
 0x2b3   : > { %9800 = vst [vmem:[#allocation80_spill] sm:$0xff] %v7288_v20  ;;  %v2076_v22 = vmul.f32 %v7288_v20, %v1940_v29 }
 0x2b4   : > { %5883 = vpow2.f32 %v1823_v56 }
 0x2b5   : > { %v7294_v38 = vpop.eup %5873 }
 0x2b6   : > { %9801 = vst [vmem:[#allocation81_spill] sm:$0xff] %v7294_v38  ;;  %2255 = vrot.lane.b32.xlu1 %v2074_v47, %s5982_s4  ;;  %2257 = vrot.lane.b32.xlu0 %v2075_v48, %s5982_s4  ;;  %v7298_v52 = vpop.eup %5875  ;;  %v2077_v51 = vmul.f32 %v7294_v38, %v1942_v44 }
 0x2b7   : > { %9802 = vst [vmem:[#allocation82_spill] sm:$0xff] %v7298_v52  ;;  %v2079_v56 = vmul.f32 %v7298_v52, %v1946_v55 }
 0x2b8   : > { %v2154_v1 = vpop.permute.xlu0 %2153 }
 0x2b9   : > { %v7302_v15 = vpop.eup %5877 }
 0x2ba   : > { %9803 = vst [vmem:[#allocation83_spill] sm:$0xff] %v7302_v15  ;;  %2259 = vrot.lane.b32.xlu1 %v2076_v22, %s5982_s4  ;;  %2261 = vrot.lane.b32.xlu0 %v2077_v51, %s5982_s4  ;;  %v7306_v63 = vpop.eup %5879  ;;  %v2078_v36 = vmul.f32 %v7302_v15, %v1944_v10 }
 0x2bb   : > { %9804 = vst [vmem:[#allocation84_spill] sm:$0xff] %v7306_v63  ;;  %v2080_v44 = vmul.f32 %v7306_v63, %v1948_v14 }
 0x2bc   : > { %v2156_v47 = vpop.permute.xlu1 %2155  ;;  %v2150_v48 = vpop.permute.xlu0 %2149 }
 0x2bd   : > { %v7310_v35 = vpop.eup %5881  ;;  %v7317_v22 = vadd.f32 %v2156_v47, %v6697_v59  ;;  %v7322_v55 = vadd.f32 %v2150_v48, %v6691_v57 }
 0x2be   : > { %9805 = vst [vmem:[#allocation85_spill] sm:$0xff] %v7310_v35  ;;  %2263 = vrot.lane.b32.xlu1 %v2078_v36, %s5982_s4  ;;  %2265 = vrot.lane.b32.xlu0 %v2079_v56, %s5982_s4  ;;  %v2081_v29 = vmul.f32 %v7310_v35, %v1950_v25  ;;  %v7328_v36 = vadd.f32 %v2154_v1, %v6685_v37  ;;  %v5757_v1 = vld [vmem:[%s9574_s1 + $0x48] sm:$0xff]  }
 0x2bf   : > { %5564 = vmatprep.subr.bf16.mxu1 %v5757_v1 }
 0x2c0   : > { %v2152_v51 = vpop.permute.xlu1 %2151  ;;  %v2162_v38 = vpop.permute.xlu0 %2161  ;;  %v2407_v56 = vpack.c.bf16 %v7317_v22, %v7328_v36  ;;  %5565 = vmatpush3.bf16.msra.mxu1 %v5757_v1 }
 0x2c1   : > { %v7319_v10 = vpop.eup %5883  ;;  %v7325_v52 = vadd.f32 %v2152_v51, %v6701_v62 }
 0x2c2   : > { %9806 = vst [vmem:[#allocation86_spill] sm:$0xff] %v7319_v10  ;;  %2267 = vrot.lane.b32.xlu1 %v2080_v44, %s5982_s4  ;;  %2269 = vrot.lane.b32.xlu0 %v2081_v29, %s5982_s4  ;;  %v2082_v25 = vmul.f32 %v7319_v10, %v1952_v32 }
 0x2c3   : > { %v2406_v14 = vpack.c.bf16 %v7325_v52, %v7322_v55 }
 0x2c4   : > { %v2164_v47 = vpop.permute.xlu1 %2163  ;;  %v2158_v48 = vpop.permute.xlu0 %2157 }
 0x2c5   : > { %5500 = vmatprep.mubr.msk.bf16.mxu0 %vm2443_vm2, %v2406_v14  ;;  %v7344_v44 = vadd.f32 %v2164_v47, %v6717_v41  ;;  %v7347_v51 = vadd.f32 %v2158_v48, %v6713_v40  ;;  %v7353_v14 = vadd.f32 %v2162_v38, %v6707_v24 }
 0x2c6   : > { %2271 = vrot.lane.b32.xlu1 %v2082_v25, %s5982_s4  ;;  %5501 = vmatmul.mubr.msk.bf16.vlgmr.msra.gmra.mxu0 %vm2443_vm2, %v2407_v56 }
 0x2c7   : > { %9807 = vst [vmem:[#allocation87_spill] sm:$0xff] %v7344_v44  ;;  %9808 = vst [vmem:[#allocation88_spill] sm:$0xff] %v7347_v51  ;;  %v2409_v56 = vpack.c.bf16 %v7344_v44, %v7353_v14 }
 0x2c8   : > { %v2160_v29 = vpop.permute.xlu1 %2159  ;;  %v2170_v32 = vpop.permute.xlu0 %2169 }
 0x2c9   : > { %v7350_v35 = vadd.f32 %v2160_v29, %v6723_v46 }
 0x2cb   : > { %9809 = vst [vmem:[#allocation89_spill] sm:$0xff] %v7350_v35  ;;  %v2408_v25 = vpack.c.bf16 %v7350_v35, %v7347_v51  ;;  %v7371_v35 = vadd.f32 %v2170_v32, %v6732_v27 }
 0x2cc   : > { %v2172_v47 = vpop.permute.xlu1 %2171  ;;  %v2166_v10 = vpop.permute.xlu0 %2165 }
 0x2cd   : > { %5504 = vmatprep.mubr.msk.bf16.mxu0 %vm2443_vm2, %v2408_v25  ;;  %v7362_v48 = vadd.f32 %v2172_v47, %v6748_v5  ;;  %v7365_v38 = vadd.f32 %v2166_v10, %v6740_v54  ;;  %9813 = vst [vmem:[#allocation93_spill] sm:$0xff] %v7371_v35 }
 0x2ce   : > { %5505 = vmatmul.mubr.msk.bf16.gmra.mxu0 %vm2443_vm2, %v2409_v56 }
 0x2cf   : > { %9810 = vst [vmem:[#allocation90_spill] sm:$0xff] %v7362_v48  ;;  %9811 = vst [vmem:[#allocation91_spill] sm:$0xff] %v7365_v38  ;;  %v2411_v25 = vpack.c.bf16 %v7362_v48, %v7371_v35 }
 0x2d0   : > { %v2168_v29 = vpop.permute.xlu1 %2167  ;;  %v2178_v63 = vpop.permute.xlu0 %2177 }
 0x2d1   : > { %v7368_v1 = vadd.f32 %v2168_v29, %v6761_v21 }
 0x2d3   : > { %9812 = vst [vmem:[#allocation92_spill] sm:$0xff] %v7368_v1  ;;  %v2410_v51 = vpack.c.bf16 %v7368_v1, %v7365_v38  ;;  %v7389_v1 = vadd.f32 %v2178_v63, %v6767_v0 }
 0x2d4   : > { %v2180_v56 = vpop.permute.xlu1 %2179  ;;  %v2174_v47 = vpop.permute.xlu0 %2173 }
 0x2d5   : > { %5508 = vmatprep.mubr.msk.bf16.mxu0 %vm2443_vm2, %v2410_v51  ;;  %v7380_v10 = vadd.f32 %v2180_v56, %v6789_v7  ;;  %v7383_v32 = vadd.f32 %v2174_v47, %v6781_v26  ;;  %9817 = vst [vmem:[#allocation97_spill] sm:$0xff] %v7389_v1 }
 0x2d6   : > { %5509 = vmatmul.mubr.msk.bf16.gmra.mxu0 %vm2443_vm2, %v2411_v25 }
 0x2d7   : > { %9814 = vst [vmem:[#allocation94_spill] sm:$0xff] %v7380_v10  ;;  %9815 = vst [vmem:[#allocation95_spill] sm:$0xff] %v7383_v32  ;;  %v2413_v51 = vpack.c.bf16 %v7380_v10, %v7389_v1 }
 0x2d8   : > { %v2176_v29 = vpop.permute.xlu1 %2175  ;;  %v2186_v44 = vpop.permute.xlu0 %2185 }
 0x2d9   : > { %v7386_v15 = vadd.f32 %v2176_v29, %v6801_v53 }
 0x2db   : > { %9816 = vst [vmem:[#allocation96_spill] sm:$0xff] %v7386_v15  ;;  %v2412_v38 = vpack.c.bf16 %v7386_v15, %v7383_v32  ;;  %v7407_v15 = vadd.f32 %v2186_v44, %v6809_v3 }
 0x2dc   : > { %v2188_v25 = vpop.permute.xlu1 %2187  ;;  %v2182_v56 = vpop.permute.xlu0 %2181 }
 0x2dd   : > { %5512 = vmatprep.mubr.msk.bf16.mxu0 %vm2443_vm2, %v2412_v38  ;;  %v7398_v47 = vadd.f32 %v2188_v25, %v6829_v28  ;;  %v7401_v63 = vadd.f32 %v2182_v56, %v6823_v23  ;;  %v5917_v38 = vld [vmem:[%s9575_s2 + $0x2] ss:$0 sm:$0xff] }
 0x2de   : > { %5513 = vmatmul.mubr.msk.bf16.gmra.mxu0 %vm2443_vm2, %v2413_v51  ;;  %v7413_v51 = vadd.f32 %v5917_v38, %v7252_v61 }
 0x2df   : > { %9818 = vst [vmem:[#allocation98_spill] sm:$0xff] %v7398_v47  ;;  %9819 = vst [vmem:[#allocation99_spill] sm:$0xff] %v7401_v63  ;;  %v2415_v56 = vpack.c.bf16 %v7398_v47, %v7407_v15 }
 0x2e0   : > { %v2184_v29 = vpop.permute.xlu1 %2183  ;;  %v2194_v48 = vpop.permute.xlu0 %2193  ;;  %v1825_v44 = vmul.f32 1.442695, %v7413_v51 }
 0x2e1   : > { %v7404_v35 = vadd.f32 %v2184_v29, %v6843_v8  ;;  %v7423_v29 = vadd.f32 %v5917_v38, %v7269_v18 }
 0x2e2   : > { %5885 = vpow2.f32 %v1825_v44 }
 0x2e3   : > { %9820 = vst [vmem:[#allocation100_spill] sm:$0xff] %v7404_v35  ;;  %v2414_v25 = vpack.c.bf16 %v7404_v35, %v7401_v63 }
 0x2e4   : > { %v2196_v32 = vpop.permute.xlu1 %2195  ;;  %v2190_v10 = vpop.permute.xlu0 %2189 }
 0x2e5   : > { %5516 = vmatprep.mubr.msk.bf16.mxu0 %vm2443_vm2, %v2414_v25  ;;  %v7426_v61 = vadd.f32 %v2196_v32, %v6871_v12  ;;  %v7429_v35 = vadd.f32 %v2190_v10, %v6863_v30  ;;  %v7435_v25 = vadd.f32 %v2194_v48, %v6851_v11 }
 0x2e6   : > { %5517 = vmatmul.mubr.msk.bf16.gmra.mxu0 %vm2443_vm2, %v2415_v56  ;;  %v1827_v56 = vmul.f32 1.442695, %v7423_v29 }
 0x2e7   : > { %9821 = vst [vmem:[#allocation101_spill] sm:$0xff] %v7426_v61  ;;  %9822 = vst [vmem:[#allocation102_spill] sm:$0xff] %v7429_v35  ;;  %v2417_v32 = vpack.c.bf16 %v7426_v61, %v7435_v25 }
 0x2e8   : > { %v2192_v1 = vpop.permute.xlu1 %2191  ;;  %v2202_v20 = vpop.permute.xlu0 %2201  ;;  %9824 = vst [vmem:[#allocation104_spill] sm:$0xff] %v7435_v25  ;;  %5887 = vpow2.f32 %v1827_v56 }
 0x2e9   : > { %v7432_v63 = vadd.f32 %v2192_v1, %v6885_v50 }
 0x2eb   : > { %9823 = vst [vmem:[#allocation103_spill] sm:$0xff] %v7432_v63  ;;  %v2416_v18 = vpack.c.bf16 %v7432_v63, %v7429_v35  ;;  %v7454_v35 = vadd.f32 %v2202_v20, %v6891_v19 }
 0x2ec   : > { %v2204_v38 = vpop.permute.xlu1 %2203  ;;  %v2198_v47 = vpop.permute.xlu0 %2197 }
 0x2ed   : > { %5520 = vmatprep.mubr.msk.bf16.mxu0 %vm2443_vm2, %v2416_v18  ;;  %v7445_v1 = vadd.f32 %v2204_v38, %v6913_v17  ;;  %v7448_v44 = vadd.f32 %v2198_v47, %v6905_v49  ;;  %9828 = vst [vmem:[#allocation108_spill] sm:$0xff] %v7454_v35 }
 0x2ee   : > { %5521 = vmatmul.mubr.msk.bf16.gmra.mxu0 %vm2443_vm2, %v2417_v32 }
 0x2ef   : > { %9825 = vst [vmem:[#allocation105_spill] sm:$0xff] %v7445_v1  ;;  %9826 = vst [vmem:[#allocation106_spill] sm:$0xff] %v7448_v44  ;;  %v2419_v56 = vpack.c.bf16 %v7445_v1, %v7454_v35  ;;  %v7462_v47 = vpop.eup %5885 }
 0x2f0   : > { %v2200_v48 = vpop.permute.xlu1 %2199  ;;  %v2210_v10 = vpop.permute.xlu0 %2209  ;;  %9829 = vst [vmem:[#allocation109_spill] sm:$0xff] %v7462_v47 }
 0x2f1   : > { %v7451_v63 = vadd.f32 %v2200_v48, %v6925_v16  ;;  %v7475_v1 = vadd.f32 %v2210_v10, %v6933_v42 }
 0x2f3   : > { %9827 = vst [vmem:[#allocation107_spill] sm:$0xff] %v7451_v63  ;;  %v2418_v18 = vpack.c.bf16 %v7451_v63, %v7448_v44 }
 0x2f4   : > { %v2212_v32 = vpop.permute.xlu1 %2211  ;;  %v2206_v38 = vpop.permute.xlu0 %2205 }
 0x2f5   : > { %5524 = vmatprep.mubr.msk.bf16.mxu0 %vm2443_vm2, %v2418_v18  ;;  %v7465_v48 = vadd.f32 %v2212_v32, %v6953_v4  ;;  %v7468_v25 = vadd.f32 %v2206_v38, %v6947_v13 }
 0x2f6   : > { %5525 = vmatmul.mubr.msk.bf16.gmra.mxu0 %vm2443_vm2, %v2419_v56  ;;  %v7480_v56 = vpop.eup %5887 }
 0x2f7   : > { %9831 = vst [vmem:[#allocation111_spill] sm:$0xff] %v7480_v56  ;;  %v2421_v32 = vpack.c.bf16 %v7465_v48, %v7475_v1 }
 0x2f8   : > { %v2208_v61 = vpop.permute.xlu1 %2207  ;;  %v1954_v20 = vpop.permute.xlu0 %1953 }
 0x2f9   : > { %v7471_v63 = vadd.f32 %v2208_v61, %v6967_v39  ;;  %v2083_v44 = vmul.f32 %v7462_v47, %v1954_v20 }
 0x2fb   : > { %9830 = vst [vmem:[#allocation110_spill] sm:$0xff] %v7471_v63  ;;  %v2420_v18 = vpack.c.bf16 %v7471_v63, %v7468_v25  ;;  %2273 = vrot.lane.b32.xlu0 %v2083_v44, %s5982_s4 }
 0x2fc   : > { %v1956_v38 = vpop.permute.xlu1 %1955  ;;  %v2214_v35 = vpop.permute.xlu0 %2213 }
 0x2fd   : > { %v2084_v61 = vmul.f32 %v7480_v56, %v1956_v38  ;;  %5528 = vmatprep.mubr.msk.bf16.mxu0 %vm2443_vm2, %v2420_v18  ;;  %v7491_v20 = vadd.f32 %v2214_v35, %v6986_v33  ;;  %v9836_v56 = vld [vmem:[#allocation33_spill] sm:$0xff] }
 0x2fe   : > { %5529 = vmatmul.mubr.msk.bf16.gmra.mxu0 %vm2443_vm2, %v2421_v32 }
 0x2ff   : > { %2275 = vrot.lane.b32.xlu1 %v2084_v61, %s5982_s4  ;;  %3966 = vrot.lane.b32.xlu0 %v7322_v55, %s5983_s8  ;;  %9832 = vst [vmem:[#allocation112_spill] sm:$0xff] %v7491_v20  ;;  %v9834_v55 = vld [vmem:[#allocation30_spill] sm:$0xff]  ;;  %s162_s4 = sand.u32 1, %s5970_s13  }
 0x300   : > { %v2216_v10 = vpop.permute.xlu1 %2215  ;;  %v2218_v44 = vpop.permute.xlu0 %2217  ;;  %s5010_s28 = sshll.u32 %s162_s4, 9  ;;  %s9532_s17 = scalar_lea.sflag [#allocation3], %s162_s4 }
 0x301   : > { %v7494_v47 = vadd.f32 %v2216_v10, %v7008_v58  ;;  %v7503_v61 = vadd.f32 %v2218_v44, %v9834_v55  ;;  %v9840_v44 = vld [vmem:[#allocation41_spill] sm:$0xff]  ;;  %s8526_s7 = scalar_lea.vmem [#allocation2], %s5010_s28 }
 0x303   : > { %9833 = vst [vmem:[#allocation113_spill] sm:$0xff] %v7494_v47  ;;  %v2422_v38 = vpack.c.bf16 %v7494_v47, %v7491_v20  ;;  %3968 = vrot.lane.b32.xlu1 %v7325_v52, %s5983_s8  ;;  %3970 = vrot.lane.b32.xlu0 %v7328_v36, %s5983_s8  ;;  %9835 = vst [vmem:[#allocation30_spill] sm:$0xff] %v7503_v61  ;;  %v9838_v47 = vld [vmem:[#allocation37_spill] sm:$0xff] }
 0x304   : > { %v2220_v18 = vpop.permute.xlu1 %2219  ;;  %v2222_v32 = vpop.permute.xlu0 %2221 }
 0x305   : > { %v7506_v35 = vadd.f32 %v2220_v18, %v9836_v56  ;;  %5532 = vmatprep.mubr.msk.bf16.mxu0 %vm2443_vm2, %v2422_v38  ;;  %v7516_v20 = vadd.f32 %v2222_v32, %v9838_v47  ;;  %v9842_v18 = vld [vmem:[#allocation36_spill] sm:$0xff] }
 0x307   : > { %9837 = vst [vmem:[#allocation33_spill] sm:$0xff] %v7506_v35  ;;  %v2423_v10 = vpack.c.bf16 %v7506_v35, %v7503_v61  ;;  %3972 = vrot.lane.b32.xlu1 %v7317_v22, %s5983_s8  ;;  %3978 = vrot.lane.b32.xlu0 %v7353_v14, %s5983_s8  ;;  %9839 = vst [vmem:[#allocation37_spill] sm:$0xff] %v7516_v20  ;;  %v9844_v35 = vld [vmem:[#allocation40_spill] sm:$0xff]  ;;  %v9851_v61 = vld [vmem:[#allocation46_spill] sm:$0xff] }
 0x308   : > { %v2224_v52 = vpop.permute.xlu1 %2223  ;;  %v2226_v36 = vpop.permute.xlu0 %2225 }
 0x309   : > { %v7519_v63 = vadd.f32 %v2224_v52, %v9840_v44  ;;  %5533 = vmatmul.mubr.msk.bf16.gmra.mxu0 %vm2443_vm2, %v2423_v10  ;;  %v7529_v32 = vadd.f32 %v2226_v36, %v9842_v18  ;;  %v5758_v10 = vld [vmem:[%s9574_s1 + $0x40] sm:$0xff]  }
 0x30a   : > { %5566 = vmatprep.subr.bf16.mxu1 %v5758_v10 }
 0x30b   : > { %9841 = vst [vmem:[#allocation41_spill] sm:$0xff] %v7519_v63  ;;  %v2424_v38 = vpack.c.bf16 %v7519_v63, %v7516_v20  ;;  %4289 = vrot.lane.b32.xlu1 %v6701_v62, %s5984_s9  ;;  %4287 = vrot.lane.b32.xlu0 %v6691_v57, %s5984_s9  ;;  %9843 = vst [vmem:[#allocation36_spill] sm:$0xff] %v7529_v32 }
 0x30c   : > { %v2228_v22 = vpop.permute.xlu1 %2227  ;;  %v2230_v14 = vpop.permute.xlu0 %2229  ;;  %5567 = vmatpush3.bf16.msra.mxu1 %v5758_v10 }
 0x30d   : > { %v7532_v52 = vadd.f32 %v2228_v22, %v9844_v35  ;;  %5536 = vmatprep.mubr.msk.bf16.mxu0 %vm2443_vm2, %v2424_v38  ;;  %v9846_v22 = vld [vmem:[#allocation44_spill] sm:$0xff] }
 0x30e   : > { %v7545_v63 = vadd.f32 %v2230_v14, %v9846_v22  ;;  %v9848_v38 = vld [vmem:[#allocation48_spill] sm:$0xff] }
 0x30f   : > { %9845 = vst [vmem:[#allocation40_spill] sm:$0xff] %v7532_v52  ;;  %v2425_v62 = vpack.c.bf16 %v7532_v52, %v7529_v32  ;;  %4293 = vrot.lane.b32.xlu1 %v6697_v59, %s5984_s9  ;;  %4291 = vrot.lane.b32.xlu0 %v6685_v37, %s5984_s9  ;;  %v9850_v32 = vld [vmem:[#allocation43_spill] sm:$0xff] }
 0x310   : > { %v2232_v57 = vpop.permute.xlu1 %2231  ;;  %v2234_v36 = vpop.permute.xlu0 %2233  ;;  %9847 = vst [vmem:[#allocation44_spill] sm:$0xff] %v7545_v63 }
 0x311   : > { %v7548_v20 = vadd.f32 %v2232_v57, %v9848_v38  ;;  %5537 = vmatmul.mubr.msk.bf16.gmra.mxu0 %vm2443_vm2, %v2425_v62  ;;  %v7558_v14 = vadd.f32 %v2234_v36, %v9850_v32 }
 0x313   : > { %9849 = vst [vmem:[#allocation48_spill] sm:$0xff] %v7548_v20  ;;  %v2426_v52 = vpack.c.bf16 %v7548_v20, %v7545_v63  ;;  %4297 = vrot.lane.b32.xlu1 %v6723_v46, %s5984_s9  ;;  %4295 = vrot.lane.b32.xlu0 %v6713_v40, %s5984_s9 }
 0x314   : > { %v2236_v37 = vpop.permute.xlu1 %2235  ;;  %v2238_v59 = vpop.permute.xlu0 %2237 }
 0x315   : > { %v7561_v57 = vadd.f32 %v2236_v37, %v9851_v61  ;;  %5540 = vmatprep.mubr.msk.bf16.mxu0 %vm2443_vm2, %v2426_v52  ;;  %v7571_v62 = vadd.f32 %v2238_v59, %v7106_v45  ;;  %v9854_v37 = vld [vmem:[#allocation50_spill] sm:$0xff]  ;;  %v9855_v59 = vld [vmem:[#allocation53_spill] sm:$0xff] }
 0x317   : > { %v2427_v10 = vpack.c.bf16 %v7561_v57, %v7558_v14  ;;  %4301 = vrot.lane.b32.xlu1 %v6717_v41, %s5984_s9  ;;  %4299 = vrot.lane.b32.xlu0 %v6707_v24, %s5984_s9  ;;  %9852 = vst [vmem:[#allocation43_spill] sm:$0xff] %v7571_v62 }
 0x318   : > { %v2240_v40 = vpop.permute.xlu1 %2239  ;;  %v2242_v46 = vpop.permute.xlu0 %2241 }
 0x319   : > { %v7574_v36 = vadd.f32 %v2240_v40, %v7128_v6  ;;  %5541 = vmatmul.mubr.msk.bf16.gmra.mxu0 %vm2443_vm2, %v2427_v10  ;;  %v7584_v20 = vadd.f32 %v2242_v46, %v9854_v37  ;;  %v9857_v40 = vld [vmem:[#allocation58_spill] sm:$0xff] }
 0x31b   : > { %9853 = vst [vmem:[#allocation46_spill] sm:$0xff] %v7574_v36  ;;  %v2428_v52 = vpack.c.bf16 %v7574_v36, %v7571_v62  ;;  %4305 = vrot.lane.b32.xlu1 %v6761_v21, %s5984_s9  ;;  %4303 = vrot.lane.b32.xlu0 %v6740_v54, %s5984_s9 }
 0x31c   : > { %v2244_v24 = vpop.permute.xlu1 %2243  ;;  %v2246_v41 = vpop.permute.xlu0 %2245 }
 0x31d   : > { %v7587_v63 = vadd.f32 %v2244_v24, %v9855_v59  ;;  %5544 = vmatprep.mubr.msk.bf16.mxu0 %vm2443_vm2, %v2428_v52  ;;  %v7597_v36 = vadd.f32 %v2246_v41, %v9857_v40  ;;  %v9860_v24 = vld [vmem:[#allocation56_spill] sm:$0xff] }
 0x31e   : > { %v9861_v41 = vld [vmem:[#allocation60_spill] sm:$0xff] }
 0x31f   : > { %9856 = vst [vmem:[#allocation50_spill] sm:$0xff] %v7587_v63  ;;  %v2429_v10 = vpack.c.bf16 %v7587_v63, %v7584_v20  ;;  %4309 = vrot.lane.b32.xlu1 %v6748_v5, %s5984_s9  ;;  %4307 = vrot.lane.b32.xlu0 %v6732_v27, %s5984_s9  ;;  %9858 = vst [vmem:[#allocation53_spill] sm:$0xff] %v7597_v36 }
 0x320   : > { %v2248_v54 = vpop.permute.xlu1 %2247  ;;  %v2250_v21 = vpop.permute.xlu0 %2249 }
 0x321   : > { %v7600_v46 = vadd.f32 %v2248_v54, %v7168_v34  ;;  %5545 = vmatmul.mubr.msk.bf16.gmra.mxu0 %vm2443_vm2, %v2429_v10  ;;  %v7610_v62 = vadd.f32 %v2250_v21, %v9860_v24  ;;  %v9863_v21 = vld [vmem:[#allocation68_spill] sm:$0xff] }
 0x323   : > { %9859 = vst [vmem:[#allocation58_spill] sm:$0xff] %v7600_v46  ;;  %v2430_v52 = vpack.c.bf16 %v7600_v46, %v7597_v36  ;;  %4313 = vrot.lane.b32.xlu1 %v6801_v53, %s5984_s9  ;;  %4311 = vrot.lane.b32.xlu0 %v6781_v26, %s5984_s9 }
 0x324   : > { %v2252_v27 = vpop.permute.xlu1 %2251  ;;  %v2254_v5 = vpop.permute.xlu0 %2253 }
 0x325   : > { %v7613_v63 = vadd.f32 %v2252_v27, %v9861_v41  ;;  %5548 = vmatprep.mubr.msk.bf16.mxu0 %vm2443_vm2, %v2430_v52  ;;  %v7623_v54 = vadd.f32 %v2254_v5, %v7190_v2  ;;  %v9865_v27 = vld [vmem:[#allocation63_spill] sm:$0xff]  ;;  %v9866_v5 = vld [vmem:[#allocation66_spill] sm:$0xff] }
 0x327   : > { %9862 = vst [vmem:[#allocation56_spill] sm:$0xff] %v7613_v63  ;;  %v2431_v10 = vpack.c.bf16 %v7613_v63, %v7610_v62  ;;  %4317 = vrot.lane.b32.xlu1 %v6789_v7, %s5984_s9  ;;  %4315 = vrot.lane.b32.xlu0 %v6767_v0, %s5984_s9 }
 0x328   : > { %v2256_v26 = vpop.permute.xlu1 %2255  ;;  %v2258_v53 = vpop.permute.xlu0 %2257 }
 0x329   : > { %v7626_v46 = vadd.f32 %v2256_v26, %v9863_v21  ;;  %5549 = vmatmul.mubr.msk.bf16.gmra.mxu0 %vm2443_vm2, %v2431_v10  ;;  %v7636_v36 = vadd.f32 %v2258_v53, %v9865_v27  ;;  %v9867_v53 = vld [vmem:[#allocation74_spill] sm:$0xff] }
 0x32b   : > { %9864 = vst [vmem:[#allocation60_spill] sm:$0xff] %v7626_v46  ;;  %v2432_v52 = vpack.c.bf16 %v7626_v46, %v7623_v54  ;;  %4321 = vrot.lane.b32.xlu1 %v6843_v8, %s5984_s9  ;;  %4319 = vrot.lane.b32.xlu0 %v6823_v23, %s5984_s9 }
 0x32c   : > { %v2260_v0 = vpop.permute.xlu1 %2259  ;;  %v2262_v7 = vpop.permute.xlu0 %2261 }
 0x32d   : > { %v7639_v63 = vadd.f32 %v2260_v0, %v9866_v5  ;;  %5552 = vmatprep.mubr.msk.bf16.mxu0 %vm2443_vm2, %v2432_v52  ;;  %v7649_v26 = vadd.f32 %v2262_v7, %v7230_v60 }
 0x32f   : > { %v2433_v10 = vpack.c.bf16 %v7639_v63, %v7636_v36  ;;  %4325 = vrot.lane.b32.xlu1 %v6829_v28, %s5984_s9  ;;  %4323 = vrot.lane.b32.xlu0 %v6809_v3, %s5984_s9  ;;  %v9869_v28 = vld [vmem:[#allocation70_spill] sm:$0xff] }
 0x330   : > { %v2264_v23 = vpop.permute.xlu1 %2263  ;;  %v2266_v8 = vpop.permute.xlu0 %2265 }
 0x331   : > { %v7652_v46 = vadd.f32 %v2264_v23, %v9867_v53  ;;  %5553 = vmatmul.mubr.msk.bf16.gmra.mxu0 %vm2443_vm2, %v2433_v10  ;;  %v7662_v0 = vadd.f32 %v2266_v8, %v9869_v28 }
 0x333   : > { %9868 = vst [vmem:[#allocation68_spill] sm:$0xff] %v7652_v46  ;;  %v2434_v52 = vpack.c.bf16 %v7652_v46, %v7649_v26  ;;  %4329 = vrot.lane.b32.xlu1 %v6885_v50, %s5984_s9  ;;  %4327 = vrot.lane.b32.xlu0 %v6863_v30, %s5984_s9  ;;  %v9870_v50 = vld [vmem:[#allocation77_spill] sm:$0xff] }
 0x334   : > { %v2268_v3 = vpop.permute.xlu1 %2267  ;;  %v2270_v23 = vpop.permute.xlu0 %2269 }
 0x335   : > { %v7665_v7 = vadd.f32 %v2268_v3, %v7239_v31  ;;  %5556 = vmatprep.mubr.msk.bf16.mxu0 %vm2443_vm2, %v2434_v52  ;;  %v7675_v46 = vadd.f32 %v2270_v23, %v9870_v50 }
 0x337   : > { %v2435_v10 = vpack.c.bf16 %v7665_v7, %v7662_v0  ;;  %4333 = vrot.lane.b32.xlu1 %v6871_v12, %s5984_s9  ;;  %4331 = vrot.lane.b32.xlu0 %v6851_v11, %s5984_s9 }
 0x338   : > { %v2272_v30 = vpop.permute.xlu1 %2271 }
 0x339   : > { %v7678_v8 = vadd.f32 %v2272_v30, %v7281_v43  ;;  %5557 = vmatmul.mubr.msk.bf16.gmra.mxu0 %vm2443_vm2, %v2435_v10  ;;  %v9875_v30 = vld [vmem:[#allocation12_spill] sm:$0xff] }
 0x33b   : > { %v2436_v52 = vpack.c.bf16 %v7678_v8, %v7675_v46  ;;  %4337 = vrot.lane.b32.xlu1 %v6925_v16, %s5984_s9  ;;  %4335 = vrot.lane.b32.xlu0 %v6905_v49, %s5984_s9 }
 0x33d   : > { %5560 = vmatprep.mubr.msk.bf16.mxu0 %vm2443_vm2, %v2436_v52  ;;  %v9876_v52 = vld [vmem:[#allocation10_spill] sm:$0xff] }
 0x33f   : > { %4341 = vrot.lane.b32.xlu1 %v6913_v17, %s5984_s9  ;;  %4339 = vrot.lane.b32.xlu0 %v6891_v19, %s5984_s9 }
 0x343   : > { %4345 = vrot.lane.b32.xlu1 %v6967_v39, %s5984_s9  ;;  %4343 = vrot.lane.b32.xlu0 %v6947_v13, %s5984_s9 }
 0x347   : > { %4349 = vrot.lane.b32.xlu1 %v6953_v4, %s5984_s9  ;;  %4347 = vrot.lane.b32.xlu0 %v6933_v42, %s5984_s9 }
 0x34b   : > { %4353 = vrot.lane.b32.xlu1 %v7008_v58, %s5984_s9  ;;  %4351 = vrot.lane.b32.xlu0 %v6986_v33, %s5984_s9 }
 0x34f   : > { %4357 = vrot.lane.b32.xlu1 %v9836_v56, %s5984_s9  ;;  %4355 = vrot.lane.b32.xlu0 %v9834_v55, %s5984_s9 }
 0x353   : > { %4361 = vrot.lane.b32.xlu1 %v9840_v44, %s5984_s9  ;;  %4359 = vrot.lane.b32.xlu0 %v9838_v47, %s5984_s9  ;;  %v7798_v47 = vld [vmem:[%s9575_s2 + $0x3] ss:$0 sm:$0xff] }
 0x357   : > { %4365 = vrot.lane.b32.xlu1 %v9844_v35, %s5984_s9  ;;  %4363 = vrot.lane.b32.xlu0 %v9842_v18, %s5984_s9  ;;  %v9871_v35 = vld [vmem:[#allocation8_spill] sm:$0xff] }
 0x35b   : > { %4369 = vrot.lane.b32.xlu1 %v9848_v38, %s5984_s9  ;;  %4367 = vrot.lane.b32.xlu0 %v9846_v22, %s5984_s9 }
 0x35f   : > { %4373 = vrot.lane.b32.xlu1 %v9851_v61, %s5984_s9  ;;  %4371 = vrot.lane.b32.xlu0 %v9850_v32, %s5984_s9 }
 0x363   : > { %4377 = vrot.lane.b32.xlu1 %v7128_v6, %s5984_s9  ;;  %4375 = vrot.lane.b32.xlu0 %v7106_v45, %s5984_s9 }
 0x367   : > { %4381 = vrot.lane.b32.xlu1 %v9855_v59, %s5984_s9  ;;  %4379 = vrot.lane.b32.xlu0 %v9854_v37, %s5984_s9 }
 0x36b   : > { %4385 = vrot.lane.b32.xlu1 %v7168_v34, %s5984_s9  ;;  %4383 = vrot.lane.b32.xlu0 %v9857_v40, %s5984_s9 }
 0x36d   : > { %v2274_v4 = vpop.permute.xlu0 %2273 }
 0x36e   : > { %v7743_v12 = vadd.f32 %v2274_v4, %v7413_v51 }
 0x36f   : > { %4389 = vrot.lane.b32.xlu1 %v9861_v41, %s5984_s9  ;;  %4387 = vrot.lane.b32.xlu0 %v9860_v24, %s5984_s9  ;;  %v9873_v24 = vld [vmem:[#allocation7_spill] sm:$0xff]  ;;  %v9874_v41 = vld [vmem:[#allocation5_spill] sm:$0xff] }
 0x371   : > { %v2276_v19 = vpop.permute.xlu1 %2275  ;;  %v7740_v11 = vpop.permute.xlu0 %3966 }
 0x372   : > { %v7746_v16 = vadd.f32 %v2276_v19, %v7423_v29 }
 0x373   : > { %4393 = vrot.lane.b32.xlu1 %v9863_v21, %s5984_s9  ;;  %4391 = vrot.lane.b32.xlu0 %v7190_v2, %s5984_s9 }
 0x374   : > { %v2437_v49 = vpack.c.bf16 %v7746_v16, %v7743_v12 }
 0x375   : > { %v7754_v17 = vpop.permute.xlu1 %3968  ;;  %v7756_v42 = vpop.permute.xlu0 %3970 }
 0x376   : > { %5561 = vmatmul.mubr.msk.bf16.gmra.mxu0 %vm2443_vm2, %v2437_v49 }
 0x377   : > { %4397 = vrot.lane.b32.xlu1 %v9866_v5, %s5984_s9  ;;  %4395 = vrot.lane.b32.xlu0 %v9865_v27, %s5984_s9 }
 0x379   : > { %v7763_v13 = vpop.permute.xlu1 %3972  ;;  %v7765_v39 = vpop.permute.xlu0 %3978 }
 0x37b   : > { %4401 = vrot.lane.b32.xlu1 %v9867_v53, %s5984_s9  ;;  %4399 = vrot.lane.b32.xlu0 %v7230_v60, %s5984_s9 }
 0x37d   : > { %v7771_v33 = vpop.permute.xlu1 %4289  ;;  %v7773_v58 = vpop.permute.xlu0 %4287 }
 0x37f   : > { %4405 = vrot.lane.b32.xlu1 %v7239_v31, %s5984_s9  ;;  %4403 = vrot.lane.b32.xlu0 %v9869_v28, %s5984_s9 }
 0x381   : > { %v7779_v45 = vpop.permute.xlu1 %4293  ;;  %v7781_v6 = vpop.permute.xlu0 %4291 }
 0x383   : > { %4409 = vrot.lane.b32.xlu1 %v7281_v43, %s5984_s9  ;;  %4407 = vrot.lane.b32.xlu0 %v9870_v50, %s5984_s9 }
 0x385   : > { %v7787_v34 = vpop.permute.xlu1 %4297  ;;  %v7789_v2 = vpop.permute.xlu0 %4295 }
 0x386   : > { %v5502_v60 = vpop.f32.mrf.mxu0 }
 0x387   : > { %4413 = vrot.lane.b32.xlu1 %v7423_v29, %s5984_s9  ;;  %4411 = vrot.lane.b32.xlu0 %v7413_v51, %s5984_s9  ;;  %v9872_v29 = vld [vmem:[#allocation6_spill] sm:$0xff]  ;;  %v2587_v51 = vadd.f32 %v5502_v60, %v7798_v47 }
 0x388   : > { %v2578_v31 = vpop.f32.mrf.mxu0 }
 0x389   : > { %v7800_v43 = vpop.permute.xlu1 %4301  ;;  %v2579_v55 = vadd.f32 %v7798_v47, %v2578_v31  ;;  %v7809_v44 = vpop.permute.xlu0 %4299  ;;  %v2835_v21 = vmax.f32 %v2587_v51, 0.0  ;;  %v9878_v51 = vld [vmem:[#allocation9_spill] sm:$0xff] }
 0x38a   : > { %v5503_v56 = vpop.f32.mrf.mxu0 }
 0x38b   : > { %v2590_v61 = vadd.f32 %v5503_v56, %v7798_v47  ;;  %4610 = vrot.lane.b32.xlu1 %v9871_v35, %s5984_s9  ;;  %4608 = vrot.lane.b32.xlu0 %v9872_v29, %s5984_s9  ;;  %v2833_v37 = vmax.f32 %v2579_v55, 0.0 }
 0x38c   : > { %v2581_v18 = vpop.f32.mrf.mxu0 }
 0x38d   : > { %v2582_v32 = vadd.f32 %v7798_v47, %v2581_v18  ;;  %v2836_v22 = vmax.f32 %v2590_v61, 0.0  ;;  %v7812_v40 = vpop.permute.xlu1 %4305  ;;  %v7818_v3 = vpop.permute.xlu0 %4303  ;;  %v9877_v61 = vld [vmem:[#allocation11_spill] sm:$0xff] }
 0x38e   : > { %v5506_v38 = vpop.f32.mrf.mxu0 }
 0x38f   : > { %v2834_v59 = vmax.f32 %v2582_v32, 0.0  ;;  %4614 = vrot.lane.b32.xlu1 %v9873_v24, %s5984_s9  ;;  %4612 = vrot.lane.b32.xlu0 %v9874_v41, %s5984_s9  ;;  %v2902_v53 = vpack.c.bf16 %v2836_v22, %v2835_v21  ;;  %v2603_v50 = vadd.f32 %v5506_v38, %v7798_v47  ;;  %v5759_v32 = vld [vmem:[%s9574_s1 + $0x58] sm:$0xff]  }
 0x390   : > { %v2594_v27 = vpop.f32.mrf.mxu0  ;;  %5632 = vmatprep.subr.bf16.mxu0 %v5759_v32  ;;  %v9879_v21 = vld [vmem:[#allocation16_spill] sm:$0xff] }
 0x391   : > { %v2901_v5 = vpack.c.bf16 %v2834_v59, %v2833_v37  ;;  %v2595_v23 = vadd.f32 %v7798_v47, %v2594_v27  ;;  %v7829_v19 = vpop.permute.xlu1 %4309  ;;  %v2839_v35 = vmax.f32 %v2603_v50, 0.0  ;;  %v7834_v29 = vpop.permute.xlu0 %4307  ;;  %5633 = vmatpush3.bf16.msra.mxu0 %v5759_v32  ;;  %v9883_v32 = vld [vmem:[#allocation20_spill] sm:$0xff] }
 0x392   : > { %v5507_v28 = vpop.f32.mrf.mxu0 }
 0x393   : > { %v2606_v10 = vadd.f32 %v5507_v28, %v7798_v47  ;;  %4618 = vrot.lane.b32.xlu1 %v9875_v30, %s5984_s9  ;;  %5568 = vmatprep.mubr.msk.bf16.mxu1 %vm813_vm0, %v2901_v5  ;;  %v2837_v56 = vmax.f32 %v2595_v23, 0.0  ;;  %v9880_v5 = vld [vmem:[#allocation14_spill] sm:$0xff] }
 0x394   : > { %4616 = vrot.lane.b32.xlu0 %v9876_v52, %s5984_s9  ;;  %v2597_v4 = vpop.f32.mrf.mxu0  ;;  %5569 = vmatmul.mubr.msk.bf16.vlgmr.msra.gmra.mxu1 %vm813_vm0, %v2902_v53 }
 0x395   : > { %v2598_v49 = vadd.f32 %v7798_v47, %v2597_v4  ;;  %v2840_v60 = vmax.f32 %v2606_v10, 0.0  ;;  %v7841_v59 = vpop.permute.xlu1 %4313  ;;  %v7853_v23 = vpop.permute.xlu0 %4311  ;;  %v9881_v4 = vld [vmem:[#allocation15_spill] sm:$0xff] }
 0x396   : > { %v5510_v31 = vpop.f32.mrf.mxu0 }
 0x397   : > { %v2838_v55 = vmax.f32 %v2598_v49, 0.0  ;;  %4622 = vrot.lane.b32.xlu1 %v9877_v61, %s5984_s9  ;;  %v2904_v38 = vpack.c.bf16 %v2840_v60, %v2839_v35  ;;  %v2619_v27 = vadd.f32 %v5510_v31, %v7798_v47  ;;  %v9882_v60 = vld [vmem:[#allocation13_spill] sm:$0xff] }
 0x398   : > { %4620 = vrot.lane.b32.xlu0 %v9878_v51, %s5984_s9  ;;  %v2610_v18 = vpop.f32.mrf.mxu0 }
 0x399   : > { %v2903_v22 = vpack.c.bf16 %v2838_v55, %v2837_v56  ;;  %v2611_v24 = vadd.f32 %v7798_v47, %v2610_v18  ;;  %v2843_v49 = vmax.f32 %v2619_v27, 0.0  ;;  %v7859_v56 = vpop.permute.xlu1 %4317 }
 0x39a   : > { %v5511_v37 = vpop.f32.mrf.mxu0 }
 0x39b   : > { %v2622_v41 = vadd.f32 %v5511_v37, %v7798_v47  ;;  %4626 = vrot.lane.b32.xlu1 %v9879_v21, %s5984_s9  ;;  %5572 = vmatprep.mubr.msk.bf16.mxu1 %vm813_vm0, %v2903_v22  ;;  %v2841_v50 = vmax.f32 %v2611_v24, 0.0  ;;  %v7866_v22 = vpop.permute.xlu0 %4315  ;;  %v9884_v37 = vld [vmem:[#allocation18_spill] sm:$0xff] }
 0x39c   : > { %4624 = vrot.lane.b32.xlu0 %v9880_v5, %s5984_s9  ;;  %v2613_v53 = vpop.f32.mrf.mxu0  ;;  %5573 = vmatmul.mubr.msk.bf16.gmra.mxu1 %vm813_vm0, %v2904_v38 }
 0x39d   : > { %v2614_v28 = vadd.f32 %v7798_v47, %v2613_v53  ;;  %v2844_v10 = vmax.f32 %v2622_v41, 0.0  ;;  %v7873_v5 = vpop.permute.xlu1 %4321 }
 0x39e   : > { %v5514_v30 = vpop.f32.mrf.mxu0  ;;  %9885 = vst [vmem:[#allocation63_spill] sm:$0xff] %v7873_v5  ;;  %v10015_v5 = vld [vmem:[#allocation56_spill] sm:$0xff] }
 0x39f   : > { %v2842_v52 = vmax.f32 %v2614_v28, 0.0  ;;  %4630 = vrot.lane.b32.xlu1 %v9881_v4, %s5984_s9  ;;  %v2906_v61 = vpack.c.bf16 %v2844_v10, %v2843_v49  ;;  %v2635_v38 = vadd.f32 %v5514_v30, %v7798_v47  ;;  %v9886_v10 = vld [vmem:[#allocation19_spill] sm:$0xff]  ;;  %v9887_v30 = vld [vmem:[#allocation17_spill] sm:$0xff]  ;;  %v7879_v49 = vpop.permute.xlu0 %4319 }
 0x3a0   : > { %4628 = vrot.lane.b32.xlu0 %v9882_v60, %s5984_s9  ;;  %v2626_v31 = vpop.f32.mrf.mxu0  ;;  %9888 = vst [vmem:[#allocation66_spill] sm:$0xff] %v7879_v49 }
 0x3a1   : > { %v2905_v55 = vpack.c.bf16 %v2842_v52, %v2841_v50  ;;  %v2627_v51 = vadd.f32 %v7798_v47, %v2626_v31  ;;  %v2847_v50 = vmax.f32 %v2635_v38, 0.0  ;;  %v7890_v38 = vpop.permute.xlu1 %4325 }
 0x3a2   : > { %v5515_v35 = vpop.f32.mrf.mxu0  ;;  %9891 = vst [vmem:[#allocation74_spill] sm:$0xff] %v7890_v38 }
 0x3a3   : > { %v2638_v18 = vadd.f32 %v5515_v35, %v7798_v47  ;;  %4634 = vrot.lane.b32.xlu1 %v9883_v32, %s5984_s9  ;;  %5576 = vmatprep.mubr.msk.bf16.mxu1 %vm813_vm0, %v2905_v55  ;;  %v2845_v53 = vmax.f32 %v2627_v51, 0.0  ;;  %v9889_v35 = vld [vmem:[#allocation24_spill] sm:$0xff] }
 0x3a4   : > { %4632 = vrot.lane.b32.xlu0 %v9884_v37, %s5984_s9  ;;  %v2629_v24 = vpop.f32.mrf.mxu0  ;;  %5577 = vmatmul.mubr.msk.bf16.gmra.mxu1 %vm813_vm0, %v2906_v61 }
 0x3a5   : > { %v2630_v41 = vadd.f32 %v7798_v47, %v2629_v24  ;;  %v2848_v21 = vmax.f32 %v2638_v18, 0.0  ;;  %v9890_v18 = vld [vmem:[#allocation22_spill] sm:$0xff] }
 0x3a6   : > { %v5518_v27 = vpop.f32.mrf.mxu0 }
 0x3a7   : > { %v2846_v28 = vmax.f32 %v2630_v41, 0.0  ;;  %4638 = vrot.lane.b32.xlu1 %v9886_v10, %s5984_s9  ;;  %v2908_v60 = vpack.c.bf16 %v2848_v21, %v2847_v50  ;;  %v2651_v51 = vadd.f32 %v5518_v27, %v7798_v47  ;;  %v7895_v10 = vpop.permute.xlu0 %4323  ;;  %v9893_v50 = vld [vmem:[#allocation21_spill] sm:$0xff] }
 0x3a8   : > { %4636 = vrot.lane.b32.xlu0 %v9887_v30, %s5984_s9  ;;  %v2642_v52 = vpop.f32.mrf.mxu0 }
 0x3a9   : > { %v2907_v4 = vpack.c.bf16 %v2846_v28, %v2845_v53  ;;  %v2643_v55 = vadd.f32 %v7798_v47, %v2642_v52  ;;  %v9892_v28 = vld [vmem:[#allocation23_spill] sm:$0xff]  ;;  %v2851_v27 = vmax.f32 %v2651_v51, 0.0 }
 0x3aa   : > { %v5519_v31 = vpop.f32.mrf.mxu0 }
 0x3ab   : > { %v2654_v61 = vadd.f32 %v5519_v31, %v7798_v47  ;;  %4642 = vrot.lane.b32.xlu1 %v9889_v35, %s5984_s9  ;;  %5580 = vmatprep.mubr.msk.bf16.mxu1 %vm813_vm0, %v2907_v4  ;;  %v2849_v21 = vmax.f32 %v2643_v55, 0.0  ;;  %v7899_v31 = vpop.permute.xlu1 %4329  ;;  %v9895_v35 = vld [vmem:[#allocation28_spill] sm:$0xff] }
 0x3ac   : > { %4640 = vrot.lane.b32.xlu0 %v9890_v18, %s5984_s9  ;;  %v2645_v32 = vpop.f32.mrf.mxu0  ;;  %5581 = vmatmul.mubr.msk.bf16.gmra.mxu1 %vm813_vm0, %v2908_v60  ;;  %9894 = vst [vmem:[#allocation70_spill] sm:$0xff] %v7899_v31  ;;  %v9896_v18 = vld [vmem:[#allocation26_spill] sm:$0xff] }
 0x3ad   : > { %v2646_v37 = vadd.f32 %v7798_v47, %v2645_v32  ;;  %v2852_v24 = vmax.f32 %v2654_v61, 0.0 }
 0x3ae   : > { %v5522_v41 = vpop.f32.mrf.mxu0 }
 0x3af   : > { %v2850_v53 = vmax.f32 %v2646_v37, 0.0  ;;  %4646 = vrot.lane.b32.xlu1 %v9892_v28, %s5984_s9  ;;  %v2910_v4 = vpack.c.bf16 %v2852_v24, %v2851_v27  ;;  %v2667_v51 = vadd.f32 %v5522_v41, %v7798_v47  ;;  %v7911_v24 = vpop.permute.xlu0 %4327  ;;  %v9899_v41 = vld [vmem:[#allocation25_spill] sm:$0xff] }
 0x3b0   : > { %4644 = vrot.lane.b32.xlu0 %v9893_v50, %s5984_s9  ;;  %v2658_v30 = vpop.f32.mrf.mxu0  ;;  %9897 = vst [vmem:[#allocation77_spill] sm:$0xff] %v7911_v24  ;;  %v9898_v50 = vld [vmem:[#allocation27_spill] sm:$0xff] }
 0x3b1   : > { %v2909_v52 = vpack.c.bf16 %v2850_v53, %v2849_v21  ;;  %v2659_v61 = vadd.f32 %v7798_v47, %v2658_v30  ;;  %v2855_v30 = vmax.f32 %v2667_v51, 0.0 }
 0x3b2   : > { %v5523_v60 = vpop.f32.mrf.mxu0 }
 0x3b3   : > { %v2670_v55 = vadd.f32 %v5523_v60, %v7798_v47  ;;  %4650 = vrot.lane.b32.xlu1 %v9895_v35, %s5984_s9  ;;  %5584 = vmatprep.mubr.msk.bf16.mxu1 %vm813_vm0, %v2909_v52  ;;  %v2853_v28 = vmax.f32 %v2659_v61, 0.0  ;;  %v7917_v60 = vpop.permute.xlu1 %4333  ;;  %v9901_v61 = vld [vmem:[#allocation34_spill] sm:$0xff] }
 0x3b4   : > { %4648 = vrot.lane.b32.xlu0 %v9896_v18, %s5984_s9  ;;  %v2661_v32 = vpop.f32.mrf.mxu0  ;;  %5585 = vmatmul.mubr.msk.bf16.gmra.mxu1 %vm813_vm0, %v2910_v4  ;;  %9900 = vst [vmem:[#allocation8_spill] sm:$0xff] %v7917_v60 }
 0x3b5   : > { %v2662_v37 = vadd.f32 %v7798_v47, %v2661_v32  ;;  %v2856_v21 = vmax.f32 %v2670_v55, 0.0 }
 0x3b6   : > { %v5526_v53 = vpop.f32.mrf.mxu0 }
 0x3b7   : > { %v2854_v27 = vmax.f32 %v2662_v37, 0.0  ;;  %4654 = vrot.lane.b32.xlu1 %v9898_v50, %s5984_s9  ;;  %v2912_v4 = vpack.c.bf16 %v2856_v21, %v2855_v30  ;;  %v7924_v37 = vpop.permute.xlu0 %4331  ;;  %v2683_v51 = vadd.f32 %v5526_v53, %v7798_v47  ;;  %v9903_v50 = vld [vmem:[#allocation31_spill] sm:$0xff]  ;;  %v7931_v30 = vpop.permute.xlu1 %4337  ;;  %v9906_v53 = vld [vmem:[#allocation29_spill] sm:$0xff] }
 0x3b8   : > { %4652 = vrot.lane.b32.xlu0 %v9899_v41, %s5984_s9  ;;  %v2674_v52 = vpop.f32.mrf.mxu0  ;;  %9902 = vst [vmem:[#allocation6_spill] sm:$0xff] %v7924_v37  ;;  %9904 = vst [vmem:[#allocation7_spill] sm:$0xff] %v7931_v30 }
 0x3b9   : > { %v2911_v35 = vpack.c.bf16 %v2854_v27, %v2853_v28  ;;  %v2675_v32 = vadd.f32 %v7798_v47, %v2674_v52 }
 0x3ba   : > { %v5527_v18 = vpop.f32.mrf.mxu0 }
 0x3bb   : > { %v2686_v55 = vadd.f32 %v5527_v18, %v7798_v47  ;;  %4658 = vrot.lane.b32.xlu1 %v9901_v61, %s5984_s9  ;;  %5588 = vmatprep.mubr.msk.bf16.mxu1 %vm813_vm0, %v2911_v35  ;;  %v2857_v52 = vmax.f32 %v2675_v32, 0.0  ;;  %v9905_v35 = vld [vmem:[#allocation32_spill] sm:$0xff]  ;;  %v2859_v61 = vmax.f32 %v2683_v51, 0.0  ;;  %v7937_v60 = vpop.permute.xlu0 %4335  ;;  %v9908_v32 = vld [vmem:[#allocation42_spill] sm:$0xff] }
 0x3bc   : > { %4656 = vrot.lane.b32.xlu0 %v9903_v50, %s5984_s9  ;;  %v2677_v41 = vpop.f32.mrf.mxu0  ;;  %5589 = vmatmul.mubr.msk.bf16.gmra.mxu1 %vm813_vm0, %v2912_v4  ;;  %9907 = vst [vmem:[#allocation5_spill] sm:$0xff] %v7937_v60  ;;  %v9923_v60 = vld [vmem:[#allocation52_spill] sm:$0xff] }
 0x3bd   : > { %v2678_v21 = vadd.f32 %v7798_v47, %v2677_v41  ;;  %v2860_v28 = vmax.f32 %v2686_v55, 0.0 }
 0x3be   : > { %v5530_v27 = vpop.f32.mrf.mxu0 }
 0x3bf   : > { %v2858_v18 = vmax.f32 %v2678_v21, 0.0  ;;  %4662 = vrot.lane.b32.xlu1 %v9905_v35, %s5984_s9  ;;  %v2914_v4 = vpack.c.bf16 %v2860_v28, %v2859_v61  ;;  %v2699_v51 = vadd.f32 %v5530_v27, %v7798_v47  ;;  %v9909_v21 = vld [vmem:[#allocation38_spill] sm:$0xff]  ;;  %v9911_v61 = vld [vmem:[#allocation39_spill] sm:$0xff] }
 0x3c0   : > { %4660 = vrot.lane.b32.xlu0 %v9906_v53, %s5984_s9  ;;  %v2690_v31 = vpop.f32.mrf.mxu0  ;;  %v7953_v53 = vpop.permute.xlu0 %4339  ;;  %v9913_v27 = vld [vmem:[#allocation35_spill] sm:$0xff] }
 0x3c1   : > { %v2913_v50 = vpack.c.bf16 %v2858_v18, %v2857_v52  ;;  %v2691_v55 = vadd.f32 %v7798_v47, %v2690_v31  ;;  %v7948_v52 = vpop.permute.xlu1 %4341  ;;  %9912 = vst [vmem:[#allocation10_spill] sm:$0xff] %v7953_v53 }
 0x3c2   : > { %v5531_v24 = vpop.f32.mrf.mxu0  ;;  %9910 = vst [vmem:[#allocation12_spill] sm:$0xff] %v7948_v52  ;;  %v9915_v52 = vld [vmem:[#allocation49_spill] sm:$0xff] }
 0x3c3   : > { %v2702_v41 = vadd.f32 %v5531_v24, %v7798_v47  ;;  %4666 = vrot.lane.b32.xlu1 %v9908_v32, %s5984_s9  ;;  %5592 = vmatprep.mubr.msk.bf16.mxu1 %vm813_vm0, %v2913_v50  ;;  %v2861_v18 = vmax.f32 %v2691_v55, 0.0  ;;  %v2863_v50 = vmax.f32 %v2699_v51, 0.0  ;;  %v9916_v55 = vld [vmem:[#allocation45_spill] sm:$0xff] }
 0x3c4   : > { %4664 = vrot.lane.b32.xlu0 %v9909_v21, %s5984_s9  ;;  %v2693_v35 = vpop.f32.mrf.mxu0  ;;  %5593 = vmatmul.mubr.msk.bf16.gmra.mxu1 %vm813_vm0, %v2914_v4 }
 0x3c5   : > { %v2694_v28 = vadd.f32 %v7798_v47, %v2693_v35  ;;  %v2864_v31 = vmax.f32 %v2702_v41, 0.0  ;;  %v7957_v4 = vpop.permute.xlu1 %4345  ;;  %v7965_v35 = vpop.permute.xlu0 %4343 }
 0x3c6   : > { %9914 = vst [vmem:[#allocation11_spill] sm:$0xff] %v7957_v4  ;;  %9917 = vst [vmem:[#allocation9_spill] sm:$0xff] %v7965_v35 }
 0x3c7   : > { %v2862_v24 = vmax.f32 %v2694_v28, 0.0  ;;  %4670 = vrot.lane.b32.xlu1 %v9911_v61, %s5984_s9  ;;  %v2916_v30 = vpack.c.bf16 %v2864_v31, %v2863_v50  ;;  %v9919_v50 = vld [vmem:[#allocation47_spill] sm:$0xff] }
 0x3c8   : > { %4668 = vrot.lane.b32.xlu0 %v9913_v27, %s5984_s9 }
 0x3c9   : > { %v2915_v32 = vpack.c.bf16 %v2862_v24, %v2861_v18  ;;  %v5534_v21 = vpop.f32.mrf.mxu0  ;;  %v9918_v24 = vld [vmem:[#allocation51_spill] sm:$0xff]  ;;  %v7975_v27 = vpop.permute.xlu1 %4349 }
 0x3ca   : > { %v2715_v18 = vadd.f32 %v5534_v21, %v7798_v47  ;;  %9920 = vst [vmem:[#allocation16_spill] sm:$0xff] %v7975_v27  ;;  %v7979_v35 = vpop.permute.xlu0 %4347  ;;  %v9929_v27 = vld [vmem:[#allocation59_spill] sm:$0xff] }
 0x3cb   : > { %4674 = vrot.lane.b32.xlu1 %v9915_v52, %s5984_s9  ;;  %v2706_v41 = vpop.f32.mrf.mxu0  ;;  %5596 = vmatprep.mubr.msk.bf16.mxu1 %vm813_vm0, %v2915_v32  ;;  %9922 = vst [vmem:[#allocation14_spill] sm:$0xff] %v7979_v35 }
 0x3cc   : > { %4672 = vrot.lane.b32.xlu0 %v9916_v55, %s5984_s9  ;;  %5597 = vmatmul.mubr.msk.bf16.gmra.mxu1 %vm813_vm0, %v2916_v30  ;;  %v2707_v28 = vadd.f32 %v7798_v47, %v2706_v41  ;;  %v2867_v41 = vmax.f32 %v2715_v18, 0.0 }
 0x3cd   : > { %v5535_v51 = vpop.f32.mrf.mxu0 }
 0x3ce   : > { %v2718_v31 = vadd.f32 %v5535_v51, %v7798_v47  ;;  %v2865_v55 = vmax.f32 %v2707_v28, 0.0  ;;  %v9921_v51 = vld [vmem:[#allocation55_spill] sm:$0xff]  ;;  %v7986_v28 = vpop.permute.xlu1 %4353 }
 0x3cf   : > { %4678 = vrot.lane.b32.xlu1 %v9918_v24, %s5984_s9  ;;  %v2709_v52 = vpop.f32.mrf.mxu0  ;;  %9924 = vst [vmem:[#allocation15_spill] sm:$0xff] %v7986_v28 }
 0x3d0   : > { %v2710_v61 = vadd.f32 %v7798_v47, %v2709_v52  ;;  %4676 = vrot.lane.b32.xlu0 %v9919_v50, %s5984_s9  ;;  %v2868_v30 = vmax.f32 %v2718_v31, 0.0 }
 0x3d1   : > { %v5538_v32 = vpop.f32.mrf.mxu0 }
 0x3d2   : > { %v2866_v4 = vmax.f32 %v2710_v61, 0.0  ;;  %v2918_v52 = vpack.c.bf16 %v2868_v30, %v2867_v41  ;;  %v2731_v18 = vadd.f32 %v5538_v32, %v7798_v47  ;;  %v9925_v61 = vld [vmem:[#allocation57_spill] sm:$0xff]  ;;  %v9928_v32 = vld [vmem:[#allocation62_spill] sm:$0xff] }
 0x3d3   : > { %4682 = vrot.lane.b32.xlu1 %v9921_v51, %s5984_s9  ;;  %v2722_v21 = vpop.f32.mrf.mxu0 }
 0x3d4   : > { %v2917_v24 = vpack.c.bf16 %v2866_v4, %v2865_v55  ;;  %4680 = vrot.lane.b32.xlu0 %v9923_v60, %s5984_s9  ;;  %v2723_v50 = vadd.f32 %v7798_v47, %v2722_v21  ;;  %v9926_v4 = vld [vmem:[#allocation54_spill] sm:$0xff] }
 0x3d5   : > { %v5539_v53 = vpop.f32.mrf.mxu0 }
 0x3d6   : > { %v2734_v31 = vadd.f32 %v5539_v53, %v7798_v47  ;;  %5600 = vmatprep.mubr.msk.bf16.mxu1 %vm813_vm0, %v2917_v24  ;;  %v7995_v53 = vpop.permute.xlu0 %4351  ;;  %v2869_v41 = vmax.f32 %v2723_v50, 0.0  ;;  %v2871_v24 = vmax.f32 %v2731_v18, 0.0 }
 0x3d7   : > { %4686 = vrot.lane.b32.xlu1 %v9925_v61, %s5984_s9  ;;  %v2725_v51 = vpop.f32.mrf.mxu0  ;;  %5601 = vmatmul.mubr.msk.bf16.gmra.mxu1 %vm813_vm0, %v2918_v52  ;;  %9927 = vst [vmem:[#allocation13_spill] sm:$0xff] %v7995_v53  ;;  %v8001_v52 = vpop.permute.xlu1 %4357  ;;  %v9936_v53 = vld [vmem:[#allocation65_spill] sm:$0xff] }
 0x3d8   : > { %v2726_v60 = vadd.f32 %v7798_v47, %v2725_v51  ;;  %4684 = vrot.lane.b32.xlu0 %v9926_v4, %s5984_s9  ;;  %v2872_v30 = vmax.f32 %v2734_v31, 0.0  ;;  %9930 = vst [vmem:[#allocation20_spill] sm:$0xff] %v8001_v52  ;;  %v5760_v31 = vld [vmem:[%s9574_s1 + $0x50] sm:$0xff]   ;;  %v9931_v4 = vld [vmem:[#allocation64_spill] sm:$0xff] }
 0x3d9   : > { %v5542_v55 = vpop.f32.mrf.mxu0  ;;  %5634 = vmatprep.subr.bf16.mxu0 %v5760_v31 }
 0x3da   : > { %v2870_v21 = vmax.f32 %v2726_v60, 0.0  ;;  %v2920_v51 = vpack.c.bf16 %v2872_v30, %v2871_v24  ;;  %v2747_v60 = vadd.f32 %v5542_v55, %v7798_v47  ;;  %v8013_v30 = vpop.permute.xlu0 %4355  ;;  %5635 = vmatpush3.bf16.msra.mxu0 %v5760_v31 }
 0x3db   : > { %4690 = vrot.lane.b32.xlu1 %v9928_v32, %s5984_s9  ;;  %v2738_v28 = vpop.f32.mrf.mxu0  ;;  %9932 = vst [vmem:[#allocation18_spill] sm:$0xff] %v8013_v30  ;;  %v8018_v55 = vpop.permute.xlu1 %4361 }
 0x3dc   : > { %v2919_v61 = vpack.c.bf16 %v2870_v21, %v2869_v41  ;;  %4688 = vrot.lane.b32.xlu0 %v9929_v27, %s5984_s9  ;;  %v2739_v50 = vadd.f32 %v7798_v47, %v2738_v28  ;;  %v9933_v21 = vld [vmem:[#allocation61_spill] sm:$0xff]  ;;  %9934 = vst [vmem:[#allocation19_spill] sm:$0xff] %v8018_v55 }
 0x3dd   : > { %v5543_v35 = vpop.f32.mrf.mxu0 }
 0x3de   : > { %v2750_v18 = vadd.f32 %v5543_v35, %v7798_v47  ;;  %5604 = vmatprep.mubr.msk.bf16.mxu1 %vm813_vm0, %v2919_v61  ;;  %v2873_v24 = vmax.f32 %v2739_v50, 0.0  ;;  %v2875_v61 = vmax.f32 %v2747_v60, 0.0  ;;  %v9938_v60 = vld [vmem:[#allocation71_spill] sm:$0xff] }
 0x3df   : > { %4694 = vrot.lane.b32.xlu1 %v9931_v4, %s5984_s9  ;;  %v2741_v27 = vpop.f32.mrf.mxu0  ;;  %5605 = vmatmul.mubr.msk.bf16.gmra.mxu1 %vm813_vm0, %v2920_v51  ;;  %v9935_v4 = vld [vmem:[#allocation69_spill] sm:$0xff] }
 0x3e0   : > { %v2742_v41 = vadd.f32 %v7798_v47, %v2741_v27  ;;  %4692 = vrot.lane.b32.xlu0 %v9933_v21, %s5984_s9  ;;  %v2876_v28 = vmax.f32 %v2750_v18, 0.0  ;;  %v8024_v21 = vpop.permute.xlu0 %4359 }
 0x3e1   : > { %v5546_v35 = vpop.f32.mrf.mxu0  ;;  %9937 = vst [vmem:[#allocation17_spill] sm:$0xff] %v8024_v21 }
 0x3e2   : > { %v2874_v32 = vmax.f32 %v2742_v41, 0.0  ;;  %v2922_v27 = vpack.c.bf16 %v2876_v28, %v2875_v61  ;;  %v2763_v50 = vadd.f32 %v5546_v35, %v7798_v47  ;;  %v9939_v28 = vld [vmem:[#allocation67_spill] sm:$0xff] }
 0x3e3   : > { %4698 = vrot.lane.b32.xlu1 %v9935_v4, %s5984_s9  ;;  %v2754_v51 = vpop.f32.mrf.mxu0  ;;  %v9941_v35 = vld [vmem:[#allocation75_spill] sm:$0xff] }
 0x3e4   : > { %v2921_v52 = vpack.c.bf16 %v2874_v32, %v2873_v24  ;;  %4696 = vrot.lane.b32.xlu0 %v9936_v53, %s5984_s9  ;;  %v2755_v18 = vadd.f32 %v7798_v47, %v2754_v51  ;;  %v8036_v24 = vpop.permute.xlu1 %4365 }
 0x3e5   : > { %v5547_v30 = vpop.f32.mrf.mxu0  ;;  %9940 = vst [vmem:[#allocation24_spill] sm:$0xff] %v8036_v24 }
 0x3e6   : > { %v2766_v31 = vadd.f32 %v5547_v30, %v7798_v47  ;;  %5608 = vmatprep.mubr.msk.bf16.mxu1 %vm813_vm0, %v2921_v52  ;;  %v2877_v30 = vmax.f32 %v2755_v18, 0.0  ;;  %v2879_v52 = vmax.f32 %v2763_v50, 0.0 }
 0x3e7   : > { %4702 = vrot.lane.b32.xlu1 %v9938_v60, %s5984_s9  ;;  %v2757_v41 = vpop.f32.mrf.mxu0  ;;  %5609 = vmatmul.mubr.msk.bf16.gmra.mxu1 %vm813_vm0, %v2922_v27  ;;  %v8040_v60 = vpop.permute.xlu0 %4363  ;;  %v9943_v27 = vld [vmem:[#allocation72_spill] sm:$0xff] }
 0x3e8   : > { %v2758_v53 = vadd.f32 %v7798_v47, %v2757_v41  ;;  %4700 = vrot.lane.b32.xlu0 %v9939_v28, %s5984_s9  ;;  %v2880_v32 = vmax.f32 %v2766_v31, 0.0  ;;  %9942 = vst [vmem:[#allocation22_spill] sm:$0xff] %v8040_v60  ;;  %v8047_v18 = vpop.permute.xlu1 %4369 }
 0x3e9   : > { %v5550_v61 = vpop.f32.mrf.mxu0  ;;  %9944 = vst [vmem:[#allocation23_spill] sm:$0xff] %v8047_v18  ;;  %v9948_v18 = vld [vmem:[#allocation78_spill] sm:$0xff] }
 0x3ea   : > { %v2878_v4 = vmax.f32 %v2758_v53, 0.0  ;;  %v2924_v41 = vpack.c.bf16 %v2880_v32, %v2879_v52  ;;  %v2779_v50 = vadd.f32 %v5550_v61, %v7798_v47  ;;  %v9945_v53 = vld [vmem:[#allocation76_spill] sm:$0xff]  ;;  %v9946_v32 = vld [vmem:[#allocation73_spill] sm:$0xff] }
 0x3eb   : > { %4706 = vrot.lane.b32.xlu1 %v9941_v35, %s5984_s9  ;;  %v2770_v51 = vpop.f32.mrf.mxu0 }
 0x3ec   : > { %v2923_v55 = vpack.c.bf16 %v2878_v4, %v2877_v30  ;;  %4704 = vrot.lane.b32.xlu0 %v9943_v27, %s5984_s9  ;;  %v2771_v28 = vadd.f32 %v7798_v47, %v2770_v51  ;;  %v2883_v27 = vmax.f32 %v2779_v50, 0.0  ;;  %v9950_v50 = vld [vmem:[#allocation80_spill] sm:$0xff] }
 0x3ed   : > { %v5551_v21 = vpop.f32.mrf.mxu0 }
 0x3ee   : > { %v2782_v31 = vadd.f32 %v5551_v21, %v7798_v47  ;;  %5612 = vmatprep.mubr.msk.bf16.mxu1 %vm813_vm0, %v2923_v55  ;;  %v8056_v21 = vpop.permute.xlu0 %4367  ;;  %v2881_v55 = vmax.f32 %v2771_v28, 0.0 }
 0x3ef   : > { %4710 = vrot.lane.b32.xlu1 %v9945_v53, %s5984_s9  ;;  %v2773_v35 = vpop.f32.mrf.mxu0  ;;  %5613 = vmatmul.mubr.msk.bf16.gmra.mxu1 %vm813_vm0, %v2924_v41  ;;  %9947 = vst [vmem:[#allocation21_spill] sm:$0xff] %v8056_v21  ;;  %v8062_v41 = vpop.permute.xlu1 %4373 }
 0x3f0   : > { %v2774_v30 = vadd.f32 %v7798_v47, %v2773_v35  ;;  %4708 = vrot.lane.b32.xlu0 %v9946_v32, %s5984_s9  ;;  %v2884_v4 = vmax.f32 %v2782_v31, 0.0  ;;  %9949 = vst [vmem:[#allocation28_spill] sm:$0xff] %v8062_v41 }
 0x3f1   : > { %v5554_v52 = vpop.f32.mrf.mxu0 }
 0x3f2   : > { %v2882_v51 = vmax.f32 %v2774_v30, 0.0  ;;  %v2926_v35 = vpack.c.bf16 %v2884_v4, %v2883_v27  ;;  %v2795_v28 = vadd.f32 %v5554_v52, %v7798_v47  ;;  %v8071_v30 = vpop.permute.xlu0 %4371  ;;  %v9952_v4 = vld [vmem:[#allocation79_spill] sm:$0xff] }
 0x3f3   : > { %4714 = vrot.lane.b32.xlu1 %v7283_v9, %s5984_s9  ;;  %v2786_v61 = vpop.f32.mrf.mxu0  ;;  %9951 = vst [vmem:[#allocation26_spill] sm:$0xff] %v8071_v30 }
 0x3f4   : > { %v2925_v53 = vpack.c.bf16 %v2882_v51, %v2881_v55  ;;  %4712 = vrot.lane.b32.xlu0 %v9948_v18, %s5984_s9  ;;  %v2787_v31 = vadd.f32 %v7798_v47, %v2786_v61  ;;  %v8076_v61 = vpop.permute.xlu1 %4377  ;;  %v2887_v52 = vmax.f32 %v2795_v28, 0.0 }
 0x3f5   : > { %v5555_v24 = vpop.f32.mrf.mxu0  ;;  %9953 = vst [vmem:[#allocation27_spill] sm:$0xff] %v8076_v61  ;;  %v10005_v61 = vld [vmem:[#allocation113_spill] sm:$0xff] }
 0x3f6   : > { %v2798_v32 = vadd.f32 %v5555_v24, %v7798_v47  ;;  %5616 = vmatprep.mubr.msk.bf16.mxu1 %vm813_vm0, %v2925_v53  ;;  %v2885_v24 = vmax.f32 %v2787_v31, 0.0  ;;  %v9954_v53 = vld [vmem:[#allocation83_spill] sm:$0xff]  ;;  %v8082_v30 = vpop.permute.xlu0 %4375 }
 0x3f7   : > { %4718 = vrot.lane.b32.xlu1 %v9950_v50, %s5984_s9  ;;  %v2789_v9 = vpop.f32.mrf.mxu0  ;;  %5617 = vmatmul.mubr.msk.bf16.gmra.mxu1 %vm813_vm0, %v2926_v35  ;;  %v9955_v35 = vld [vmem:[#allocation81_spill] sm:$0xff]  ;;  %9956 = vst [vmem:[#allocation25_spill] sm:$0xff] %v8082_v30  ;;  %v10014_v30 = vld [vmem:[#allocation46_spill] sm:$0xff] }
 0x3f8   : > { %v2790_v18 = vadd.f32 %v7798_v47, %v2789_v9  ;;  %4716 = vrot.lane.b32.xlu0 %v9952_v4, %s5984_s9  ;;  %v2888_v55 = vmax.f32 %v2798_v32, 0.0 }
 0x3f9   : > { %v5558_v51 = vpop.f32.mrf.mxu0 }
 0x3fa   : > { %v2886_v27 = vmax.f32 %v2790_v18, 0.0  ;;  %v2928_v21 = vpack.c.bf16 %v2888_v55, %v2887_v52  ;;  %v2811_v28 = vadd.f32 %v5558_v51, %v7798_v47  ;;  %v9957_v18 = vld [vmem:[#allocation84_spill] sm:$0xff]  ;;  %v9958_v55 = vld [vmem:[#allocation82_spill] sm:$0xff]  ;;  %v8098_v51 = vpop.permute.xlu0 %4379 }
 0x3fb   : > { %4722 = vrot.lane.b32.xlu1 %v9954_v53, %s5984_s9  ;;  %v2802_v50 = vpop.f32.mrf.mxu0  ;;  %9961 = vst [vmem:[#allocation31_spill] sm:$0xff] %v8098_v51 }
 0x3fc   : > { %v2927_v41 = vpack.c.bf16 %v2886_v27, %v2885_v24  ;;  %4720 = vrot.lane.b32.xlu0 %v9955_v35, %s5984_s9  ;;  %v2803_v32 = vadd.f32 %v7798_v47, %v2802_v50  ;;  %v8094_v27 = vpop.permute.xlu1 %4381  ;;  %v2891_v35 = vmax.f32 %v2811_v28, 0.0  ;;  %v9967_v28 = vld [vmem:[#allocation89_spill] sm:$0xff] }
 0x3fd   : > { %v5559_v9 = vpop.f32.mrf.mxu0  ;;  %9959 = vst [vmem:[#allocation34_spill] sm:$0xff] %v8094_v27 }
 0x3fe   : > { %v2814_v31 = vadd.f32 %v5559_v9, %v7798_v47  ;;  %5620 = vmatprep.mubr.msk.bf16.mxu1 %vm813_vm0, %v2927_v41  ;;  %v2889_v53 = vmax.f32 %v2803_v32, 0.0  ;;  %v9960_v41 = vld [vmem:[#allocation86_spill] sm:$0xff]  ;;  %v9965_v32 = vld [vmem:[#allocation88_spill] sm:$0xff] }
 0x3ff   : > { %4726 = vrot.lane.b32.xlu1 %v9957_v18, %s5984_s9  ;;  %v2805_v4 = vpop.f32.mrf.mxu0  ;;  %5621 = vmatmul.mubr.msk.bf16.gmra.mxu1 %vm813_vm0, %v2928_v21  ;;  %v9962_v18 = vld [vmem:[#allocation85_spill] sm:$0xff] }
 0x400   : > { %v2806_v24 = vadd.f32 %v7798_v47, %v2805_v4  ;;  %4724 = vrot.lane.b32.xlu0 %v9958_v55, %s5984_s9  ;;  %v2892_v52 = vmax.f32 %v2814_v31, 0.0  ;;  %v8103_v4 = vpop.permute.xlu1 %4385  ;;  %v9964_v55 = vld [vmem:[#allocation87_spill] sm:$0xff]  ;;  %v8110_v31 = vpop.permute.xlu0 %4383 }
 0x401   : > { %9963 = vst [vmem:[#allocation32_spill] sm:$0xff] %v8103_v4  ;;  %9966 = vst [vmem:[#allocation29_spill] sm:$0xff] %v8110_v31 }
 0x402   : > { %v2890_v50 = vmax.f32 %v2806_v24, 0.0  ;;  %v2930_v21 = vpack.c.bf16 %v2892_v52, %v2891_v35  ;;  %v9968_v24 = vld [vmem:[#allocation93_spill] sm:$0xff]  ;;  %v9972_v35 = vld [vmem:[#allocation91_spill] sm:$0xff] }
 0x403   : > { %4730 = vrot.lane.b32.xlu1 %v9960_v41, %s5984_s9 }
 0x404   : > { %v2929_v9 = vpack.c.bf16 %v2890_v50, %v2889_v53  ;;  %4728 = vrot.lane.b32.xlu0 %v9962_v18, %s5984_s9  ;;  %v8116_v52 = vpop.permute.xlu1 %4389  ;;  %v9970_v53 = vld [vmem:[#allocation90_spill] sm:$0xff]  ;;  %v8120_v50 = vpop.permute.xlu0 %4387  ;;  %v9975_v18 = vld [vmem:[#allocation97_spill] sm:$0xff] }
 0x405   : > { %9969 = vst [vmem:[#allocation42_spill] sm:$0xff] %v8116_v52  ;;  %9971 = vst [vmem:[#allocation38_spill] sm:$0xff] %v8120_v50 }
 0x406   : > { %5624 = vmatprep.mubr.msk.bf16.mxu1 %vm813_vm0, %v2929_v9  ;;  %v9974_v9 = vld [vmem:[#allocation92_spill] sm:$0xff] }
 0x407   : > { %3980 = vrot.lane.b32.xlu1 %v9964_v55, %s5983_s8  ;;  %5625 = vmatmul.mubr.msk.bf16.gmra.mxu1 %vm813_vm0, %v2930_v21  ;;  %v9977_v55 = vld [vmem:[#allocation94_spill] sm:$0xff] }
 0x408   : > { %3974 = vrot.lane.b32.xlu0 %v9965_v32, %s5983_s8  ;;  %v8124_v41 = vpop.permute.xlu1 %4393  ;;  %v8130_v21 = vpop.permute.xlu0 %4391  ;;  %v9978_v32 = vld [vmem:[#allocation95_spill] sm:$0xff] }
 0x409   : > { %9973 = vst [vmem:[#allocation39_spill] sm:$0xff] %v8124_v41  ;;  %9976 = vst [vmem:[#allocation35_spill] sm:$0xff] %v8130_v21 }
 0x40b   : > { %3976 = vrot.lane.b32.xlu1 %v9967_v28, %s5983_s8 }
 0x40c   : > { %3986 = vrot.lane.b32.xlu0 %v9968_v24, %s5983_s8  ;;  %v8136_v28 = vpop.permute.xlu1 %4397  ;;  %v9980_v24 = vld [vmem:[#allocation96_spill] sm:$0xff] }
 0x40d   : > { %9979 = vst [vmem:[#allocation49_spill] sm:$0xff] %v8136_v28 }
 0x40f   : > { %3988 = vrot.lane.b32.xlu1 %v9970_v53, %s5983_s8  ;;  %v8140_v53 = vpop.permute.xlu0 %4395 }
 0x410   : > { %3982 = vrot.lane.b32.xlu0 %v9972_v35, %s5983_s8  ;;  %9981 = vst [vmem:[#allocation45_spill] sm:$0xff] %v8140_v53  ;;  %v8144_v35 = vpop.permute.xlu1 %4401 }
 0x411   : > { %9982 = vst [vmem:[#allocation51_spill] sm:$0xff] %v8144_v35 }
 0x413   : > { %3984 = vrot.lane.b32.xlu1 %v9974_v9, %s5983_s8  ;;  %v9983_v9 = vld [vmem:[#allocation98_spill] sm:$0xff] }
 0x414   : > { %3994 = vrot.lane.b32.xlu0 %v9975_v18, %s5983_s8  ;;  %v9984_v18 = vld [vmem:[#allocation99_spill] sm:$0xff]  ;;  %v8156_v41 = vpop.permute.xlu1 %4405 }
 0x415   : > { %9988 = vst [vmem:[#allocation55_spill] sm:$0xff] %v8156_v41 }
 0x417   : > { %3996 = vrot.lane.b32.xlu1 %v9977_v55, %s5983_s8  ;;  %v8150_v55 = vpop.permute.xlu0 %4399 }
 0x418   : > { %3990 = vrot.lane.b32.xlu0 %v9978_v32, %s5983_s8  ;;  %9985 = vst [vmem:[#allocation47_spill] sm:$0xff] %v8150_v55  ;;  %v9986_v32 = vld [vmem:[#allocation100_spill] sm:$0xff]  ;;  %v8164_v28 = vpop.permute.xlu1 %4409 }
 0x419   : > { %9992 = vst [vmem:[#allocation57_spill] sm:$0xff] %v8164_v28 }
 0x41b   : > { %3992 = vrot.lane.b32.xlu1 %v9980_v24, %s5983_s8  ;;  %v9987_v24 = vld [vmem:[#allocation104_spill] sm:$0xff]  ;;  %v8160_v35 = vpop.permute.xlu0 %4403 }
 0x41c   : > { %4002 = vrot.lane.b32.xlu0 %v7407_v15, %s5983_s8  ;;  %v9989_v15 = vld [vmem:[#allocation101_spill] sm:$0xff]  ;;  %9990 = vst [vmem:[#allocation52_spill] sm:$0xff] %v8160_v35  ;;  %v8176_v41 = vpop.permute.xlu1 %4413  ;;  %v10002_v35 = vld [vmem:[#allocation30_spill] sm:$0xff] }
 0x41d   : > { %9998 = vst [vmem:[#allocation62_spill] sm:$0xff] %v8176_v41 }
 0x41f   : > { %4004 = vrot.lane.b32.xlu1 %v9983_v9, %s5983_s8  ;;  %v9991_v9 = vld [vmem:[#allocation102_spill] sm:$0xff]  ;;  %v8170_v55 = vpop.permute.xlu0 %4407 }
 0x420   : > { %3998 = vrot.lane.b32.xlu0 %v9984_v18, %s5983_s8  ;;  %v9993_v18 = vld [vmem:[#allocation103_spill] sm:$0xff]  ;;  %9995 = vst [vmem:[#allocation54_spill] sm:$0xff] %v8170_v55 }
 0x423   : > { %4000 = vrot.lane.b32.xlu1 %v9986_v32, %s5983_s8  ;;  %v9994_v32 = vld [vmem:[#allocation108_spill] sm:$0xff]  ;;  %v8180_v28 = vpop.permute.xlu0 %4411 }
 0x424   : > { %4010 = vrot.lane.b32.xlu0 %v9987_v24, %s5983_s8  ;;  %v9996_v24 = vld [vmem:[#allocation105_spill] sm:$0xff]  ;;  %10000 = vst [vmem:[#allocation59_spill] sm:$0xff] %v8180_v28  ;;  %v10001_v28 = vld [vmem:[#allocation110_spill] sm:$0xff] }
 0x427   : > { %4012 = vrot.lane.b32.xlu1 %v9989_v15, %s5983_s8  ;;  %v9997_v15 = vld [vmem:[#allocation106_spill] sm:$0xff] }
 0x428   : > { %4006 = vrot.lane.b32.xlu0 %v9991_v9, %s5983_s8  ;;  %v9999_v9 = vld [vmem:[#allocation107_spill] sm:$0xff] }
 0x42b   : > { %4008 = vrot.lane.b32.xlu1 %v9993_v18, %s5983_s8 }
 0x42c   : > { %4018 = vrot.lane.b32.xlu0 %v9994_v32, %s5983_s8  ;;  %v8184_v32 = vpop.permute.xlu1 %4610 }
 0x42f   : > { %4020 = vrot.lane.b32.xlu1 %v9996_v24, %s5983_s8 }
 0x430   : > { %4014 = vrot.lane.b32.xlu0 %v9997_v15, %s5983_s8  ;;  %v8190_v15 = vpop.permute.xlu0 %4608  ;;  %v8199_v21 = vpop.permute.xlu1 %4614 }
 0x433   : > { %4016 = vrot.lane.b32.xlu1 %v9999_v9, %s5983_s8 }
 0x434   : > { %4026 = vrot.lane.b32.xlu0 %v7475_v1, %s5983_s8 }
 0x436   : > { %v5562_v18 = vpop.f32.mrf.mxu0 }
 0x437   : > { %4028 = vrot.lane.b32.xlu1 %v7465_v48, %s5983_s8  ;;  %v2827_v1 = vadd.f32 %v5562_v18, %v7798_v47 }
 0x438   : > { %4022 = vrot.lane.b32.xlu0 %v7468_v25, %s5983_s8  ;;  %v2818_v24 = vpop.f32.mrf.mxu0 }
 0x439   : > { %v2819_v9 = vadd.f32 %v7798_v47, %v2818_v24  ;;  %v10003_v24 = vld [vmem:[#allocation33_spill] sm:$0xff]  ;;  %v2895_v31 = vmax.f32 %v2827_v1, 0.0 }
 0x43a   : > { %v5563_v41 = vpop.f32.mrf.mxu0 }
 0x43b   : > { %v2830_v55 = vadd.f32 %v5563_v41, %v7798_v47  ;;  %4024 = vrot.lane.b32.xlu1 %v10001_v28, %s5983_s8  ;;  %v2893_v4 = vmax.f32 %v2819_v9, 0.0  ;;  %v8204_v41 = vpop.permute.xlu0 %4612  ;;  %v10004_v28 = vld [vmem:[#allocation112_spill] sm:$0xff] }
 0x43c   : > { %4034 = vrot.lane.b32.xlu0 %v10002_v35, %s5983_s8  ;;  %v2821_v48 = vpop.f32.mrf.mxu0  ;;  %v8208_v35 = vpop.permute.xlu1 %4618  ;;  %v10007_v9 = vld [vmem:[#allocation40_spill] sm:$0xff] }
 0x43d   : > { %v2822_v25 = vadd.f32 %v7798_v47, %v2821_v48  ;;  %v2896_v53 = vmax.f32 %v2830_v55, 0.0  ;;  %v10006_v47 = vld [vmem:[#allocation36_spill] sm:$0xff] }
 0x43e   : > { %v10011_v48 = vld [vmem:[#allocation48_spill] sm:$0xff] }
 0x43f   : > { %v2894_v52 = vmax.f32 %v2822_v25, 0.0  ;;  %4036 = vrot.lane.b32.xlu1 %v10003_v24, %s5983_s8  ;;  %v2932_v50 = vpack.c.bf16 %v2896_v53, %v2895_v31  ;;  %v8216_v55 = vpop.permute.xlu0 %4616 }
 0x440   : > { %4030 = vrot.lane.b32.xlu0 %v10004_v28, %s5983_s8  ;;  %v8222_v31 = vpop.permute.xlu1 %4622  ;;  %v8247_v28 = vld [vmem:[%s9575_s2 + $0x4] ss:$0 sm:$0xff] }
 0x441   : > { %v2931_v18 = vpack.c.bf16 %v2894_v52, %v2893_v4  ;;  %v10008_v4 = vld [vmem:[#allocation37_spill] sm:$0xff] }
 0x442   : > { %v10009_v52 = vld [vmem:[#allocation41_spill] sm:$0xff] }
 0x443   : > { %4032 = vrot.lane.b32.xlu1 %v10005_v61, %s5983_s8  ;;  %5628 = vmatprep.mubr.msk.bf16.mxu1 %vm813_vm0, %v2931_v18  ;;  %v8226_v61 = vpop.permute.xlu0 %4620 }
 0x444   : > { %4042 = vrot.lane.b32.xlu0 %v10006_v47, %s5983_s8  ;;  %5629 = vmatmul.mubr.msk.bf16.gmra.mxu1 %vm813_vm0, %v2932_v50  ;;  %v8230_v53 = vpop.permute.xlu1 %4626  ;;  %v10010_v50 = vld [vmem:[#allocation44_spill] sm:$0xff]  ;;  %v10013_v47 = vld [vmem:[#allocation43_spill] sm:$0xff] }
 0x447   : > { %4044 = vrot.lane.b32.xlu1 %v10007_v9, %s5983_s8  ;;  %v8236_v1 = vpop.permute.xlu0 %4624 }
 0x448   : > { %4038 = vrot.lane.b32.xlu0 %v10008_v4, %s5983_s8  ;;  %v8242_v24 = vpop.permute.xlu1 %4630 }
 0x44b   : > { %4040 = vrot.lane.b32.xlu1 %v10009_v52, %s5983_s8  ;;  %v8251_v18 = vpop.permute.xlu0 %4628 }
 0x44c   : > { %4050 = vrot.lane.b32.xlu0 %v7558_v14, %s5983_s8 }
 0x44f   : > { %4052 = vrot.lane.b32.xlu1 %v7561_v57, %s5983_s8  ;;  %v10012_v57 = vld [vmem:[#allocation50_spill] sm:$0xff] }
 0x450   : > { %4046 = vrot.lane.b32.xlu0 %v10010_v50, %s5983_s8 }
 0x453   : > { %4048 = vrot.lane.b32.xlu1 %v10011_v48, %s5983_s8  ;;  %v8258_v48 = vpop.permute.xlu1 %4634 }
 0x454   : > { %4058 = vrot.lane.b32.xlu0 %v7584_v20, %s5983_s8  ;;  %v5570_v25 = vpop.f32.mrf.mxu1 }
 0x455   : > { %v3089_v52 = vadd.f32 %v5570_v25, %v8247_v28 }
 0x456   : > { %v3080_v14 = vpop.f32.mrf.mxu1 }
 0x457   : > { %4060 = vrot.lane.b32.xlu1 %v10012_v57, %s5983_s8  ;;  %v3081_v20 = vadd.f32 %v8247_v28, %v3080_v14  ;;  %v8265_v14 = vpop.permute.xlu0 %4632 }
 0x458   : > { %4054 = vrot.lane.b32.xlu0 %v10013_v47, %s5983_s8  ;;  %v5571_v9 = vpop.f32.mrf.mxu1 }
 0x459   : > { %v3092_v4 = vadd.f32 %v5571_v9, %v8247_v28  ;;  %v3335_v51 = vmax.f32 %v3081_v20, 0.0  ;;  %v3337_v9 = vmax.f32 %v3089_v52, 0.0 }
 0x45a   : > { %v3083_v50 = vpop.f32.mrf.mxu1 }
 0x45b   : > { %v3084_v27 = vadd.f32 %v8247_v28, %v3083_v50  ;;  %4056 = vrot.lane.b32.xlu1 %v10014_v30, %s5983_s8  ;;  %v3338_v57 = vmax.f32 %v3092_v4, 0.0  ;;  %v10016_v50 = vld [vmem:[#allocation53_spill] sm:$0xff]  ;;  %v8271_v4 = vpop.permute.xlu1 %4638 }
 0x45c   : > { %4066 = vrot.lane.b32.xlu0 %v7610_v62, %s5983_s8  ;;  %v5574_v47 = vpop.f32.mrf.mxu1 }
 0x45d   : > { %v3336_v60 = vmax.f32 %v3084_v27, 0.0  ;;  %v3404_v38 = vpack.c.bf16 %v3338_v57, %v3337_v9  ;;  %v3105_v27 = vadd.f32 %v5574_v47, %v8247_v28 }
 0x45e   : > { %v3096_v37 = vpop.f32.mrf.mxu1 }
 0x45f   : > { %v3403_v25 = vpack.c.bf16 %v3336_v60, %v3335_v51  ;;  %4068 = vrot.lane.b32.xlu1 %v10015_v5, %s5983_s8  ;;  %v3097_v62 = vadd.f32 %v8247_v28, %v3096_v37  ;;  %v10017_v60 = vld [vmem:[#allocation58_spill] sm:$0xff]  ;;  %v8281_v51 = vpop.permute.xlu0 %4636  ;;  %v8285_v47 = vpop.permute.xlu1 %4642 }
 0x460   : > { %4062 = vrot.lane.b32.xlu0 %v10016_v50, %s5983_s8  ;;  %v5575_v30 = vpop.f32.mrf.mxu1 }
 0x461   : > { %v3108_v20 = vadd.f32 %v5575_v30, %v8247_v28  ;;  %5636 = vmatprep.mubr.msk.bf16.mxu0 %vm813_vm0, %v3403_v25  ;;  %v3339_v9 = vmax.f32 %v3097_v62, 0.0  ;;  %v3341_v25 = vmax.f32 %v3105_v27, 0.0 }
 0x462   : > { %v3099_v52 = vpop.f32.mrf.mxu1  ;;  %5637 = vmatmul.mubr.msk.bf16.vlgmr.msra.gmra.mxu0 %vm813_vm0, %v3404_v38 }
 0x463   : > { %v3100_v5 = vadd.f32 %v8247_v28, %v3099_v52  ;;  %4064 = vrot.lane.b32.xlu1 %v10017_v60, %s5983_s8  ;;  %v3342_v57 = vmax.f32 %v3108_v20, 0.0  ;;  %v8294_v62 = vpop.permute.xlu0 %4640  ;;  %v10018_v60 = vld [vmem:[#allocation60_spill] sm:$0xff] }
 0x464   : > { %4074 = vrot.lane.b32.xlu0 %v7636_v36, %s5983_s8  ;;  %v5578_v37 = vpop.f32.mrf.mxu1 }
 0x465   : > { %v3340_v50 = vmax.f32 %v3100_v5, 0.0  ;;  %v3406_v38 = vpack.c.bf16 %v3342_v57, %v3341_v25  ;;  %v3121_v27 = vadd.f32 %v5578_v37, %v8247_v28 }
 0x466   : > { %v3112_v30 = vpop.f32.mrf.mxu1 }
 0x467   : > { %v3405_v49 = vpack.c.bf16 %v3340_v50, %v3339_v9  ;;  %4076 = vrot.lane.b32.xlu1 %v7639_v63, %s5983_s8  ;;  %v3113_v20 = vadd.f32 %v8247_v28, %v3112_v30  ;;  %v8303_v9 = vpop.permute.xlu1 %4646  ;;  %v3345_v25 = vmax.f32 %v3121_v27, 0.0 }
 0x468   : > { %4070 = vrot.lane.b32.xlu0 %v7623_v54, %s5983_s8  ;;  %v5579_v52 = vpop.f32.mrf.mxu1 }
 0x469   : > { %v3124_v36 = vadd.f32 %v5579_v52, %v8247_v28  ;;  %5640 = vmatprep.mubr.msk.bf16.mxu0 %vm813_vm0, %v3405_v49  ;;  %v3343_v49 = vmax.f32 %v3113_v20, 0.0 }
 0x46a   : > { %v3115_v5 = vpop.f32.mrf.mxu1  ;;  %5641 = vmatmul.mubr.msk.bf16.gmra.mxu0 %vm813_vm0, %v3406_v38  ;;  %v8307_v38 = vpop.permute.xlu0 %4644 }
 0x46b   : > { %v3116_v63 = vadd.f32 %v8247_v28, %v3115_v5  ;;  %4072 = vrot.lane.b32.xlu1 %v10018_v60, %s5983_s8  ;;  %v3346_v54 = vmax.f32 %v3124_v36, 0.0  ;;  %v10020_v60 = vld [vmem:[#allocation68_spill] sm:$0xff] }
 0x46c   : > { %4082 = vrot.lane.b32.xlu0 %v7662_v0, %s5983_s8  ;;  %v5582_v57 = vpop.f32.mrf.mxu1 }
 0x46d   : > { %v3344_v50 = vmax.f32 %v3116_v63, 0.0  ;;  %v3408_v52 = vpack.c.bf16 %v3346_v54, %v3345_v25  ;;  %v3137_v20 = vadd.f32 %v5582_v57, %v8247_v28  ;;  %v8316_v63 = vpop.permute.xlu1 %4650 }
 0x46e   : > { %v3128_v30 = vpop.f32.mrf.mxu1  ;;  %10019 = vst [vmem:[#allocation64_spill] sm:$0xff] %v8316_v63  ;;  %v8323_v25 = vpop.permute.xlu0 %4648 }
 0x46f   : > { %v3407_v37 = vpack.c.bf16 %v3344_v50, %v3343_v49  ;;  %4084 = vrot.lane.b32.xlu1 %v7665_v7, %s5983_s8  ;;  %v3129_v0 = vadd.f32 %v8247_v28, %v3128_v30  ;;  %10021 = vst [vmem:[#allocation61_spill] sm:$0xff] %v8323_v25  ;;  %v3349_v57 = vmax.f32 %v3137_v20, 0.0 }
 0x470   : > { %4078 = vrot.lane.b32.xlu0 %v7649_v26, %s5983_s8  ;;  %v5583_v36 = vpop.f32.mrf.mxu1 }
 0x471   : > { %v3140_v5 = vadd.f32 %v5583_v36, %v8247_v28  ;;  %5644 = vmatprep.mubr.msk.bf16.mxu0 %vm813_vm0, %v3407_v37  ;;  %v3347_v49 = vmax.f32 %v3129_v0, 0.0 }
 0x472   : > { %v3131_v27 = vpop.f32.mrf.mxu1  ;;  %5645 = vmatmul.mubr.msk.bf16.gmra.mxu0 %vm813_vm0, %v3408_v52 }
 0x473   : > { %v3132_v7 = vadd.f32 %v8247_v28, %v3131_v27  ;;  %4080 = vrot.lane.b32.xlu1 %v10020_v60, %s5983_s8  ;;  %v3350_v26 = vmax.f32 %v3140_v5, 0.0  ;;  %v8329_v5 = vpop.permute.xlu1 %4654  ;;  %v10024_v60 = vld [vmem:[#allocation109_spill] sm:$0xff] }
 0x474   : > { %4090 = vrot.lane.b32.xlu0 %v7743_v12, %s5983_s8  ;;  %v5586_v54 = vpop.f32.mrf.mxu1  ;;  %10022 = vst [vmem:[#allocation69_spill] sm:$0xff] %v8329_v5 }
 0x475   : > { %v3348_v50 = vmax.f32 %v3132_v7, 0.0  ;;  %v3410_v52 = vpack.c.bf16 %v3350_v26, %v3349_v57  ;;  %v3153_v20 = vadd.f32 %v5586_v54, %v8247_v28 }
 0x476   : > { %v3144_v30 = vpop.f32.mrf.mxu1 }
 0x477   : > { %v3409_v37 = vpack.c.bf16 %v3348_v50, %v3347_v49  ;;  %4092 = vrot.lane.b32.xlu1 %v7746_v16, %s5983_s8  ;;  %v3145_v12 = vadd.f32 %v8247_v28, %v3144_v30  ;;  %v3353_v57 = vmax.f32 %v3153_v20, 0.0  ;;  %v8343_v54 = vpop.permute.xlu1 %4658 }
 0x478   : > { %4086 = vrot.lane.b32.xlu0 %v7675_v46, %s5983_s8  ;;  %v5587_v36 = vpop.f32.mrf.mxu1  ;;  %v8339_v46 = vpop.permute.xlu0 %4652  ;;  %10025 = vst [vmem:[#allocation71_spill] sm:$0xff] %v8343_v54 }
 0x479   : > { %v3156_v0 = vadd.f32 %v5587_v36, %v8247_v28  ;;  %5648 = vmatprep.mubr.msk.bf16.mxu0 %vm813_vm0, %v3409_v37  ;;  %10023 = vst [vmem:[#allocation65_spill] sm:$0xff] %v8339_v46  ;;  %v3351_v49 = vmax.f32 %v3145_v12, 0.0 }
 0x47a   : > { %v3147_v27 = vpop.f32.mrf.mxu1  ;;  %5649 = vmatmul.mubr.msk.bf16.gmra.mxu0 %vm813_vm0, %v3410_v52  ;;  %v10026_v52 = vld [vmem:[#allocation111_spill] sm:$0xff] }
 0x47b   : > { %v3148_v16 = vadd.f32 %v8247_v28, %v3147_v27  ;;  %4088 = vrot.lane.b32.xlu1 %v7678_v8, %s5983_s8  ;;  %v3354_v7 = vmax.f32 %v3156_v0, 0.0  ;;  %s5192_s8 = sshll.u32 %s6029_s16, 13 }
 0x47c   : > { %4732 = vrot.lane.b32.xlu0 %v10024_v60, %s5984_s9  ;;  %v5590_v26 = vpop.f32.mrf.mxu1  ;;  %s9514_s11 = scalar_lea.hbm %s9576_s3, %s5192_s8 }
 0x47d   : > { %v3352_v50 = vmax.f32 %v3148_v16, 0.0  ;;  %v3412_v36 = vpack.c.bf16 %v3354_v7, %v3353_v57  ;;  %v3169_v60 = vadd.f32 %v5590_v26, %v8247_v28 }
 0x47e   : > { %v3160_v30 = vpop.f32.mrf.mxu1 }
 0x47f   : > { %v3411_v37 = vpack.c.bf16 %v3352_v50, %v3351_v49  ;;  %4734 = vrot.lane.b32.xlu1 %v10026_v52, %s5984_s9  ;;  %v3161_v8 = vadd.f32 %v8247_v28, %v3160_v30  ;;  %v3357_v52 = vmax.f32 %v3169_v60, 0.0  ;;  %s4944_s9 = sshll.u32 %s8526_s7, 4  ;;  %s9522_s9 = int_to_ptr.vmem [resolvable:$true] %s4944_s9 }
 0x480   : > { %v5591_v27 = vpop.f32.mrf.mxu1  ;;  %s5918_s19 = scalar_lea.vmem %s9522_s9, 8192  ;;  %p5925_p0 = scmp.lt.s32.totalorder %s9522_s9, %s5923_s25 }
 0x481   : > { %v3172_v0 = vadd.f32 %v5591_v27, %v8247_v28  ;;  %5652 = vmatprep.mubr.msk.bf16.mxu0 %vm813_vm0, %v3411_v37  ;;  %v3355_v50 = vmax.f32 %v3161_v8, 0.0  ;;  %v8359_v8 = vpop.permute.xlu0 %4656  ;;  %p5919_p11 = scmp.ne.s32.totalorder %s9522_s9, %s5918_s19  ;;  %p5926_p1 = scmp.lt.s32.totalorder %s5924_s26, %s5918_s19 }
 0x482   : > { %v3163_v12 = vpop.f32.mrf.mxu1  ;;  %5653 = vmatmul.mubr.msk.bf16.gmra.mxu0 %vm813_vm0, %v3412_v36  ;;  %10027 = vst [vmem:[#allocation67_spill] sm:$0xff] %v8359_v8 }
 0x483   : > { %v3164_v20 = vadd.f32 %v8247_v28, %v3163_v12  ;;  %v3358_v16 = vmax.f32 %v3172_v0, 0.0  ;;  %p5920_p12 = pnand %p5919_p11, %p6046_p5  ;;  %p5927_p2 = por %p5926_p1, %p5925_p0 }
 0x484   : > { %v5594_v49 = vpop.f32.mrf.mxu1 }
 0x485   : > { %v3356_v54 = vmax.f32 %v3164_v20, 0.0  ;;  %v3414_v63 = vpack.c.bf16 %v3358_v16, %v3357_v52  ;;  %v3185_v26 = vadd.f32 %v5594_v49, %v8247_v28  ;;  %p5921_p13 = pneg %p5920_p12 }
 0x486   : > { %v3176_v7 = vpop.f32.mrf.mxu1 }
 0x487   : > { %v3413_v57 = vpack.c.bf16 %v3356_v54, %v3355_v50  ;;  %v3177_v27 = vadd.f32 %v8247_v28, %v3176_v7  ;;  %v3361_v16 = vmax.f32 %v3185_v26, 0.0  ;;  %v8361_v7 = vpop.permute.xlu1 %4662  ;;  %p5928_p3 = pnand %p5927_p2, %p5921_p13 }
 0x488   : > { %v5595_v30 = vpop.f32.mrf.mxu1  ;;  %10028 = vst [vmem:[#allocation75_spill] sm:$0xff] %v8361_v7 }
 0x489   : > { %v3188_v37 = vadd.f32 %v5595_v30, %v8247_v28  ;;  %5656 = vmatprep.mubr.msk.bf16.mxu0 %vm813_vm0, %v3413_v57  ;;  %v3359_v54 = vmax.f32 %v3177_v27, 0.0 }
 0x48a   : > { %v3179_v36 = vpop.f32.mrf.mxu1  ;;  %5657 = vmatmul.mubr.msk.bf16.gmra.mxu0 %vm813_vm0, %v3414_v63  ;;  %v8366_v63 = vpop.permute.xlu0 %4660 }
 0x48b   : > { %v3180_v0 = vadd.f32 %v8247_v28, %v3179_v36  ;;  %v3362_v60 = vmax.f32 %v3188_v37, 0.0  ;;  %10029 = vst [vmem:[#allocation72_spill] sm:$0xff] %v8366_v63 }
 0x48c   : > { %v5598_v12 = vpop.f32.mrf.mxu1 }
 0x48d   : > { %v3360_v20 = vmax.f32 %v3180_v0, 0.0  ;;  %v3416_v30 = vpack.c.bf16 %v3362_v60, %v3361_v16  ;;  %v3201_v37 = vadd.f32 %v5598_v12, %v8247_v28  ;;  %v8371_v60 = vpop.permute.xlu1 %4666 }
 0x48e   : > { %v3192_v50 = vpop.f32.mrf.mxu1  ;;  %10030 = vst [vmem:[#allocation76_spill] sm:$0xff] %v8371_v60 }
 0x48f   : > { %v3415_v52 = vpack.c.bf16 %v3360_v20, %v3359_v54  ;;  %v3193_v49 = vadd.f32 %v8247_v28, %v3192_v50  ;;  %v3365_v20 = vmax.f32 %v3201_v37, 0.0 }
 0x490   : > { %v5599_v57 = vpop.f32.mrf.mxu1 }
 0x491   : > { %v3204_v5 = vadd.f32 %v5599_v57, %v8247_v28  ;;  %5660 = vmatprep.mubr.msk.bf16.mxu0 %vm813_vm0, %v3415_v52  ;;  %v3363_v0 = vmax.f32 %v3193_v49, 0.0  ;;  %v8373_v57 = vpop.permute.xlu0 %4664 }
 0x492   : > { %v3195_v36 = vpop.f32.mrf.mxu1  ;;  %5661 = vmatmul.mubr.msk.bf16.gmra.mxu0 %vm813_vm0, %v3416_v30  ;;  %10031 = vst [vmem:[#allocation73_spill] sm:$0xff] %v8373_v57  ;;  %v8377_v30 = vpop.permute.xlu1 %4670 }
 0x493   : > { %v3196_v27 = vadd.f32 %v8247_v28, %v3195_v36  ;;  %v3366_v26 = vmax.f32 %v3204_v5, 0.0  ;;  %10032 = vst [vmem:[#allocation78_spill] sm:$0xff] %v8377_v30 }
 0x495   : > { %v3364_v54 = vmax.f32 %v3196_v27, 0.0  ;;  %v3418_v52 = vpack.c.bf16 %v3366_v26, %v3365_v20  ;;  %v8382_v27 = vpop.permute.xlu0 %4668 }
 0x496   : > { %10033 = vst [vmem:[#allocation80_spill] sm:$0xff] %v8382_v27  ;;  %v8385_v57 = vpop.permute.xlu1 %4674 }
 0x497   : > { %v3417_v16 = vpack.c.bf16 %v3364_v54, %v3363_v0  ;;  %v5602_v50 = vpop.f32.mrf.mxu1  ;;  %10034 = vst [vmem:[#allocation79_spill] sm:$0xff] %v8385_v57 }
 0x498   : > { %v3217_v36 = vadd.f32 %v5602_v50, %v8247_v28 }
 0x499   : > { %v3208_v7 = vpop.f32.mrf.mxu1  ;;  %5664 = vmatprep.mubr.msk.bf16.mxu0 %vm813_vm0, %v3417_v16  ;;  %v8387_v63 = vpop.permute.xlu0 %4672 }
 0x49a   : > { %5665 = vmatmul.mubr.msk.bf16.gmra.mxu0 %vm813_vm0, %v3418_v52  ;;  %v3209_v5 = vadd.f32 %v8247_v28, %v3208_v7  ;;  %v3369_v60 = vmax.f32 %v3217_v36, 0.0  ;;  %10035 = vst [vmem:[#allocation83_spill] sm:$0xff] %v8387_v63 }
 0x49b   : > { %v5603_v12 = vpop.f32.mrf.mxu1 }
 0x49c   : > { %v3220_v49 = vadd.f32 %v5603_v12, %v8247_v28  ;;  %v3367_v20 = vmax.f32 %v3209_v5, 0.0 }
 0x49d   : > { %v3211_v37 = vpop.f32.mrf.mxu1 }
 0x49e   : > { %v3212_v0 = vadd.f32 %v8247_v28, %v3211_v37  ;;  %v3370_v26 = vmax.f32 %v3220_v49, 0.0 }
 0x49f   : > { %v5606_v54 = vpop.f32.mrf.mxu1 }
 0x4a0   : > { %v3368_v16 = vmax.f32 %v3212_v0, 0.0  ;;  %v3420_v8 = vpack.c.bf16 %v3370_v26, %v3369_v60  ;;  %v3233_v49 = vadd.f32 %v5606_v54, %v8247_v28 }
 0x4a1   : > { %v3224_v52 = vpop.f32.mrf.mxu1 }
 0x4a2   : > { %v3419_v30 = vpack.c.bf16 %v3368_v16, %v3367_v20  ;;  %v3225_v50 = vadd.f32 %v8247_v28, %v3224_v52  ;;  %v8395_v20 = vpop.permute.xlu1 %4678  ;;  %v3373_v16 = vmax.f32 %v3233_v49, 0.0  ;;  %v8397_v52 = vpop.permute.xlu0 %4676 }
 0x4a3   : > { %v5607_v7 = vpop.f32.mrf.mxu1  ;;  %10036 = vst [vmem:[#allocation81_spill] sm:$0xff] %v8395_v20  ;;  %10037 = vst [vmem:[#allocation84_spill] sm:$0xff] %v8397_v52 }
 0x4a4   : > { %v3236_v12 = vadd.f32 %v5607_v7, %v8247_v28  ;;  %5668 = vmatprep.mubr.msk.bf16.mxu0 %vm813_vm0, %v3419_v30  ;;  %v3371_v60 = vmax.f32 %v3225_v50, 0.0 }
 0x4a5   : > { %v3227_v37 = vpop.f32.mrf.mxu1  ;;  %5669 = vmatmul.mubr.msk.bf16.gmra.mxu0 %vm813_vm0, %v3420_v8 }
 0x4a6   : > { %v3228_v5 = vadd.f32 %v8247_v28, %v3227_v37  ;;  %v3374_v36 = vmax.f32 %v3236_v12, 0.0  ;;  %v8404_v50 = vpop.permute.xlu1 %4682 }
 0x4a7   : > { %v5610_v0 = vpop.f32.mrf.mxu1  ;;  %10038 = vst [vmem:[#allocation82_spill] sm:$0xff] %v8404_v50 }
 0x4a8   : > { %v3372_v26 = vmax.f32 %v3228_v5, 0.0  ;;  %v3422_v63 = vpack.c.bf16 %v3374_v36, %v3373_v16  ;;  %v3249_v8 = vadd.f32 %v5610_v0, %v8247_v28 }
 0x4a9   : > { %v3240_v57 = vpop.f32.mrf.mxu1 }
 0x4aa   : > { %v3421_v7 = vpack.c.bf16 %v3372_v26, %v3371_v60  ;;  %v3241_v54 = vadd.f32 %v8247_v28, %v3240_v57  ;;  %v8407_v60 = vpop.permute.xlu0 %4680  ;;  %v3377_v57 = vmax.f32 %v3249_v8, 0.0  ;;  %v8409_v52 = vpop.permute.xlu1 %4686 }
 0x4ab   : > { %v5611_v30 = vpop.f32.mrf.mxu1  ;;  %10039 = vst [vmem:[#allocation86_spill] sm:$0xff] %v8407_v60  ;;  %10040 = vst [vmem:[#allocation85_spill] sm:$0xff] %v8409_v52 }
 0x4ac   : > { %v3252_v27 = vadd.f32 %v5611_v30, %v8247_v28  ;;  %5672 = vmatprep.mubr.msk.bf16.mxu0 %vm813_vm0, %v3421_v7  ;;  %v3375_v36 = vmax.f32 %v3241_v54, 0.0 }
 0x4ad   : > { %v3243_v12 = vpop.f32.mrf.mxu1  ;;  %5673 = vmatmul.mubr.msk.bf16.gmra.mxu0 %vm813_vm0, %v3422_v63 }
 0x4ae   : > { %v3244_v49 = vadd.f32 %v8247_v28, %v3243_v12  ;;  %v3378_v37 = vmax.f32 %v3252_v27, 0.0  ;;  %v8416_v54 = vpop.permute.xlu0 %4684 }
 0x4af   : > { %v5614_v5 = vpop.f32.mrf.mxu1  ;;  %10041 = vst [vmem:[#allocation87_spill] sm:$0xff] %v8416_v54 }
 0x4b0   : > { %v3376_v26 = vmax.f32 %v3244_v49, 0.0  ;;  %v3424_v20 = vpack.c.bf16 %v3378_v37, %v3377_v57  ;;  %v3265_v27 = vadd.f32 %v5614_v5, %v8247_v28 }
 0x4b1   : > { %v3256_v16 = vpop.f32.mrf.mxu1 }
 0x4b2   : > { %v3423_v30 = vpack.c.bf16 %v3376_v26, %v3375_v36  ;;  %v3257_v0 = vadd.f32 %v8247_v28, %v3256_v16  ;;  %v3381_v57 = vmax.f32 %v3265_v27, 0.0  ;;  %v8419_v16 = vpop.permute.xlu1 %4690  ;;  %v8421_v60 = vpop.permute.xlu0 %4688 }
 0x4b3   : > { %v5615_v7 = vpop.f32.mrf.mxu1  ;;  %10042 = vst [vmem:[#allocation88_spill] sm:$0xff] %v8419_v16  ;;  %10043 = vst [vmem:[#allocation89_spill] sm:$0xff] %v8421_v60 }
 0x4b4   : > { %v3268_v63 = vadd.f32 %v5615_v7, %v8247_v28  ;;  %5676 = vmatprep.mubr.msk.bf16.mxu0 %vm813_vm0, %v3423_v30  ;;  %v3379_v36 = vmax.f32 %v3257_v0, 0.0 }
 0x4b5   : > { %v3259_v12 = vpop.f32.mrf.mxu1  ;;  %5677 = vmatmul.mubr.msk.bf16.gmra.mxu0 %vm813_vm0, %v3424_v20 }
 0x4b6   : > { %v3260_v8 = vadd.f32 %v8247_v28, %v3259_v12  ;;  %v3382_v49 = vmax.f32 %v3268_v63, 0.0 }
 0x4b7   : > { %v5618_v37 = vpop.f32.mrf.mxu1 }
 0x4b8   : > { %v3380_v26 = vmax.f32 %v3260_v8, 0.0  ;;  %v3426_v52 = vpack.c.bf16 %v3382_v49, %v3381_v57  ;;  %v3281_v63 = vadd.f32 %v5618_v37, %v8247_v28 }
 0x4b9   : > { %v3272_v50 = vpop.f32.mrf.mxu1 }
 0x4ba   : > { %v3425_v7 = vpack.c.bf16 %v3380_v26, %v3379_v36  ;;  %v3273_v5 = vadd.f32 %v8247_v28, %v3272_v50  ;;  %v8429_v36 = vpop.permute.xlu1 %4694  ;;  %v3385_v57 = vmax.f32 %v3281_v63, 0.0  ;;  %v8431_v50 = vpop.permute.xlu0 %4692 }
 0x4bb   : > { %v5619_v30 = vpop.f32.mrf.mxu1  ;;  %10044 = vst [vmem:[#allocation93_spill] sm:$0xff] %v8429_v36  ;;  %10045 = vst [vmem:[#allocation90_spill] sm:$0xff] %v8431_v50 }
 0x4bc   : > { %v3284_v20 = vadd.f32 %v5619_v30, %v8247_v28  ;;  %5680 = vmatprep.mubr.msk.bf16.mxu0 %vm813_vm0, %v3425_v7  ;;  %v3383_v49 = vmax.f32 %v3273_v5, 0.0 }
 0x4bd   : > { %v3275_v12 = vpop.f32.mrf.mxu1  ;;  %5681 = vmatmul.mubr.msk.bf16.gmra.mxu0 %vm813_vm0, %v3426_v52 }
 0x4be   : > { %v3276_v0 = vadd.f32 %v8247_v28, %v3275_v12  ;;  %v3386_v27 = vmax.f32 %v3284_v20, 0.0  ;;  %v8438_v5 = vpop.permute.xlu1 %4698 }
 0x4bf   : > { %v5622_v8 = vpop.f32.mrf.mxu1  ;;  %10046 = vst [vmem:[#allocation91_spill] sm:$0xff] %v8438_v5 }
 0x4c0   : > { %v3384_v26 = vmax.f32 %v3276_v0, 0.0  ;;  %v3428_v60 = vpack.c.bf16 %v3386_v27, %v3385_v57  ;;  %v3297_v52 = vadd.f32 %v5622_v8, %v8247_v28 }
 0x4c1   : > { %v3288_v16 = vpop.f32.mrf.mxu1 }
 0x4c2   : > { %v3427_v30 = vpack.c.bf16 %v3384_v26, %v3383_v49  ;;  %v3289_v37 = vadd.f32 %v8247_v28, %v3288_v16  ;;  %v8441_v49 = vpop.permute.xlu0 %4696  ;;  %v3389_v16 = vmax.f32 %v3297_v52, 0.0  ;;  %v8443_v50 = vpop.permute.xlu1 %4702 }
 0x4c3   : > { %v5623_v7 = vpop.f32.mrf.mxu1  ;;  %10047 = vst [vmem:[#allocation92_spill] sm:$0xff] %v8441_v49  ;;  %10048 = vst [vmem:[#allocation97_spill] sm:$0xff] %v8443_v50 }
 0x4c4   : > { %v3300_v54 = vadd.f32 %v5623_v7, %v8247_v28  ;;  %5684 = vmatprep.mubr.msk.bf16.mxu0 %vm813_vm0, %v3427_v30  ;;  %v3387_v27 = vmax.f32 %v3289_v37, 0.0 }
 0x4c5   : > { %v3291_v20 = vpop.f32.mrf.mxu1  ;;  %5685 = vmatmul.mubr.msk.bf16.gmra.mxu0 %vm813_vm0, %v3428_v60 }
 0x4c6   : > { %v3292_v63 = vadd.f32 %v8247_v28, %v3291_v20  ;;  %v3390_v12 = vmax.f32 %v3300_v54, 0.0  ;;  %v8450_v37 = vpop.permute.xlu0 %4700 }
 0x4c7   : > { %v5626_v0 = vpop.f32.mrf.mxu1  ;;  %10049 = vst [vmem:[#allocation94_spill] sm:$0xff] %v8450_v37 }
 0x4c8   : > { %v3388_v26 = vmax.f32 %v3292_v63, 0.0  ;;  %v3430_v36 = vpack.c.bf16 %v3390_v12, %v3389_v16  ;;  %v3313_v54 = vadd.f32 %v5626_v0, %v8247_v28  ;;  %v8453_v16 = vpop.permute.xlu1 %4706 }
 0x4c9   : > { %v3304_v57 = vpop.f32.mrf.mxu1  ;;  %10050 = vst [vmem:[#allocation95_spill] sm:$0xff] %v8453_v16 }
 0x4ca   : > { %v3429_v7 = vpack.c.bf16 %v3388_v26, %v3387_v27  ;;  %v3305_v8 = vadd.f32 %v8247_v28, %v3304_v57  ;;  %v3393_v26 = vmax.f32 %v3313_v54, 0.0 }
 0x4cb   : > { %v5627_v30 = vpop.f32.mrf.mxu1 }
 0x4cc   : > { %v3316_v60 = vadd.f32 %v5627_v30, %v8247_v28  ;;  %5688 = vmatprep.mubr.msk.bf16.mxu0 %vm813_vm0, %v3429_v7  ;;  %v3391_v12 = vmax.f32 %v3305_v8, 0.0  ;;  %v8455_v30 = vpop.permute.xlu0 %4704  ;;  %v8459_v0 = vpop.permute.xlu1 %4710 }
 0x4cd   : > { %v3307_v20 = vpop.f32.mrf.mxu1  ;;  %5689 = vmatmul.mubr.msk.bf16.gmra.mxu0 %vm813_vm0, %v3430_v36  ;;  %10051 = vst [vmem:[#allocation96_spill] sm:$0xff] %v8455_v30  ;;  %10052 = vst [vmem:[#allocation98_spill] sm:$0xff] %v8459_v0 }
 0x4ce   : > { %v3308_v52 = vadd.f32 %v8247_v28, %v3307_v20  ;;  %v3394_v63 = vmax.f32 %v3316_v60, 0.0 }
 0x4d0   : > { %v3392_v27 = vmax.f32 %v3308_v52, 0.0  ;;  %v3432_v5 = vpack.c.bf16 %v3394_v63, %v3393_v26  ;;  %v8461_v36 = vpop.permute.xlu0 %4708  ;;  %v8463_v7 = vpop.permute.xlu1 %4714 }
 0x4d1   : > { %10053 = vst [vmem:[#allocation99_spill] sm:$0xff] %v8461_v36  ;;  %10054 = vst [vmem:[#allocation100_spill] sm:$0xff] %v8463_v7 }
 0x4d2   : > { %v3431_v57 = vpack.c.bf16 %v3392_v27, %v3391_v12 }
 0x4d4   : > { %5692 = vmatprep.mubr.msk.bf16.mxu0 %vm813_vm0, %v3431_v57  ;;  %v8465_v60 = vpop.permute.xlu0 %4712  ;;  %v8467_v8 = vpop.permute.xlu1 %4718 }
 0x4d5   : > { %5693 = vmatmul.mubr.msk.bf16.gmra.mxu0 %vm813_vm0, %v3432_v5  ;;  %10055 = vst [vmem:[#allocation104_spill] sm:$0xff] %v8465_v60  ;;  %10056 = vst [vmem:[#allocation101_spill] sm:$0xff] %v8467_v8 }
 0x4d8   : > { %v8469_v54 = vpop.permute.xlu0 %4716  ;;  %v8471_v20 = vpop.permute.xlu1 %4722 }
 0x4d9   : > { %10057 = vst [vmem:[#allocation102_spill] sm:$0xff] %v8469_v54  ;;  %10058 = vst [vmem:[#allocation103_spill] sm:$0xff] %v8471_v20 }
 0x4dc   : > { %v8473_v52 = vpop.permute.xlu0 %4720  ;;  %v8475_v63 = vpop.permute.xlu1 %4726 }
 0x4dd   : > { %10059 = vst [vmem:[#allocation108_spill] sm:$0xff] %v8473_v52  ;;  %10060 = vst [vmem:[#allocation105_spill] sm:$0xff] %v8475_v63 }
 0x4e0   : > { %v8477_v12 = vpop.permute.xlu0 %4724  ;;  %v8479_v5 = vpop.permute.xlu1 %4730 }
 0x4e1   : > { %10061 = vst [vmem:[#allocation106_spill] sm:$0xff] %v8477_v12  ;;  %10062 = vst [vmem:[#allocation107_spill] sm:$0xff] %v8479_v5 }
 0x4e4   : > { %v8481_v27 = vpop.permute.xlu0 %4728  ;;  %v8483_v26 = vpop.permute.xlu1 %3980 }
 0x4e5   : > { %10063 = vst [vmem:[#allocation110_spill] sm:$0xff] %v8481_v27 }
 0x4e8   : > { %v8485_v57 = vpop.permute.xlu0 %3974  ;;  %v8487_v7 = vpop.permute.xlu1 %3976 }
 0x4ec   : > { %v8489_v8 = vpop.permute.xlu0 %3986  ;;  %v8491_v54 = vpop.permute.xlu1 %3988 }
 0x4f0   : > { %v8495_v5 = vpop.permute.xlu0 %3982  ;;  %v8499_v49 = vpop.permute.xlu1 %3984 }
 0x4f4   : > { %v8501_v46 = vpop.permute.xlu0 %3994 }
 0x504   : > { %v5630_v60 = vpop.f32.mrf.mxu1 }
 0x505   : > { %v3329_v27 = vadd.f32 %v5630_v60, %v8247_v28  ;;  %v8505_v60 = vpop.permute.xlu1 %3996 }
 0x506   : > { %v3320_v20 = vpop.f32.mrf.mxu1 }
 0x507   : > { %v3321_v63 = vadd.f32 %v8247_v28, %v3320_v20  ;;  %v3397_v37 = vmax.f32 %v3329_v27, 0.0 }
 0x508   : > { %v5631_v52 = vpop.f32.mrf.mxu1 }
 0x509   : > { %v3332_v12 = vadd.f32 %v5631_v52, %v8247_v28  ;;  %v3395_v36 = vmax.f32 %v3321_v63, 0.0  ;;  %v8507_v52 = vpop.permute.xlu0 %3990 }
 0x50a   : > { %v3323_v16 = vpop.f32.mrf.mxu1 }
 0x50b   : > { %v3324_v0 = vadd.f32 %v8247_v28, %v3323_v16  ;;  %v3398_v30 = vmax.f32 %v3332_v12, 0.0  ;;  %v8509_v28 = vpop.permute.xlu1 %3992 }
 0x50d   : > { %v3396_v50 = vmax.f32 %v3324_v0, 0.0  ;;  %v3434_v20 = vpack.c.bf16 %v3398_v30, %v3397_v37  ;;  %v8511_v16 = vpop.permute.xlu0 %4002 }
 0x50f   : > { %v3433_v25 = vpack.c.bf16 %v3396_v50, %v3395_v36  ;;  %v8516_v0 = vpop.permute.xlu1 %4004  ;;  %v8521_v50 = vld [vmem:[%s9575_s2 + $0x5] ss:$0 sm:$0xff] }
 0x511   : > { %5696 = vmatprep.mubr.msk.bf16.mxu0 %vm813_vm0, %v3433_v25  ;;  %v8523_v25 = vpop.permute.xlu0 %3998 }
 0x512   : > { %5697 = vmatmul.mubr.msk.bf16.gmra.mxu0 %vm813_vm0, %v3434_v20 }
 0x513   : > { %v8531_v12 = vpop.permute.xlu1 %4000 }
 0x522   : > { %v5638_v37 = vpop.f32.mrf.mxu0 }
 0x523   : > { %v3591_v30 = vadd.f32 %v5638_v37, %v8521_v50  ;;  %v8542_v37 = vpop.permute.xlu0 %4010 }
 0x524   : > { %v3582_v36 = vpop.f32.mrf.mxu0 }
 0x525   : > { %3840 = vst.msk [vmem:[%s8526_s7 + $0x10] sm:$0xff] %vm3837_vm3, %v3591_v30  ;;  %v3583_v63 = vadd.f32 %v8521_v50, %v3582_v36  ;;  %v5985_v30 = vmov 0.0  }
 0x526   : > { %4161 = vst.msk [vmem:[%s8526_s7 + $0x10] sm:$0xff] %vm4158_vm4, %v7756_v42  ;;  %v5639_v27 = vpop.f32.mrf.mxu0 }
 0x527   : > { %4482 = vst.msk [vmem:[%s8526_s7 + $0x10] sm:$0xff] %vm4479_vm5, %v7781_v6  ;;  %v3594_v20 = vadd.f32 %v5639_v27, %v8521_v50  ;;  %v10069_v27 = vld [vmem:[#allocation77_spill] sm:$0xff] }
 0x528   : > { %3838 = vst.msk [vmem:[%s8526_s7] sm:$0xff] %vm3837_vm3, %v3583_v63  ;;  %v3585_v42 = vpop.f32.mrf.mxu0  ;;  %v10068_v63 = vld [vmem:[#allocation65_spill] sm:$0xff] }
 0x529   : > { %4803 = vst.msk [vmem:[%s8526_s7 + $0x10] sm:$0xff] %vm4800_vm6, %v8204_v41  ;;  %v3586_v6 = vadd.f32 %v8521_v50, %v3585_v42  ;;  %v8591_v41 = vpop.permute.xlu0 %4006  ;;  %v10070_v42 = vld [vmem:[#allocation61_spill] sm:$0xff] }
 0x52a   : > { %4159 = vst.msk [vmem:[%s8526_s7] sm:$0xff] %vm4158_vm4, %v7740_v11  ;;  %v5642_v11 = vpop.f32.mrf.mxu0 }
 0x52b   : > { %4868 = vst.msk [vmem:[%s8526_s7 + $0x10] sm:$0xff] %vm4865_vm7, %v5985_v30 }
 0x52c   : > { %4480 = vst.msk [vmem:[%s8526_s7] sm:$0xff] %vm4479_vm5, %v7773_v58  ;;  %v3607_v58 = vadd.f32 %v5642_v11, %v8521_v50  ;;  %v10071_v11 = vld [vmem:[#allocation8_spill] sm:$0xff] }
 0x52d   : > { %3841 = vst.msk [vmem:[%s8526_s7 + $0x18] sm:$0xff] %vm3837_vm3, %v3594_v20  ;;  %3839 = vst.msk [vmem:[%s8526_s7 + $0x8] sm:$0xff] %vm3837_vm3, %v3586_v6 }
 0x52e   : > { %4801 = vst.msk [vmem:[%s8526_s7] sm:$0xff] %vm4800_vm6, %v8190_v15  ;;  %v8574_v15 = vpop.permute.xlu1 %4012 }
 0x52f   : > { %4162 = vst.msk [vmem:[%s8526_s7 + $0x18] sm:$0xff] %vm4158_vm4, %v7763_v13  ;;  %4160 = vst.msk [vmem:[%s8526_s7 + $0x8] sm:$0xff] %vm4158_vm4, %v7754_v17  ;;  %v3598_v13 = vpop.f32.mrf.mxu0 }
 0x530   : > { %4866 = vst.msk [vmem:[%s8526_s7] sm:$0xff] %vm4865_vm7, %v5985_v30 }
 0x531   : > { %4483 = vst.msk [vmem:[%s8526_s7 + $0x18] sm:$0xff] %vm4479_vm5, %v7779_v45  ;;  %4481 = vst.msk [vmem:[%s8526_s7 + $0x8] sm:$0xff] %vm4479_vm5, %v7771_v33  ;;  %v3599_v45 = vadd.f32 %v8521_v50, %v3598_v13  ;;  %v5643_v17 = vpop.f32.mrf.mxu0  ;;  %v10072_v13 = vld [vmem:[#allocation69_spill] sm:$0xff] }
 0x532   : > { %4804 = vst.msk [vmem:[%s8526_s7 + $0x18] sm:$0xff] %vm4800_vm6, %v8199_v21  ;;  %4802 = vst.msk [vmem:[%s8526_s7 + $0x8] sm:$0xff] %vm4800_vm6, %v8184_v32  ;;  %v3610_v33 = vadd.f32 %v5643_v17, %v8521_v50  ;;  %v8623_v21 = vpop.permute.xlu1 %4008 }
 0x533   : > { %4869 = vst.msk [vmem:[%s8526_s7 + $0x18] sm:$0xff] %vm4865_vm7, %v5985_v30  ;;  %4867 = vst.msk [vmem:[%s8526_s7 + $0x8] sm:$0xff] %vm4865_vm7, %v5985_v30 }
 0x534   : > { %3844 = vst.msk [vmem:[%s8526_s7 + $0x30] sm:$0xff] %vm3837_vm3, %v3607_v58  ;;  %3842 = vst.msk [vmem:[%s8526_s7 + $0x20] sm:$0xff] %vm3837_vm3, %v3599_v45  ;;  %v10073_v45 = vld [vmem:[#allocation70_spill] sm:$0xff] }
 0x535   : > { %4165 = vst.msk [vmem:[%s8526_s7 + $0x30] sm:$0xff] %vm4158_vm4, %v7765_v39  ;;  %4163 = vst.msk [vmem:[%s8526_s7 + $0x20] sm:$0xff] %vm4158_vm4, %v8485_v57  ;;  %v3601_v39 = vpop.f32.mrf.mxu0 }
 0x536   : > { %4486 = vst.msk [vmem:[%s8526_s7 + $0x30] sm:$0xff] %vm4479_vm5, %v7809_v44  ;;  %4484 = vst.msk [vmem:[%s8526_s7 + $0x20] sm:$0xff] %vm4479_vm5, %v7789_v2  ;;  %v3602_v44 = vadd.f32 %v8521_v50, %v3601_v39 }
 0x537   : > { %4807 = vst.msk [vmem:[%s8526_s7 + $0x30] sm:$0xff] %vm4800_vm6, %v8226_v61  ;;  %4805 = vst.msk [vmem:[%s8526_s7 + $0x20] sm:$0xff] %vm4800_vm6, %v8216_v55  ;;  %v5646_v32 = vpop.f32.mrf.mxu0  ;;  %v8640_v61 = vpop.permute.xlu0 %4018 }
 0x538   : > { %4872 = vst.msk [vmem:[%s8526_s7 + $0x30] sm:$0xff] %vm4865_vm7, %v5985_v30  ;;  %4870 = vst.msk [vmem:[%s8526_s7 + $0x20] sm:$0xff] %vm4865_vm7, %v5985_v30  ;;  %v3623_v2 = vadd.f32 %v5646_v32, %v8521_v50 }
 0x539   : > { %3845 = vst.msk [vmem:[%s8526_s7 + $0x38] sm:$0xff] %vm3837_vm3, %v3610_v33  ;;  %3843 = vst.msk [vmem:[%s8526_s7 + $0x28] sm:$0xff] %vm3837_vm3, %v3602_v44  ;;  %v3614_v55 = vpop.f32.mrf.mxu0  ;;  %v10074_v33 = vld [vmem:[#allocation64_spill] sm:$0xff]  ;;  %v10075_v44 = vld [vmem:[#allocation10_spill] sm:$0xff] }
 0x53a   : > { %4166 = vst.msk [vmem:[%s8526_s7 + $0x38] sm:$0xff] %vm4158_vm4, %v8483_v26  ;;  %4164 = vst.msk [vmem:[%s8526_s7 + $0x28] sm:$0xff] %vm4158_vm4, %v8487_v7  ;;  %v10064_v26 = vld [vmem:[#allocation66_spill] sm:$0xff] }
 0x53b   : > { %4487 = vst.msk [vmem:[%s8526_s7 + $0x38] sm:$0xff] %vm4479_vm5, %v7800_v43  ;;  %4485 = vst.msk [vmem:[%s8526_s7 + $0x28] sm:$0xff] %vm4479_vm5, %v7787_v34  ;;  %v3615_v43 = vadd.f32 %v8521_v50, %v3614_v55  ;;  %v10077_v55 = vld [vmem:[#allocation5_spill] sm:$0xff] }
 0x53c   : > { %4808 = vst.msk [vmem:[%s8526_s7 + $0x38] sm:$0xff] %vm4800_vm6, %v8222_v31  ;;  %4806 = vst.msk [vmem:[%s8526_s7 + $0x28] sm:$0xff] %vm4800_vm6, %v8208_v35  ;;  %v5647_v31 = vpop.f32.mrf.mxu0  ;;  %v8672_v35 = vpop.permute.xlu1 %4020 }
 0x53d   : > { %4873 = vst.msk [vmem:[%s8526_s7 + $0x38] sm:$0xff] %vm4865_vm7, %v5985_v30  ;;  %4871 = vst.msk [vmem:[%s8526_s7 + $0x28] sm:$0xff] %vm4865_vm7, %v5985_v30  ;;  %v3626_v34 = vadd.f32 %v5647_v31, %v8521_v50  ;;  %v10078_v31 = vld [vmem:[#allocation67_spill] sm:$0xff] }
 0x53e   : > { %3848 = vst.msk [vmem:[%s8526_s7 + $0x50] sm:$0xff] %vm3837_vm3, %v3623_v2  ;;  %3846 = vst.msk [vmem:[%s8526_s7 + $0x40] sm:$0xff] %vm3837_vm3, %v3615_v43  ;;  %v3617_v7 = vpop.f32.mrf.mxu0  ;;  %v10076_v2 = vld [vmem:[#allocation72_spill] sm:$0xff] }
 0x53f   : > { %4169 = vst.msk [vmem:[%s8526_s7 + $0x50] sm:$0xff] %vm4158_vm4, %v8489_v8  ;;  %4167 = vst.msk [vmem:[%s8526_s7 + $0x40] sm:$0xff] %vm4158_vm4, %v8495_v5  ;;  %v8689_v8 = vpop.permute.xlu0 %4014 }
 0x540   : > { %4490 = vst.msk [vmem:[%s8526_s7 + $0x50] sm:$0xff] %vm4479_vm5, %v7834_v29  ;;  %4488 = vst.msk [vmem:[%s8526_s7 + $0x40] sm:$0xff] %vm4479_vm5, %v7818_v3  ;;  %v3618_v29 = vadd.f32 %v8521_v50, %v3617_v7  ;;  %v10079_v7 = vld [vmem:[#allocation12_spill] sm:$0xff] }
 0x541   : > { %4811 = vst.msk [vmem:[%s8526_s7 + $0x50] sm:$0xff] %vm4800_vm6, %v8251_v18  ;;  %4809 = vst.msk [vmem:[%s8526_s7 + $0x40] sm:$0xff] %vm4800_vm6, %v8236_v1  ;;  %v5650_v18 = vpop.f32.mrf.mxu0 }
 0x542   : > { %4876 = vst.msk [vmem:[%s8526_s7 + $0x50] sm:$0xff] %vm4865_vm7, %v5985_v30  ;;  %4874 = vst.msk [vmem:[%s8526_s7 + $0x40] sm:$0xff] %vm4865_vm7, %v5985_v30  ;;  %v3639_v3 = vadd.f32 %v5650_v18, %v8521_v50  ;;  %v10080_v18 = vld [vmem:[#allocation75_spill] sm:$0xff] }
 0x543   : > { %3849 = vst.msk [vmem:[%s8526_s7 + $0x58] sm:$0xff] %vm3837_vm3, %v3626_v34  ;;  %3847 = vst.msk [vmem:[%s8526_s7 + $0x48] sm:$0xff] %vm3837_vm3, %v3618_v29  ;;  %v3630_v1 = vpop.f32.mrf.mxu0 }
 0x544   : > { %4170 = vst.msk [vmem:[%s8526_s7 + $0x58] sm:$0xff] %vm4158_vm4, %v8491_v54  ;;  %4168 = vst.msk [vmem:[%s8526_s7 + $0x48] sm:$0xff] %vm4158_vm4, %v8499_v49  ;;  %v8738_v54 = vpop.permute.xlu0 %4026 }
 0x545   : > { %4491 = vst.msk [vmem:[%s8526_s7 + $0x58] sm:$0xff] %vm4479_vm5, %v7829_v19  ;;  %4489 = vst.msk [vmem:[%s8526_s7 + $0x48] sm:$0xff] %vm4479_vm5, %v7812_v40  ;;  %v3631_v19 = vadd.f32 %v8521_v50, %v3630_v1  ;;  %v5651_v49 = vpop.f32.mrf.mxu0 }
 0x546   : > { %4812 = vst.msk [vmem:[%s8526_s7 + $0x58] sm:$0xff] %vm4800_vm6, %v8242_v24  ;;  %v8721_v24 = vpop.permute.xlu1 %4016  ;;  %4810 = vst.msk [vmem:[%s8526_s7 + $0x48] sm:$0xff] %vm4800_vm6, %v8230_v53  ;;  %v3642_v40 = vadd.f32 %v5651_v49, %v8521_v50  ;;  %v10082_v49 = vld [vmem:[#allocation71_spill] sm:$0xff] }
 0x547   : > { %4877 = vst.msk [vmem:[%s8526_s7 + $0x58] sm:$0xff] %vm4865_vm7, %v5985_v30  ;;  %4875 = vst.msk [vmem:[%s8526_s7 + $0x48] sm:$0xff] %vm4865_vm7, %v5985_v30  ;;  %v3633_v53 = vpop.f32.mrf.mxu0 }
 0x548   : > { %3852 = vst.msk [vmem:[%s8526_s7 + $0x70] sm:$0xff] %vm3837_vm3, %v3639_v3  ;;  %3850 = vst.msk [vmem:[%s8526_s7 + $0x60] sm:$0xff] %vm3837_vm3, %v3631_v19  ;;  %v8787_v5 = vpop.permute.xlu0 %4022  ;;  %v10081_v3 = vld [vmem:[#allocation7_spill] sm:$0xff] }
 0x549   : > { %4173 = vst.msk [vmem:[%s8526_s7 + $0x70] sm:$0xff] %vm4158_vm4, %v8501_v46  ;;  %4171 = vst.msk [vmem:[%s8526_s7 + $0x60] sm:$0xff] %vm4158_vm4, %v8507_v52 }
 0x54a   : > { %4494 = vst.msk [vmem:[%s8526_s7 + $0x70] sm:$0xff] %vm4479_vm5, %v7866_v22  ;;  %4492 = vst.msk [vmem:[%s8526_s7 + $0x60] sm:$0xff] %vm4479_vm5, %v7853_v23  ;;  %v3634_v22 = vadd.f32 %v8521_v50, %v3633_v53 }
 0x54b   : > { %4815 = vst.msk [vmem:[%s8526_s7 + $0x70] sm:$0xff] %vm4800_vm6, %v8281_v51  ;;  %4813 = vst.msk [vmem:[%s8526_s7 + $0x60] sm:$0xff] %vm4800_vm6, %v8265_v14  ;;  %v5654_v51 = vpop.f32.mrf.mxu0  ;;  %v8770_v14 = vpop.permute.xlu1 %4028 }
 0x54c   : > { %4880 = vst.msk [vmem:[%s8526_s7 + $0x70] sm:$0xff] %vm4865_vm7, %v5985_v30  ;;  %4878 = vst.msk [vmem:[%s8526_s7 + $0x60] sm:$0xff] %vm4865_vm7, %v5985_v30  ;;  %v3655_v23 = vadd.f32 %v5654_v51, %v8521_v50  ;;  %v10085_v51 = vld [vmem:[#allocation9_spill] sm:$0xff] }
 0x54d   : > { %3853 = vst.msk [vmem:[%s8526_s7 + $0x78] sm:$0xff] %vm3837_vm3, %v3642_v40  ;;  %3851 = vst.msk [vmem:[%s8526_s7 + $0x68] sm:$0xff] %vm3837_vm3, %v3634_v22  ;;  %v3646_v46 = vpop.f32.mrf.mxu0  ;;  %v10083_v40 = vld [vmem:[#allocation14_spill] sm:$0xff]  ;;  %v10084_v22 = vld [vmem:[#allocation80_spill] sm:$0xff] }
 0x54e   : > { %4174 = vst.msk [vmem:[%s8526_s7 + $0x78] sm:$0xff] %vm4158_vm4, %v8505_v60  ;;  %4172 = vst.msk [vmem:[%s8526_s7 + $0x68] sm:$0xff] %vm4158_vm4, %v8509_v28  ;;  %v10065_v60 = vld [vmem:[#allocation74_spill] sm:$0xff]  ;;  %v8836_v28 = vpop.permute.xlu0 %4034 }
 0x54f   : > { %4495 = vst.msk [vmem:[%s8526_s7 + $0x78] sm:$0xff] %vm4479_vm5, %v7859_v56  ;;  %4493 = vst.msk [vmem:[%s8526_s7 + $0x68] sm:$0xff] %vm4479_vm5, %v7841_v59  ;;  %v3647_v56 = vadd.f32 %v8521_v50, %v3646_v46 }
 0x550   : > { %4816 = vst.msk [vmem:[%s8526_s7 + $0x78] sm:$0xff] %vm4800_vm6, %v8271_v4  ;;  %4814 = vst.msk [vmem:[%s8526_s7 + $0x68] sm:$0xff] %vm4800_vm6, %v8258_v48  ;;  %v5655_v4 = vpop.f32.mrf.mxu0 }
 0x551   : > { %4881 = vst.msk [vmem:[%s8526_s7 + $0x78] sm:$0xff] %vm4865_vm7, %v5985_v30  ;;  %4879 = vst.msk [vmem:[%s8526_s7 + $0x68] sm:$0xff] %vm4865_vm7, %v5985_v30  ;;  %v3658_v59 = vadd.f32 %v5655_v4, %v8521_v50 }
 0x552   : > { %3856 = vst.msk [vmem:[%s8526_s7 + $0x90] sm:$0xff] %vm3837_vm3, %v3655_v23  ;;  %3854 = vst.msk [vmem:[%s8526_s7 + $0x80] sm:$0xff] %vm3837_vm3, %v3647_v56  ;;  %v3649_v48 = vpop.f32.mrf.mxu0  ;;  %v10086_v56 = vld [vmem:[#allocation73_spill] sm:$0xff] }
 0x553   : > { %4177 = vst.msk [vmem:[%s8526_s7 + $0x90] sm:$0xff] %vm4158_vm4, %v8511_v16  ;;  %4175 = vst.msk [vmem:[%s8526_s7 + $0x80] sm:$0xff] %vm4158_vm4, %v8523_v25  ;;  %v10066_v16 = vld [vmem:[#allocation63_spill] sm:$0xff]  ;;  %v10067_v25 = vld [vmem:[#allocation6_spill] sm:$0xff] }
 0x554   : > { %4498 = vst.msk [vmem:[%s8526_s7 + $0x90] sm:$0xff] %vm4479_vm5, %v7895_v10  ;;  %4496 = vst.msk [vmem:[%s8526_s7 + $0x80] sm:$0xff] %vm4479_vm5, %v10064_v26  ;;  %v3650_v10 = vadd.f32 %v8521_v50, %v3649_v48  ;;  %v5658_v57 = vpop.f32.mrf.mxu0  ;;  %v10090_v26 = vld [vmem:[#allocation76_spill] sm:$0xff] }
 0x555   : > { %4819 = vst.msk [vmem:[%s8526_s7 + $0x90] sm:$0xff] %vm4800_vm6, %v8307_v38  ;;  %v8819_v38 = vpop.permute.xlu1 %4024  ;;  %4817 = vst.msk [vmem:[%s8526_s7 + $0x80] sm:$0xff] %vm4800_vm6, %v8294_v62  ;;  %v3671_v52 = vadd.f32 %v5658_v57, %v8521_v50 }
 0x556   : > { %4884 = vst.msk [vmem:[%s8526_s7 + $0x90] sm:$0xff] %vm4865_vm7, %v5985_v30  ;;  %4882 = vst.msk [vmem:[%s8526_s7 + $0x80] sm:$0xff] %vm4865_vm7, %v5985_v30  ;;  %v3662_v62 = vpop.f32.mrf.mxu0 }
 0x557   : > { %3857 = vst.msk [vmem:[%s8526_s7 + $0x98] sm:$0xff] %vm3837_vm3, %v3658_v59  ;;  %3855 = vst.msk [vmem:[%s8526_s7 + $0x88] sm:$0xff] %vm3837_vm3, %v3650_v10  ;;  %v10088_v59 = vld [vmem:[#allocation78_spill] sm:$0xff] }
 0x558   : > { %4178 = vst.msk [vmem:[%s8526_s7 + $0x98] sm:$0xff] %vm4158_vm4, %v8516_v0  ;;  %4176 = vst.msk [vmem:[%s8526_s7 + $0x88] sm:$0xff] %vm4158_vm4, %v8531_v12  ;;  %v3663_v0 = vadd.f32 %v8521_v50, %v3662_v62 }
 0x559   : > { %4499 = vst.msk [vmem:[%s8526_s7 + $0x98] sm:$0xff] %vm4479_vm5, %v10065_v60  ;;  %4497 = vst.msk [vmem:[%s8526_s7 + $0x88] sm:$0xff] %vm4479_vm5, %v10066_v16  ;;  %v10091_v16 = vld [vmem:[#allocation18_spill] sm:$0xff] }
 0x55a   : > { %4820 = vst.msk [vmem:[%s8526_s7 + $0x98] sm:$0xff] %vm4800_vm6, %v8303_v9  ;;  %4818 = vst.msk [vmem:[%s8526_s7 + $0x88] sm:$0xff] %vm4800_vm6, %v8285_v47  ;;  %v5659_v9 = vpop.f32.mrf.mxu0  ;;  %v8868_v47 = vpop.permute.xlu1 %4036 }
 0x55b   : > { %4885 = vst.msk [vmem:[%s8526_s7 + $0x98] sm:$0xff] %vm4865_vm7, %v5985_v30  ;;  %4883 = vst.msk [vmem:[%s8526_s7 + $0x88] sm:$0xff] %vm4865_vm7, %v5985_v30  ;;  %v3674_v36 = vadd.f32 %v5659_v9, %v8521_v50  ;;  %v10092_v9 = vld [vmem:[#allocation84_spill] sm:$0xff] }
 0x55c   : > { %3860 = vst.msk [vmem:[%s8526_s7 + $0xb0] sm:$0xff] %vm3837_vm3, %v3671_v52  ;;  %3858 = vst.msk [vmem:[%s8526_s7 + $0xa0] sm:$0xff] %vm3837_vm3, %v3663_v0  ;;  %v3665_v12 = vpop.f32.mrf.mxu0 }
 0x55d   : > { %4181 = vst.msk [vmem:[%s8526_s7 + $0xb0] sm:$0xff] %vm4158_vm4, %v8542_v37  ;;  %4179 = vst.msk [vmem:[%s8526_s7 + $0xa0] sm:$0xff] %vm4158_vm4, %v8591_v41  ;;  %v3666_v20 = vadd.f32 %v8521_v50, %v3665_v12  ;;  %v8885_v37 = vpop.permute.xlu0 %4030 }
 0x55e   : > { %4502 = vst.msk [vmem:[%s8526_s7 + $0xb0] sm:$0xff] %vm4479_vm5, %v10067_v25  ;;  %4500 = vst.msk [vmem:[%s8526_s7 + $0xa0] sm:$0xff] %vm4479_vm5, %v10069_v27  ;;  %v5662_v6 = vpop.f32.mrf.mxu0  ;;  %v8917_v17 = vpop.permute.xlu1 %4032  ;;  %v10093_v25 = vld [vmem:[#allocation13_spill] sm:$0xff] }
 0x55f   : > { %4823 = vst.msk [vmem:[%s8526_s7 + $0xb0] sm:$0xff] %vm4800_vm6, %v10068_v63  ;;  %4821 = vst.msk [vmem:[%s8526_s7 + $0xa0] sm:$0xff] %vm4800_vm6, %v10070_v42  ;;  %v3687_v58 = vadd.f32 %v5662_v6, %v8521_v50  ;;  %v10094_v63 = vld [vmem:[#allocation83_spill] sm:$0xff]  ;;  %v10096_v42 = vld [vmem:[#allocation81_spill] sm:$0xff] }
 0x560   : > { %4888 = vst.msk [vmem:[%s8526_s7 + $0xb0] sm:$0xff] %vm4865_vm7, %v5985_v30  ;;  %4886 = vst.msk [vmem:[%s8526_s7 + $0xa0] sm:$0xff] %vm4865_vm7, %v5985_v30 }
 0x561   : > { %3861 = vst.msk [vmem:[%s8526_s7 + $0xb8] sm:$0xff] %vm3837_vm3, %v3674_v36  ;;  %3859 = vst.msk [vmem:[%s8526_s7 + $0xa8] sm:$0xff] %vm3837_vm3, %v3666_v20  ;;  %v8934_v32 = vpop.permute.xlu0 %4042  ;;  %v10095_v20 = vld [vmem:[#allocation20_spill] sm:$0xff] }
 0x562   : > { %4182 = vst.msk [vmem:[%s8526_s7 + $0xb8] sm:$0xff] %vm4158_vm4, %v8574_v15  ;;  %4180 = vst.msk [vmem:[%s8526_s7 + $0xa8] sm:$0xff] %vm4158_vm4, %v8623_v21  ;;  %v3678_v15 = vpop.f32.mrf.mxu0 }
 0x563   : > { %4503 = vst.msk [vmem:[%s8526_s7 + $0xb8] sm:$0xff] %vm4479_vm5, %v10071_v11  ;;  %4501 = vst.msk [vmem:[%s8526_s7 + $0xa8] sm:$0xff] %vm4479_vm5, %v10073_v45  ;;  %v3679_v41 = vadd.f32 %v8521_v50, %v3678_v15  ;;  %v10097_v11 = vld [vmem:[#allocation15_spill] sm:$0xff]  ;;  %v10099_v45 = vld [vmem:[#allocation22_spill] sm:$0xff] }
 0x564   : > { %4824 = vst.msk [vmem:[%s8526_s7 + $0xb8] sm:$0xff] %vm4800_vm6, %v10072_v13  ;;  %4822 = vst.msk [vmem:[%s8526_s7 + $0xa8] sm:$0xff] %vm4800_vm6, %v10074_v33  ;;  %v5663_v39 = vpop.f32.mrf.mxu0  ;;  %v10098_v13 = vld [vmem:[#allocation79_spill] sm:$0xff] }
 0x565   : > { %4889 = vst.msk [vmem:[%s8526_s7 + $0xb8] sm:$0xff] %vm4865_vm7, %v5985_v30  ;;  %4887 = vst.msk [vmem:[%s8526_s7 + $0xa8] sm:$0xff] %vm4865_vm7, %v5985_v30  ;;  %v3690_v21 = vadd.f32 %v5663_v39, %v8521_v50  ;;  %v8983_v19 = vpop.permute.xlu0 %4038 }
 0x566   : > { %3864 = vst.msk [vmem:[%s8526_s7 + $0xd0] sm:$0xff] %vm3837_vm3, %v3687_v58  ;;  %3862 = vst.msk [vmem:[%s8526_s7 + $0xc0] sm:$0xff] %vm3837_vm3, %v3679_v41 }
 0x567   : > { %4185 = vst.msk [vmem:[%s8526_s7 + $0xd0] sm:$0xff] %vm4158_vm4, %v8640_v61  ;;  %4183 = vst.msk [vmem:[%s8526_s7 + $0xc0] sm:$0xff] %vm4158_vm4, %v8689_v8  ;;  %v3681_v61 = vpop.f32.mrf.mxu0  ;;  %v8966_v8 = vpop.permute.xlu1 %4044 }
 0x568   : > { %4506 = vst.msk [vmem:[%s8526_s7 + $0xd0] sm:$0xff] %vm4479_vm5, %v10075_v44  ;;  %4504 = vst.msk [vmem:[%s8526_s7 + $0xc0] sm:$0xff] %vm4479_vm5, %v10077_v55  ;;  %v3682_v43 = vadd.f32 %v8521_v50, %v3681_v61  ;;  %v10101_v44 = vld [vmem:[#allocation17_spill] sm:$0xff]  ;;  %v10103_v55 = vld [vmem:[#allocation24_spill] sm:$0xff] }
 0x569   : > { %4827 = vst.msk [vmem:[%s8526_s7 + $0xd0] sm:$0xff] %vm4800_vm6, %v10076_v2  ;;  %4825 = vst.msk [vmem:[%s8526_s7 + $0xc0] sm:$0xff] %vm4800_vm6, %v10078_v31  ;;  %v5666_v34 = vpop.f32.mrf.mxu0  ;;  %v9031_v4 = vpop.permute.xlu0 %4050  ;;  %v10104_v31 = vld [vmem:[#allocation85_spill] sm:$0xff] }
 0x56a   : > { %4892 = vst.msk [vmem:[%s8526_s7 + $0xd0] sm:$0xff] %vm4865_vm7, %v5985_v30  ;;  %4890 = vst.msk [vmem:[%s8526_s7 + $0xc0] sm:$0xff] %vm4865_vm7, %v5985_v30  ;;  %v3703_v29 = vadd.f32 %v5666_v34, %v8521_v50 }
 0x56b   : > { %3865 = vst.msk [vmem:[%s8526_s7 + $0xd8] sm:$0xff] %vm3837_vm3, %v3690_v21  ;;  %3863 = vst.msk [vmem:[%s8526_s7 + $0xc8] sm:$0xff] %vm3837_vm3, %v3682_v43  ;;  %v9015_v46 = vpop.permute.xlu1 %4040 }
 0x56c   : > { %4186 = vst.msk [vmem:[%s8526_s7 + $0xd8] sm:$0xff] %vm4158_vm4, %v8672_v35  ;;  %4184 = vst.msk [vmem:[%s8526_s7 + $0xc8] sm:$0xff] %vm4158_vm4, %v8721_v24  ;;  %v3694_v35 = vpop.f32.mrf.mxu0 }
 0x56d   : > { %4507 = vst.msk [vmem:[%s8526_s7 + $0xd8] sm:$0xff] %vm4479_vm5, %v10079_v7  ;;  %4505 = vst.msk [vmem:[%s8526_s7 + $0xc8] sm:$0xff] %vm4479_vm5, %v10081_v3  ;;  %v3695_v1 = vadd.f32 %v8521_v50, %v3694_v35  ;;  %v9060_v62 = vpop.permute.xlu0 %4046  ;;  %v10105_v7 = vld [vmem:[#allocation19_spill] sm:$0xff]  ;;  %v10107_v3 = vld [vmem:[#allocation26_spill] sm:$0xff] }
 0x56e   : > { %4828 = vst.msk [vmem:[%s8526_s7 + $0xd8] sm:$0xff] %vm4800_vm6, %v10080_v18  ;;  %4826 = vst.msk [vmem:[%s8526_s7 + $0xc8] sm:$0xff] %vm4800_vm6, %v10082_v49  ;;  %v5667_v24 = vpop.f32.mrf.mxu0 }
 0x56f   : > { %4893 = vst.msk [vmem:[%s8526_s7 + $0xd8] sm:$0xff] %vm4865_vm7, %v5985_v30  ;;  %4891 = vst.msk [vmem:[%s8526_s7 + $0xc8] sm:$0xff] %vm4865_vm7, %v5985_v30  ;;  %v3706_v53 = vadd.f32 %v5667_v24, %v8521_v50  ;;  %v9052_v57 = vpop.permute.xlu1 %4052 }
 0x570   : > { %3868 = vst.msk [vmem:[%s8526_s7 + $0xf0] sm:$0xff] %vm3837_vm3, %v3703_v29  ;;  %3866 = vst.msk [vmem:[%s8526_s7 + $0xe0] sm:$0xff] %vm3837_vm3, %v3695_v1 }
 0x571   : > { %4189 = vst.msk [vmem:[%s8526_s7 + $0xf0] sm:$0xff] %vm4158_vm4, %v8738_v54  ;;  %4187 = vst.msk [vmem:[%s8526_s7 + $0xe0] sm:$0xff] %vm4158_vm4, %v8787_v5  ;;  %v3697_v54 = vpop.f32.mrf.mxu0  ;;  %v10087_v5 = vld [vmem:[#allocation16_spill] sm:$0xff]  ;;  %v9106_v6 = vpop.permute.xlu0 %4058 }
 0x572   : > { %4510 = vst.msk [vmem:[%s8526_s7 + $0xf0] sm:$0xff] %vm4479_vm5, %v10083_v40  ;;  %4508 = vst.msk [vmem:[%s8526_s7 + $0xe0] sm:$0xff] %vm4479_vm5, %v10085_v51  ;;  %v3698_v23 = vadd.f32 %v8521_v50, %v3697_v54  ;;  %v10109_v40 = vld [vmem:[#allocation21_spill] sm:$0xff]  ;;  %v10111_v51 = vld [vmem:[#allocation28_spill] sm:$0xff] }
 0x573   : > { %4831 = vst.msk [vmem:[%s8526_s7 + $0xf0] sm:$0xff] %vm4800_vm6, %v10084_v22  ;;  %4829 = vst.msk [vmem:[%s8526_s7 + $0xe0] sm:$0xff] %vm4800_vm6, %v10086_v56  ;;  %v5670_v48 = vpop.f32.mrf.mxu0  ;;  %v9089_v27 = vpop.permute.xlu1 %4048  ;;  %v10110_v22 = vld [vmem:[#allocation89_spill] sm:$0xff] }
 0x574   : > { %4896 = vst.msk [vmem:[%s8526_s7 + $0xf0] sm:$0xff] %vm4865_vm7, %v5985_v30  ;;  %4894 = vst.msk [vmem:[%s8526_s7 + $0xe0] sm:$0xff] %vm4865_vm7, %v5985_v30  ;;  %v3719_v10 = vadd.f32 %v5670_v48, %v8521_v50 }
 0x575   : > { %3869 = vst.msk [vmem:[%s8526_s7 + $0xf8] sm:$0xff] %vm3837_vm3, %v3706_v53  ;;  %3867 = vst.msk [vmem:[%s8526_s7 + $0xe8] sm:$0xff] %vm3837_vm3, %v3698_v23  ;;  %v4055_v61 = vpop.permute.xlu0 %4054 }
 0x576   : > { %4190 = vst.msk [vmem:[%s8526_s7 + $0xf8] sm:$0xff] %vm4158_vm4, %v8770_v14  ;;  %4188 = vst.msk [vmem:[%s8526_s7 + $0xe8] sm:$0xff] %vm4158_vm4, %v8819_v38  ;;  %v10089_v14 = vld [vmem:[#allocation11_spill] sm:$0xff]  ;;  %v3710_v38 = vpop.f32.mrf.mxu0 }
 0x577   : > { %4511 = vst.msk [vmem:[%s8526_s7 + $0xf8] sm:$0xff] %vm4479_vm5, %v10087_v5  ;;  %4509 = vst.msk [vmem:[%s8526_s7 + $0xe8] sm:$0xff] %vm4479_vm5, %v10089_v14  ;;  %v3711_v60 = vadd.f32 %v8521_v50, %v3710_v38  ;;  %v9138_v39 = vpop.permute.xlu1 %4060  ;;  %v10114_v14 = vld [vmem:[#allocation88_spill] sm:$0xff] }
 0x578   : > { %4832 = vst.msk [vmem:[%s8526_s7 + $0xf8] sm:$0xff] %vm4800_vm6, %v10088_v59  ;;  %4830 = vst.msk [vmem:[%s8526_s7 + $0xe8] sm:$0xff] %vm4800_vm6, %v10090_v26  ;;  %v5671_v52 = vpop.f32.mrf.mxu0 }
 0x579   : > { %4897 = vst.msk [vmem:[%s8526_s7 + $0xf8] sm:$0xff] %vm4865_vm7, %v5985_v30  ;;  %4895 = vst.msk [vmem:[%s8526_s7 + $0xe8] sm:$0xff] %vm4865_vm7, %v5985_v30  ;;  %v3722_v0 = vadd.f32 %v5671_v52, %v8521_v50  ;;  %v4067_v24 = vpop.permute.xlu0 %4066  ;;  %v10117_v52 = vld [vmem:[#allocation25_spill] sm:$0xff] }
 0x57a   : > { %3872 = vst.msk [vmem:[%s8526_s7 + $0x110] sm:$0xff] %vm3837_vm3, %v3719_v10  ;;  %3870 = vst.msk [vmem:[%s8526_s7 + $0x100] sm:$0xff] %vm3837_vm3, %v3711_v60  ;;  %v10115_v10 = vld [vmem:[#allocation31_spill] sm:$0xff] }
 0x57b   : > { %4193 = vst.msk [vmem:[%s8526_s7 + $0x110] sm:$0xff] %vm4158_vm4, %v8836_v28  ;;  %4191 = vst.msk [vmem:[%s8526_s7 + $0x100] sm:$0xff] %vm4158_vm4, %v8885_v37  ;;  %v3713_v28 = vpop.f32.mrf.mxu0  ;;  %v4057_v35 = vpop.permute.xlu1 %4056 }
 0x57c   : > { %4514 = vst.msk [vmem:[%s8526_s7 + $0x110] sm:$0xff] %vm4479_vm5, %v10091_v16  ;;  %4512 = vst.msk [vmem:[%s8526_s7 + $0x100] sm:$0xff] %vm4479_vm5, %v10093_v25  ;;  %v3714_v36 = vadd.f32 %v8521_v50, %v3713_v28  ;;  %v10118_v16 = vld [vmem:[#allocation92_spill] sm:$0xff]  ;;  %v10119_v28 = vld [vmem:[#allocation34_spill] sm:$0xff] }
 0x57d   : > { %4835 = vst.msk [vmem:[%s8526_s7 + $0x110] sm:$0xff] %vm4800_vm6, %v10092_v9  ;;  %4833 = vst.msk [vmem:[%s8526_s7 + $0x100] sm:$0xff] %vm4800_vm6, %v10094_v63  ;;  %v5674_v12 = vpop.f32.mrf.mxu0  ;;  %v4063_v26 = vpop.permute.xlu0 %4062 }
 0x57e   : > { %4900 = vst.msk [vmem:[%s8526_s7 + $0x110] sm:$0xff] %vm4865_vm7, %v5985_v30  ;;  %4898 = vst.msk [vmem:[%s8526_s7 + $0x100] sm:$0xff] %vm4865_vm7, %v5985_v30  ;;  %v3735_v37 = vadd.f32 %v5674_v12, %v8521_v50 }
 0x57f   : > { %3873 = vst.msk [vmem:[%s8526_s7 + $0x118] sm:$0xff] %vm3837_vm3, %v3722_v0  ;;  %3871 = vst.msk [vmem:[%s8526_s7 + $0x108] sm:$0xff] %vm3837_vm3, %v3714_v36  ;;  %v4069_v5 = vpop.permute.xlu1 %4068  ;;  %v10120_v36 = vld [vmem:[#allocation97_spill] sm:$0xff] }
 0x580   : > { %4194 = vst.msk [vmem:[%s8526_s7 + $0x118] sm:$0xff] %vm4158_vm4, %v8868_v47  ;;  %4192 = vst.msk [vmem:[%s8526_s7 + $0x108] sm:$0xff] %vm4158_vm4, %v8917_v17  ;;  %v3726_v47 = vpop.f32.mrf.mxu0  ;;  %v10100_v17 = vld [vmem:[#allocation87_spill] sm:$0xff] }
 0x581   : > { %4515 = vst.msk [vmem:[%s8526_s7 + $0x118] sm:$0xff] %vm4479_vm5, %v10095_v20  ;;  %4513 = vst.msk [vmem:[%s8526_s7 + $0x108] sm:$0xff] %vm4479_vm5, %v10097_v11  ;;  %v3727_v58 = vadd.f32 %v8521_v50, %v3726_v47  ;;  %v4075_v12 = vpop.permute.xlu0 %4074  ;;  %v10123_v47 = vld [vmem:[#allocation38_spill] sm:$0xff]  ;;  %v10124_v11 = vld [vmem:[#allocation99_spill] sm:$0xff] }
 0x582   : > { %4836 = vst.msk [vmem:[%s8526_s7 + $0x118] sm:$0xff] %vm4800_vm6, %v10096_v42  ;;  %4834 = vst.msk [vmem:[%s8526_s7 + $0x108] sm:$0xff] %vm4800_vm6, %v10098_v13  ;;  %v5675_v15 = vpop.f32.mrf.mxu0 }
 0x583   : > { %4901 = vst.msk [vmem:[%s8526_s7 + $0x118] sm:$0xff] %vm4865_vm7, %v5985_v30  ;;  %4899 = vst.msk [vmem:[%s8526_s7 + $0x108] sm:$0xff] %vm4865_vm7, %v5985_v30  ;;  %v3738_v41 = vadd.f32 %v5675_v15, %v8521_v50  ;;  %v4065_v9 = vpop.permute.xlu1 %4064  ;;  %v10125_v15 = vld [vmem:[#allocation29_spill] sm:$0xff] }
 0x584   : > { %3876 = vst.msk [vmem:[%s8526_s7 + $0x130] sm:$0xff] %vm3837_vm3, %v3735_v37  ;;  %3874 = vst.msk [vmem:[%s8526_s7 + $0x120] sm:$0xff] %vm3837_vm3, %v3727_v58  ;;  %v3729_v33 = vpop.f32.mrf.mxu0  ;;  %v10122_v37 = vld [vmem:[#allocation91_spill] sm:$0xff] }
 0x585   : > { %4197 = vst.msk [vmem:[%s8526_s7 + $0x130] sm:$0xff] %vm4158_vm4, %v8934_v32  ;;  %4195 = vst.msk [vmem:[%s8526_s7 + $0x120] sm:$0xff] %vm4158_vm4, %v8983_v19  ;;  %v3730_v21 = vadd.f32 %v8521_v50, %v3729_v33  ;;  %v10102_v32 = vld [vmem:[#allocation86_spill] sm:$0xff]  ;;  %v4071_v33 = vpop.permute.xlu0 %4070 }
 0x586   : > { %4518 = vst.msk [vmem:[%s8526_s7 + $0x130] sm:$0xff] %vm4479_vm5, %v10099_v45  ;;  %4516 = vst.msk [vmem:[%s8526_s7 + $0x120] sm:$0xff] %vm4479_vm5, %v10101_v44  ;;  %v5678_v2 = vpop.f32.mrf.mxu0  ;;  %v10108_v19 = vld [vmem:[#allocation90_spill] sm:$0xff] }
 0x587   : > { %4839 = vst.msk [vmem:[%s8526_s7 + $0x130] sm:$0xff] %vm4800_vm6, %v10100_v17  ;;  %4837 = vst.msk [vmem:[%s8526_s7 + $0x120] sm:$0xff] %vm4800_vm6, %v10102_v32  ;;  %v3751_v43 = vadd.f32 %v5678_v2, %v8521_v50  ;;  %v4077_v13 = vpop.permute.xlu1 %4076  ;;  %v10129_v2 = vld [vmem:[#allocation32_spill] sm:$0xff] }
 0x588   : > { %4904 = vst.msk [vmem:[%s8526_s7 + $0x130] sm:$0xff] %vm4865_vm7, %v5985_v30  ;;  %4902 = vst.msk [vmem:[%s8526_s7 + $0x120] sm:$0xff] %vm4865_vm7, %v5985_v30  ;;  %v3742_v34 = vpop.f32.mrf.mxu0 }
 0x589   : > { %3877 = vst.msk [vmem:[%s8526_s7 + $0x138] sm:$0xff] %vm3837_vm3, %v3738_v41  ;;  %3875 = vst.msk [vmem:[%s8526_s7 + $0x128] sm:$0xff] %vm3837_vm3, %v3730_v21  ;;  %v3743_v29 = vadd.f32 %v8521_v50, %v3742_v34  ;;  %v10126_v41 = vld [vmem:[#allocation96_spill] sm:$0xff]  ;;  %v10128_v21 = vld [vmem:[#allocation98_spill] sm:$0xff] }
 0x58a   : > { %4198 = vst.msk [vmem:[%s8526_s7 + $0x138] sm:$0xff] %vm4158_vm4, %v8966_v8  ;;  %4196 = vst.msk [vmem:[%s8526_s7 + $0x128] sm:$0xff] %vm4158_vm4, %v9015_v46  ;;  %v10106_v8 = vld [vmem:[#allocation82_spill] sm:$0xff]  ;;  %v5679_v18 = vpop.f32.mrf.mxu0  ;;  %v10112_v46 = vld [vmem:[#allocation93_spill] sm:$0xff] }
 0x58b   : > { %4519 = vst.msk [vmem:[%s8526_s7 + $0x138] sm:$0xff] %vm4479_vm5, %v10103_v55  ;;  %4517 = vst.msk [vmem:[%s8526_s7 + $0x128] sm:$0xff] %vm4479_vm5, %v10105_v7  ;;  %v3754_v1 = vadd.f32 %v5679_v18, %v8521_v50  ;;  %v10130_v55 = vld [vmem:[#allocation95_spill] sm:$0xff]  ;;  %v10131_v34 = vld [vmem:[#allocation45_spill] sm:$0xff]  ;;  %v4083_v18 = vpop.permute.xlu0 %4082 }
 0x58c   : > { %4840 = vst.msk [vmem:[%s8526_s7 + $0x138] sm:$0xff] %vm4800_vm6, %v10104_v31  ;;  %4838 = vst.msk [vmem:[%s8526_s7 + $0x128] sm:$0xff] %vm4800_vm6, %v10106_v8  ;;  %v3745_v49 = vpop.f32.mrf.mxu0  ;;  %v4073_v31 = vpop.permute.xlu1 %4072 }
 0x58d   : > { %4905 = vst.msk [vmem:[%s8526_s7 + $0x138] sm:$0xff] %vm4865_vm7, %v5985_v30  ;;  %4903 = vst.msk [vmem:[%s8526_s7 + $0x128] sm:$0xff] %vm4865_vm7, %v5985_v30  ;;  %v3746_v53 = vadd.f32 %v8521_v50, %v3745_v49  ;;  %v10135_v49 = vld [vmem:[#allocation49_spill] sm:$0xff] }
 0x58e   : > { %3880 = vst.msk [vmem:[%s8526_s7 + $0x150] sm:$0xff] %vm3837_vm3, %v3751_v43  ;;  %3878 = vst.msk [vmem:[%s8526_s7 + $0x140] sm:$0xff] %vm3837_vm3, %v3743_v29  ;;  %v5682_v54 = vpop.f32.mrf.mxu0  ;;  %v10132_v29 = vld [vmem:[#allocation102_spill] sm:$0xff] }
 0x58f   : > { %4201 = vst.msk [vmem:[%s8526_s7 + $0x150] sm:$0xff] %vm4158_vm4, %v9031_v4  ;;  %4199 = vst.msk [vmem:[%s8526_s7 + $0x140] sm:$0xff] %vm4158_vm4, %v9060_v62  ;;  %v3767_v23 = vadd.f32 %v5682_v54, %v8521_v50  ;;  %v10113_v4 = vld [vmem:[#allocation23_spill] sm:$0xff] }
 0x590   : > { %4522 = vst.msk [vmem:[%s8526_s7 + $0x150] sm:$0xff] %vm4479_vm5, %v10107_v3  ;;  %4520 = vst.msk [vmem:[%s8526_s7 + $0x140] sm:$0xff] %vm4479_vm5, %v10109_v40  ;;  %v3758_v56 = vpop.f32.mrf.mxu0  ;;  %v10136_v40 = vld [vmem:[#allocation101_spill] sm:$0xff]  ;;  %v10137_v54 = vld [vmem:[#allocation39_spill] sm:$0xff] }
 0x591   : > { %4843 = vst.msk [vmem:[%s8526_s7 + $0x150] sm:$0xff] %vm4800_vm6, %v10108_v19  ;;  %4841 = vst.msk [vmem:[%s8526_s7 + $0x140] sm:$0xff] %vm4800_vm6, %v10110_v22  ;;  %v3759_v59 = vadd.f32 %v8521_v50, %v3758_v56  ;;  %v4085_v22 = vpop.permute.xlu1 %4084  ;;  %v4079_v56 = vpop.permute.xlu0 %4078 }
 0x592   : > { %4908 = vst.msk [vmem:[%s8526_s7 + $0x150] sm:$0xff] %vm4865_vm7, %v5985_v30  ;;  %4906 = vst.msk [vmem:[%s8526_s7 + $0x140] sm:$0xff] %vm4865_vm7, %v5985_v30  ;;  %v5683_v48 = vpop.f32.mrf.mxu0 }
 0x593   : > { %3881 = vst.msk [vmem:[%s8526_s7 + $0x158] sm:$0xff] %vm3837_vm3, %v3754_v1  ;;  %3879 = vst.msk [vmem:[%s8526_s7 + $0x148] sm:$0xff] %vm3837_vm3, %v3746_v53  ;;  %v3770_v38 = vadd.f32 %v5683_v48, %v8521_v50  ;;  %v10134_v1 = vld [vmem:[#allocation104_spill] sm:$0xff]  ;;  %v10141_v48 = vld [vmem:[#allocation47_spill] sm:$0xff] }
 0x594   : > { %4202 = vst.msk [vmem:[%s8526_s7 + $0x158] sm:$0xff] %vm4158_vm4, %v9052_v57  ;;  %4200 = vst.msk [vmem:[%s8526_s7 + $0x148] sm:$0xff] %vm4158_vm4, %v9089_v27  ;;  %v10116_v57 = vld [vmem:[#allocation94_spill] sm:$0xff]  ;;  %v3761_v60 = vpop.f32.mrf.mxu0  ;;  %v10121_v27 = vld [vmem:[#allocation27_spill] sm:$0xff] }
 0x595   : > { %4523 = vst.msk [vmem:[%s8526_s7 + $0x158] sm:$0xff] %vm4479_vm5, %v10111_v51  ;;  %4521 = vst.msk [vmem:[%s8526_s7 + $0x148] sm:$0xff] %vm4479_vm5, %v10113_v4  ;;  %v3762_v62 = vadd.f32 %v8521_v50, %v3761_v60  ;;  %v10144_v60 = vld [vmem:[#allocation105_spill] sm:$0xff] }
 0x596   : > { %4844 = vst.msk [vmem:[%s8526_s7 + $0x158] sm:$0xff] %vm4800_vm6, %v10112_v46  ;;  %4842 = vst.msk [vmem:[%s8526_s7 + $0x148] sm:$0xff] %vm4800_vm6, %v10114_v14  ;;  %v5686_v0 = vpop.f32.mrf.mxu0 }
 0x597   : > { %4909 = vst.msk [vmem:[%s8526_s7 + $0x158] sm:$0xff] %vm4865_vm7, %v5985_v30  ;;  %4907 = vst.msk [vmem:[%s8526_s7 + $0x148] sm:$0xff] %vm4865_vm7, %v5985_v30  ;;  %v3783_v25 = vadd.f32 %v5686_v0, %v8521_v50 }
 0x598   : > { %3884 = vst.msk [vmem:[%s8526_s7 + $0x170] sm:$0xff] %vm3837_vm3, %v3767_v23  ;;  %3882 = vst.msk [vmem:[%s8526_s7 + $0x160] sm:$0xff] %vm3837_vm3, %v3759_v59  ;;  %v3774_v63 = vpop.f32.mrf.mxu0  ;;  %v10138_v23 = vld [vmem:[#allocation100_spill] sm:$0xff]  ;;  %v10140_v59 = vld [vmem:[#allocation106_spill] sm:$0xff] }
 0x599   : > { %4205 = vst.msk [vmem:[%s8526_s7 + $0x170] sm:$0xff] %vm4158_vm4, %v9106_v6  ;;  %4203 = vst.msk [vmem:[%s8526_s7 + $0x160] sm:$0xff] %vm4158_vm4, %v4055_v61  ;;  %v3775_v20 = vadd.f32 %v8521_v50, %v3774_v63 }
 0x59a   : > { %4526 = vst.msk [vmem:[%s8526_s7 + $0x170] sm:$0xff] %vm4479_vm5, %v10115_v10  ;;  %4524 = vst.msk [vmem:[%s8526_s7 + $0x160] sm:$0xff] %vm4479_vm5, %v10117_v52  ;;  %v5687_v42 = vpop.f32.mrf.mxu0  ;;  %v10142_v10 = vld [vmem:[#allocation108_spill] sm:$0xff]  ;;  %v10145_v52 = vld [vmem:[#allocation51_spill] sm:$0xff] }
 0x59b   : > { %4847 = vst.msk [vmem:[%s8526_s7 + $0x170] sm:$0xff] %vm4800_vm6, %v10116_v57  ;;  %4845 = vst.msk [vmem:[%s8526_s7 + $0x160] sm:$0xff] %vm4800_vm6, %v10118_v16  ;;  %v3786_v6 = vadd.f32 %v5687_v42, %v8521_v50  ;;  %v10143_v57 = vld [vmem:[#allocation55_spill] sm:$0xff]  ;;  %v4091_v16 = vpop.permute.xlu0 %4090 }
 0x59c   : > { %4912 = vst.msk [vmem:[%s8526_s7 + $0x170] sm:$0xff] %vm4865_vm7, %v5985_v30  ;;  %4910 = vst.msk [vmem:[%s8526_s7 + $0x160] sm:$0xff] %vm4865_vm7, %v5985_v30  ;;  %v3777_v58 = vpop.f32.mrf.mxu0 }
 0x59d   : > { %3885 = vst.msk [vmem:[%s8526_s7 + $0x178] sm:$0xff] %vm3837_vm3, %v3770_v38  ;;  %3883 = vst.msk [vmem:[%s8526_s7 + $0x168] sm:$0xff] %vm3837_vm3, %v3762_v62  ;;  %v3778_v45 = vadd.f32 %v8521_v50, %v3777_v58  ;;  %v4081_v38 = vpop.permute.xlu1 %4080  ;;  %v10146_v62 = vld [vmem:[#allocation103_spill] sm:$0xff]  ;;  %v10149_v58 = vld [vmem:[#allocation110_spill] sm:$0xff] }
 0x59e   : > { %4206 = vst.msk [vmem:[%s8526_s7 + $0x178] sm:$0xff] %vm4158_vm4, %v9138_v39  ;;  %4204 = vst.msk [vmem:[%s8526_s7 + $0x168] sm:$0xff] %vm4158_vm4, %v4057_v35  ;;  %v5690_v17 = vpop.f32.mrf.mxu0  ;;  %v10127_v39 = vld [vmem:[#allocation42_spill] sm:$0xff]  ;;  %v10133_v35 = vld [vmem:[#allocation35_spill] sm:$0xff] }
 0x59f   : > { %4527 = vst.msk [vmem:[%s8526_s7 + $0x178] sm:$0xff] %vm4479_vm5, %v10119_v28  ;;  %4525 = vst.msk [vmem:[%s8526_s7 + $0x168] sm:$0xff] %vm4479_vm5, %v10121_v27  ;;  %v3799_v44 = vadd.f32 %v5690_v17, %v8521_v50 }
 0x5a0   : > { %4848 = vst.msk [vmem:[%s8526_s7 + $0x178] sm:$0xff] %vm4800_vm6, %v10120_v36  ;;  %4846 = vst.msk [vmem:[%s8526_s7 + $0x168] sm:$0xff] %vm4800_vm6, %v10122_v37  ;;  %v3790_v32 = vpop.f32.mrf.mxu0  ;;  %v10147_v37 = vld [vmem:[#allocation59_spill] sm:$0xff] }
 0x5a1   : > { %4913 = vst.msk [vmem:[%s8526_s7 + $0x178] sm:$0xff] %vm4865_vm7, %v5985_v30  ;;  %4911 = vst.msk [vmem:[%s8526_s7 + $0x168] sm:$0xff] %vm4865_vm7, %v5985_v30  ;;  %v3791_v61 = vadd.f32 %v8521_v50, %v3790_v32  ;;  %v4093_v0 = vpop.permute.xlu1 %4092 }
 0x5a2   : > { %3888 = vst.msk [vmem:[%s8526_s7 + $0x190] sm:$0xff] %vm3837_vm3, %v3783_v25  ;;  %3886 = vst.msk [vmem:[%s8526_s7 + $0x180] sm:$0xff] %vm3837_vm3, %v3775_v20  ;;  %v5691_v43 = vpop.f32.mrf.mxu0 }
 0x5a3   : > { %4209 = vst.msk [vmem:[%s8526_s7 + $0x190] sm:$0xff] %vm4158_vm4, %v4067_v24  ;;  %4207 = vst.msk [vmem:[%s8526_s7 + $0x180] sm:$0xff] %vm4158_vm4, %v4063_v26  ;;  %v3802_v7 = vadd.f32 %v5691_v43, %v8521_v50 }
 0x5a4   : > { %4530 = vst.msk [vmem:[%s8526_s7 + $0x190] sm:$0xff] %vm4479_vm5, %v10123_v47  ;;  %4528 = vst.msk [vmem:[%s8526_s7 + $0x180] sm:$0xff] %vm4479_vm5, %v10125_v15  ;;  %v3793_v8 = vpop.f32.mrf.mxu0  ;;  %v10150_v15 = vld [vmem:[#allocation62_spill] sm:$0xff] }
 0x5a5   : > { %4851 = vst.msk [vmem:[%s8526_s7 + $0x190] sm:$0xff] %vm4800_vm6, %v10124_v11  ;;  %4849 = vst.msk [vmem:[%s8526_s7 + $0x180] sm:$0xff] %vm4800_vm6, %v10126_v41  ;;  %v3794_v3 = vadd.f32 %v8521_v50, %v3793_v8  ;;  %v4089_v63 = vpop.permute.xlu1 %4088 }
 0x5a6   : > { %4916 = vst.msk [vmem:[%s8526_s7 + $0x190] sm:$0xff] %vm4865_vm7, %v5985_v30  ;;  %4914 = vst.msk [vmem:[%s8526_s7 + $0x180] sm:$0xff] %vm4865_vm7, %v5985_v30  ;;  %v5694_v19 = vpop.f32.mrf.mxu0 }
 0x5a7   : > { %3889 = vst.msk [vmem:[%s8526_s7 + $0x198] sm:$0xff] %vm3837_vm3, %v3786_v6  ;;  %3887 = vst.msk [vmem:[%s8526_s7 + $0x188] sm:$0xff] %vm3837_vm3, %v3778_v45  ;;  %v3815_v24 = vadd.f32 %v5694_v19, %v8521_v50  ;;  %v10148_v6 = vld [vmem:[#allocation54_spill] sm:$0xff]  ;;  %v10152_v45 = vld [vmem:[#allocation107_spill] sm:$0xff] }
 0x5a8   : > { %4210 = vst.msk [vmem:[%s8526_s7 + $0x198] sm:$0xff] %vm4158_vm4, %v4069_v5  ;;  %4208 = vst.msk [vmem:[%s8526_s7 + $0x188] sm:$0xff] %vm4158_vm4, %v4065_v9  ;;  %v3806_v53 = vpop.f32.mrf.mxu0  ;;  %v10139_v5 = vld [vmem:[#allocation52_spill] sm:$0xff]  ;;  %v4087_v9 = vpop.permute.xlu0 %4086 }
 0x5a9   : > { %4531 = vst.msk [vmem:[%s8526_s7 + $0x198] sm:$0xff] %vm4479_vm5, %v10127_v39  ;;  %4529 = vst.msk [vmem:[%s8526_s7 + $0x188] sm:$0xff] %vm4479_vm5, %v10129_v2  ;;  %v3807_v51 = vadd.f32 %v8521_v50, %v3806_v53 }
 0x5aa   : > { %4852 = vst.msk [vmem:[%s8526_s7 + $0x198] sm:$0xff] %vm4800_vm6, %v10128_v21  ;;  %4850 = vst.msk [vmem:[%s8526_s7 + $0x188] sm:$0xff] %vm4800_vm6, %v10130_v55  ;;  %v5695_v46 = vpop.f32.mrf.mxu0 }
 0x5ab   : > { %4917 = vst.msk [vmem:[%s8526_s7 + $0x198] sm:$0xff] %vm4865_vm7, %v5985_v30  ;;  %4915 = vst.msk [vmem:[%s8526_s7 + $0x188] sm:$0xff] %vm4865_vm7, %v5985_v30  ;;  %v3818_v4 = vadd.f32 %v5695_v46, %v8521_v50 }
 0x5ac   : > { %3892 = vst.msk [vmem:[%s8526_s7 + $0x1b0] sm:$0xff] %vm3837_vm3, %v3799_v44  ;;  %3890 = vst.msk [vmem:[%s8526_s7 + $0x1a0] sm:$0xff] %vm3837_vm3, %v3791_v61  ;;  %v3809_v14 = vpop.f32.mrf.mxu0  ;;  %v4733_v20 = vpop.permute.xlu0 %4732 }
 0x5ad   : > { %4213 = vst.msk [vmem:[%s8526_s7 + $0x1b0] sm:$0xff] %vm4158_vm4, %v4075_v12  ;;  %4211 = vst.msk [vmem:[%s8526_s7 + $0x1a0] sm:$0xff] %vm4158_vm4, %v4071_v33  ;;  %v3810_v26 = vadd.f32 %v8521_v50, %v3809_v14 }
 0x5ae   : > { %4534 = vst.msk [vmem:[%s8526_s7 + $0x1b0] sm:$0xff] %vm4479_vm5, %v10131_v34  ;;  %4532 = vst.msk [vmem:[%s8526_s7 + $0x1a0] sm:$0xff] %vm4479_vm5, %v10133_v35 }
 0x5af   : > { %4855 = vst.msk [vmem:[%s8526_s7 + $0x1b0] sm:$0xff] %vm4800_vm6, %v10132_v29  ;;  %4853 = vst.msk [vmem:[%s8526_s7 + $0x1a0] sm:$0xff] %vm4800_vm6, %v10134_v1 }
 0x5b0   : > { %4920 = vst.msk [vmem:[%s8526_s7 + $0x1b0] sm:$0xff] %vm4865_vm7, %v5985_v30  ;;  %4918 = vst.msk [vmem:[%s8526_s7 + $0x1a0] sm:$0xff] %vm4865_vm7, %v5985_v30 }
 0x5b1   : > { %3893 = vst.msk [vmem:[%s8526_s7 + $0x1b8] sm:$0xff] %vm3837_vm3, %v3802_v7  ;;  %3891 = vst.msk [vmem:[%s8526_s7 + $0x1a8] sm:$0xff] %vm3837_vm3, %v3794_v3 }
 0x5b2   : > { %4214 = vst.msk [vmem:[%s8526_s7 + $0x1b8] sm:$0xff] %vm4158_vm4, %v4077_v13  ;;  %4212 = vst.msk [vmem:[%s8526_s7 + $0x1a8] sm:$0xff] %vm4158_vm4, %v4073_v31  ;;  %v4735_v13 = vpop.permute.xlu1 %4734 }
 0x5b3   : > { %4535 = vst.msk [vmem:[%s8526_s7 + $0x1b8] sm:$0xff] %vm4479_vm5, %v10135_v49  ;;  %4533 = vst.msk [vmem:[%s8526_s7 + $0x1a8] sm:$0xff] %vm4479_vm5, %v10137_v54 }
 0x5b4   : > { %4856 = vst.msk [vmem:[%s8526_s7 + $0x1b8] sm:$0xff] %vm4800_vm6, %v10136_v40  ;;  %4854 = vst.msk [vmem:[%s8526_s7 + $0x1a8] sm:$0xff] %vm4800_vm6, %v10138_v23 }
 0x5b5   : > { %4921 = vst.msk [vmem:[%s8526_s7 + $0x1b8] sm:$0xff] %vm4865_vm7, %v5985_v30  ;;  %4919 = vst.msk [vmem:[%s8526_s7 + $0x1a8] sm:$0xff] %vm4865_vm7, %v5985_v30 }
 0x5b6   : > { %3896 = vst.msk [vmem:[%s8526_s7 + $0x1d0] sm:$0xff] %vm3837_vm3, %v3815_v24  ;;  %3894 = vst.msk [vmem:[%s8526_s7 + $0x1c0] sm:$0xff] %vm3837_vm3, %v3807_v51 }
 0x5b7   : > { %4217 = vst.msk [vmem:[%s8526_s7 + $0x1d0] sm:$0xff] %vm4158_vm4, %v4083_v18  ;;  %4215 = vst.msk [vmem:[%s8526_s7 + $0x1c0] sm:$0xff] %vm4158_vm4, %v4079_v56 }
 0x5b8   : > { %4538 = vst.msk [vmem:[%s8526_s7 + $0x1d0] sm:$0xff] %vm4479_vm5, %v10139_v5  ;;  %4536 = vst.msk [vmem:[%s8526_s7 + $0x1c0] sm:$0xff] %vm4479_vm5, %v10141_v48 }
 0x5b9   : > { %4859 = vst.msk [vmem:[%s8526_s7 + $0x1d0] sm:$0xff] %vm4800_vm6, %v10140_v59  ;;  %4857 = vst.msk [vmem:[%s8526_s7 + $0x1c0] sm:$0xff] %vm4800_vm6, %v10142_v10 }
 0x5ba   : > { %4924 = vst.msk [vmem:[%s8526_s7 + $0x1d0] sm:$0xff] %vm4865_vm7, %v5985_v30  ;;  %4922 = vst.msk [vmem:[%s8526_s7 + $0x1c0] sm:$0xff] %vm4865_vm7, %v5985_v30 }
 0x5bb   : > { %3897 = vst.msk [vmem:[%s8526_s7 + $0x1d8] sm:$0xff] %vm3837_vm3, %v3818_v4  ;;  %3895 = vst.msk [vmem:[%s8526_s7 + $0x1c8] sm:$0xff] %vm3837_vm3, %v3810_v26 }
 0x5bc   : > { %4218 = vst.msk [vmem:[%s8526_s7 + $0x1d8] sm:$0xff] %vm4158_vm4, %v4085_v22  ;;  %4216 = vst.msk [vmem:[%s8526_s7 + $0x1c8] sm:$0xff] %vm4158_vm4, %v4081_v38 }
 0x5bd   : > { %4539 = vst.msk [vmem:[%s8526_s7 + $0x1d8] sm:$0xff] %vm4479_vm5, %v10143_v57  ;;  %4537 = vst.msk [vmem:[%s8526_s7 + $0x1c8] sm:$0xff] %vm4479_vm5, %v10145_v52 }
 0x5be   : > { %4860 = vst.msk [vmem:[%s8526_s7 + $0x1d8] sm:$0xff] %vm4800_vm6, %v10144_v60  ;;  %4858 = vst.msk [vmem:[%s8526_s7 + $0x1c8] sm:$0xff] %vm4800_vm6, %v10146_v62 }
 0x5bf   : > { %4925 = vst.msk [vmem:[%s8526_s7 + $0x1d8] sm:$0xff] %vm4865_vm7, %v5985_v30  ;;  %4923 = vst.msk [vmem:[%s8526_s7 + $0x1c8] sm:$0xff] %vm4865_vm7, %v5985_v30 }
 0x5d2   : > { %v5698_v28 = vpop.f32.mrf.mxu0 }
 0x5d3   : > { %v3831_v25 = vadd.f32 %v5698_v28, %v8521_v50 }
 0x5d4   : > { %v3822_v36 = vpop.f32.mrf.mxu0 }
 0x5d5   : > { %3900 = vst.msk [vmem:[%s8526_s7 + $0x1f0] sm:$0xff] %vm3837_vm3, %v3831_v25  ;;  %v3823_v12 = vadd.f32 %v8521_v50, %v3822_v36 }
 0x5d6   : > { %4221 = vst.msk [vmem:[%s8526_s7 + $0x1f0] sm:$0xff] %vm4158_vm4, %v4091_v16  ;;  %v5699_v27 = vpop.f32.mrf.mxu0 }
 0x5d7   : > { %4542 = vst.msk [vmem:[%s8526_s7 + $0x1f0] sm:$0xff] %vm4479_vm5, %v10147_v37  ;;  %v3834_v42 = vadd.f32 %v5699_v27, %v8521_v50 }
 0x5d8   : > { %3898 = vst.msk [vmem:[%s8526_s7 + $0x1e0] sm:$0xff] %vm3837_vm3, %v3823_v12  ;;  %v3825_v47 = vpop.f32.mrf.mxu0 }
 0x5d9   : > { %4863 = vst.msk [vmem:[%s8526_s7 + $0x1f0] sm:$0xff] %vm4800_vm6, %v4733_v20  ;;  %v3826_v11 = vadd.f32 %v8521_v50, %v3825_v47  ;;  %v10151_v50 = vld [vmem:[#allocation57_spill] sm:$0xff] }
 0x5da   : > { %4219 = vst.msk [vmem:[%s8526_s7 + $0x1e0] sm:$0xff] %vm4158_vm4, %v4087_v9 }
 0x5db   : > { %4928 = vst.msk [vmem:[%s8526_s7 + $0x1f0] sm:$0xff] %vm4865_vm7, %v5985_v30 }
 0x5dc   : > { %4540 = vst.msk [vmem:[%s8526_s7 + $0x1e0] sm:$0xff] %vm4479_vm5, %v10148_v6 }
 0x5dd   : > { %3901 = vst.msk [vmem:[%s8526_s7 + $0x1f8] sm:$0xff] %vm3837_vm3, %v3834_v42  ;;  %3899 = vst.msk [vmem:[%s8526_s7 + $0x1e8] sm:$0xff] %vm3837_vm3, %v3826_v11 }
 0x5de   : > { %4861 = vst.msk [vmem:[%s8526_s7 + $0x1e0] sm:$0xff] %vm4800_vm6, %v10149_v58 }
 0x5df   : > { %4222 = vst.msk [vmem:[%s8526_s7 + $0x1f8] sm:$0xff] %vm4158_vm4, %v4093_v0  ;;  %4220 = vst.msk [vmem:[%s8526_s7 + $0x1e8] sm:$0xff] %vm4158_vm4, %v4089_v63 }
 0x5e0   : > { %4926 = vst.msk [vmem:[%s8526_s7 + $0x1e0] sm:$0xff] %vm4865_vm7, %v5985_v30 }
 0x5e1   : > { %4543 = vst.msk [vmem:[%s8526_s7 + $0x1f8] sm:$0xff] %vm4479_vm5, %v10150_v15  ;;  %4541 = vst.msk [vmem:[%s8526_s7 + $0x1e8] sm:$0xff] %vm4479_vm5, %v10151_v50 }
 0x5e2   : > { %4864 = vst.msk [vmem:[%s8526_s7 + $0x1f8] sm:$0xff] %vm4800_vm6, %v4735_v13  ;;  %4862 = vst.msk [vmem:[%s8526_s7 + $0x1e8] sm:$0xff] %vm4800_vm6, %v10152_v45 }
 0x5e3   : > { %4929 = vst.msk [vmem:[%s8526_s7 + $0x1f8] sm:$0xff] %vm4865_vm7, %v5985_v30  ;;  %4927 = vst.msk [vmem:[%s8526_s7 + $0x1e8] sm:$0xff] %vm4865_vm7, %v5985_v30 }
 0x5e4   : > { %5931 = shalt.err (!%p5928_p3)
}
 0x5e5   : > { %s5932_s27 = scalar_lea.hbm %s9514_s11, 8192  ;;  %s5936_s4 = scalar_lea.hbm %s9576_s3, 32768 }
 0x5e6   : > { %p5933_p4 = scmp.ne.s32.totalorder %s9514_s11, %s5932_s27  ;;  %p5937_p9 = scmp.lt.s32.totalorder %s9514_s11, %s9576_s3 }
 0x5e7   : > { %p5938_p10 = scmp.lt.s32.totalorder %s5936_s4, %s5932_s27 }
 0x5e8   : > { %p5934_p7 = pnand %p5933_p4, %p6046_p5 }
 0x5e9   : > { %p5939_p11 = por %p5938_p10, %p5937_p9 }
 0x5ea   : > { %p5935_p8 = pneg %p5934_p7 }
 0x5ec   : > { %p5940_p12 = pnand %p5939_p11, %p5935_p8 }
 0x5ee   : > { %5943 = shalt.err (!%p5940_p12)
}
 0x5ef   : > { %s5987_s6 = smov 128  }
 0x5f0   : > { %5705 = dma.vmem_to_hbm [thread:$0]  (%p6046_p5), %s9522_s9, 8192, %s9514_s11, %s9532_s17, %s5987_s6, %s5987_s6, %s5981_s20  }
 0x5f1 PF: > { %p5711_p13 = scmp.ge.s32.totalorder %s5978_s15, 2  ;;  %s4959_s7 = sand.u32 1, %s5966_s12  }
 0x5f2   : > { %s4960_s8 = scalar_lea.sflag [#allocation3], %s4959_s7 }
 0x5f3   : > { %p5708_p0 = pnand %p5711_p13, %p6050_p6 }
 0x5f5   : > { %p5709_p1 = pneg %p5708_p0 }
 0x5f7   : > { %5961 = dma.done.wait (%p5709_p1), %s4960_s8, 8192  }
 0x5f8   : > { %5963 = vsyncadd (%p5709_p1), %s4960_s8, 4294959104  ;;  %p13_p2 = scmp.ge.s32.totalorder %s6033_s18, 6   ;;  %s10153_s12 = smov %s5970_s13 }
 0x5f9   : > { %s10154_s13 = smov %s5974_s14  ;;  %s10155_s14 = smov %s6044_s21 }
 0x5fa   : > { %s10156_s15 = smov %s6033_s18  ;;  %15 = sbr.rel (!%p13_p2) target bundleno = 3 (0x3), region = 67 }
 0x5ff   :  { %4965 = vsyncpa [#allocation3], 1 }
 0x600   :  { %4967 = vsyncpa [#allocation3 + $0x1], 1 }

</bundles_post_ra>
